<compile_context>
chip_gen: v6e
topology: v6e:2x2x1
jax: 0.10.0
libtpu: 0.0.40
codegen_flags: <defaults>
</compile_context>

<pallas_src>
import functools

import jax
import jax.numpy as jnp
from jax.experimental import pallas as pl
from jax.experimental.pallas import tpu as pltpu


def _round_up(x, m):
    return ((x + m - 1) // m) * m


# --------------------------------------------------------------------------
# Fused kernel
# --------------------------------------------------------------------------
def _fused_gru_kernel(x_ref, h0_ref, wih_ref, whh_ref, bgi_ref, bhn_ref,
                      y_ref, hN_ref, h_scratch, *, tc, bp, hp, pad_start):
    """All four ComplexGRU streams, one chunk of `tc` timesteps per grid step.

    Row layout (2bp rows): rows [0:bp] = x.real streams, [bp:2bp] = x.imag.
    Col layout (2hp cols / gate): cols [0:hp] = gru_r, [hp:2hp] = gru_i.
    bp % 8 == 0 and hp % 128 == 0, so all slices below are aligned vreg views.

      x_ref   : (tc*2bp, I)    bf16  stacked inputs for this chunk (time-major)
      h0_ref  : (2bp, 2hp)     f32   initial hidden
      wih_ref : (I, 6hp)       bf16  input weights, cols = [r_r|r_i|z_r|z_i|n_r|n_i]
      whh_ref : (2hp, 6hp)     bf16  block-diagonal hidden weights (same col layout)
      bgi_ref : (1, 6hp)       f32   b_ih (+ b_hh folded in for the r,z gates)
      bhn_ref : (1, 2hp)       f32   b_hh of the n gate only
      y_ref   : (tc, bp, 2hp)  f32   output chunk, cols [0:hp]=Re(y), [hp:2hp]=Im(y)
      hN_ref  : (2bp, 2hp)     f32   final hidden
      h_scratch: VMEM (2bp, 2hp) f32  hidden state carried across chunks
    """
    c = pl.program_id(0)
    b2 = 2 * bp
    h2 = 2 * hp

    @pl.when(c == 0)
    def _():
        h_scratch[...] = h0_ref[...]

    # Hoisted input projection for the whole chunk: one MXU pass with
    # M = tc*2bp rows instead of tc tiny matmuls.  bf16 x bf16 -> f32.
    gi = jnp.dot(x_ref[...], wih_ref[...],
                 preferred_element_type=jnp.float32) + bgi_ref[...]   # (tc*2bp, 6hp)

    whh = whh_ref[...]                                   # (2hp, 6hp) bf16, resident
    # Hoist the bias broadcast out of the unrolled loop (JAX does not CSE
    # broadcast_in_dim, so leaving it inside re-emits it every step).
    bhn = jnp.broadcast_to(bhn_ref[...], (b2, h2))       # (2bp, 2hp) f32
    h = h_scratch[...]                                   # (2bp, 2hp) f32

    is_last_chunk = None
    if pad_start is not None:
        is_last_chunk = c == pl.num_programs(0) - 1

    # Static unroll over the chunk; the only serial work per step is the
    # (2bp, 2hp) @ (2hp, 6hp) hidden matmul + VPU/EUP gate math.
    for s in range(tc):
        # 2bp is a multiple of 8 -> sublane-aligned free view of gi.
        gi_t = gi[s * b2:(s + 1) * b2, :]                          # (2bp, 6hp)
        gh = jnp.dot(h.astype(jnp.bfloat16), whh,
                     preferred_element_type=jnp.float32)           # (2bp, 6hp)

        # Gate-column slices are multiples of hp (=k*128) -> lane-aligned views.
        rz = jax.nn.sigmoid(gi_t[:, :2 * h2] + gh[:, :2 * h2])     # r|z gates
        r = rz[:, :h2]
        z = rz[:, h2:]
        n = jnp.tanh(gi_t[:, 2 * h2:] + r * (gh[:, 2 * h2:] + bhn))
        # Algebraic rewrite of (1-z)*n + z*h: one fewer op on the serial chain.
        h_new = n + z * (h - n)                                    # (2bp, 2hp)

        if pad_start is not None and s >= pad_start:
            # Only statically-padded step positions carry a select, and only
            # the last chunk actually holds the previous hidden state.
            h = jnp.where(is_last_chunk, h, h_new)
        else:
            h = h_new

        # In-kernel complex combine:  y = (Frr - Fii) + i (Fri + Fir).
        # With bp%8==0 and hp%128==0 these are plain vreg selects (no XLU),
        # and the store below is a full, unmasked (bp, 2hp) tile store.
        y_re = h_new[:bp, :hp] - h_new[bp:, hp:]                   # Frr - Fii
        y_im = h_new[:bp, hp:] + h_new[bp:, :hp]                   # Fri + Fir
        y_ref[s] = jnp.concatenate([y_re, y_im], axis=-1).astype(y_ref.dtype)

    h_scratch[...] = h
    # Cheap (2bp, 2hp) write every chunk; final HBM content = last chunk's h.
    hN_ref[...] = h.astype(hN_ref.dtype)


def _complex_gru_pallas(x2d, h0, wih, whh, bgi, bhn, *, T, T_pad, Tc, Bp, Hp, I):
    n_chunks = T_pad // Tc
    pad_start = None if T_pad == T else T - (n_chunks - 1) * Tc
    kernel = functools.partial(
        _fused_gru_kernel, tc=Tc, bp=Bp, hp=Hp, pad_start=pad_start)

    # Explicit VMEM budget (double-buffered blocks + gi intermediate + scratch)
    # so larger time chunks don't trip the default scoped-VMEM limit.
    blk_x = Tc * 2 * Bp * I * 2
    blk_y = Tc * Bp * 2 * Hp * 4
    blk_h = 2 * Bp * 2 * Hp * 4
    blk_w = (I * 6 * Hp + 2 * Hp * 6 * Hp) * 2
    blk_b = (6 * Hp + 2 * Hp) * 4
    gi_tmp = Tc * 2 * Bp * 6 * Hp * 4
    vmem_need = 2 * (blk_x + blk_y + 2 * blk_h + blk_w + blk_b) + blk_h + gi_tmp
    vmem_limit = min(max(int(1.5 * vmem_need) + (8 << 20), 32 << 20), 100 << 20)

    grid_spec = pltpu.PrefetchScalarGridSpec(
        num_scalar_prefetch=0,
        grid=(n_chunks,),
        in_specs=[
            pl.BlockSpec((Tc * 2 * Bp, I), lambda c: (c, 0)),        # x chunk
            pl.BlockSpec((2 * Bp, 2 * Hp), lambda c: (0, 0)),        # h0
            pl.BlockSpec((I, 6 * Hp), lambda c: (0, 0)),             # W_ih packed
            pl.BlockSpec((2 * Hp, 6 * Hp), lambda c: (0, 0)),        # W_hh blockdiag
            pl.BlockSpec((1, 6 * Hp), lambda c: (0, 0)),             # bias (gi)
            pl.BlockSpec((1, 2 * Hp), lambda c: (0, 0)),             # bias (n-gate hh)
        ],
        out_specs=[
            pl.BlockSpec((Tc, Bp, 2 * Hp), lambda c: (c, 0, 0)),     # y (time-major)
            pl.BlockSpec((2 * Bp, 2 * Hp), lambda c: (0, 0)),        # final hidden
        ],
        scratch_shapes=[pltpu.VMEM((2 * Bp, 2 * Hp), jnp.float32)],  # carried h
    )

    y, hN = pl.pallas_call(
        kernel,
        out_shape=(
            jax.ShapeDtypeStruct((T_pad, Bp, 2 * Hp), jnp.float32),
            jax.ShapeDtypeStruct((2 * Bp, 2 * Hp), jnp.float32),
        ),
        grid_spec=grid_spec,
        compiler_params=pltpu.CompilerParams(
            # Time recurrence (hidden state carried in scratch): must stay
            # sequential.  Never mark this axis "parallel".
            dimension_semantics=("arbitrary",),
            vmem_limit_bytes=vmem_limit),
    )(x2d, h0, wih, whh, bgi, bhn)
    return y, hN


# --------------------------------------------------------------------------
# Parameters (nn.GRU layout) and one-time packing into the fused layout
# --------------------------------------------------------------------------
def init_gru_params(key, input_size, hidden_size):
    """nn.GRU-layout params: W_ih (3H,I), W_hh (3H,H), b_ih (3H,), b_hh (3H,)."""
    k = 1.0 / jnp.sqrt(jnp.float32(hidden_size))
    k1, k2, k3, k4 = jax.random.split(key, 4)
    return {
        "w_ih": jax.random.uniform(k1, (3 * hidden_size, input_size), jnp.float32, -k, k),
        "w_hh": jax.random.uniform(k2, (3 * hidden_size, hidden_size), jnp.float32, -k, k),
        "b_ih": jax.random.uniform(k3, (3 * hidden_size,), jnp.float32, -k, k),
        "b_hh": jax.random.uniform(k4, (3 * hidden_size,), jnp.float32, -k, k),
    }


def pack_complex_gru_params(params_r, params_i):
    """Pack gru_r / gru_i weights into the fused, lane/sublane-aligned layout.

    Called ONCE at init (outside the jitted forward).  H is padded to a
    multiple of 128 so every in-kernel gate/combine slice is a free vreg view;
    padded positions carry zero weights/biases and stay exactly zero.
    """
    H = params_r["w_hh"].shape[-1]
    I = params_r["w_ih"].shape[-1]
    Hp = _round_up(H, 128)

    # Input weights: (I, 6Hp), columns = [r_r | r_i | z_r | z_i | n_r | n_i].
    def pad_ih(p):
        return jnp.pad(p["w_ih"].reshape(3, H, I), ((0, 0), (0, Hp - H), (0, 0)))
    wr, wi = pad_ih(params_r), pad_ih(params_i)
    wih = jnp.stack([wr, wi], axis=1).reshape(6 * Hp, I).T            # (I, 6Hp)

    # Hidden weights: block diagonal (2Hp, 6Hp). Rows [0:Hp] (gru_r hidden)
    # only feed the *_r gate columns, rows [Hp:2Hp] only the *_i ones.
    def pad_hh(p):
        return jnp.pad(p["w_hh"].reshape(3, H, H), ((0, 0), (0, Hp - H), (0, Hp - H)))
    hr, hi = pad_hh(params_r), pad_hh(params_i)
    zz = jnp.zeros_like(hr)
    top = jnp.stack([hr, zz], axis=1).reshape(6 * Hp, Hp).T           # (Hp, 6Hp)
    bot = jnp.stack([zz, hi], axis=1).reshape(6 * Hp, Hp).T           # (Hp, 6Hp)
    whh = jnp.concatenate([top, bot], axis=0)                         # (2Hp, 6Hp)

    # Biases: fold b_hh into b_ih for the r/z gates (they add outside the
    # nonlinearity); keep the n-gate hidden bias separate (inside r*(.)).
    def gi_bias(p):
        bi = p["b_ih"].reshape(3, H)
        bh = p["b_hh"].reshape(3, H)
        fold = jnp.array([1.0, 1.0, 0.0], jnp.float32).reshape(3, 1)
        return jnp.pad(bi + fold * bh, ((0, 0), (0, Hp - H)))
    bgi = jnp.stack([gi_bias(params_r), gi_bias(params_i)], axis=1).reshape(1, 6 * Hp)

    def n_bias(p):
        return jnp.pad(p["b_hh"][2 * H:3 * H], (0, Hp - H))
    bhn = jnp.concatenate([n_bias(params_r), n_bias(params_i)]).reshape(1, 2 * Hp)

    return {
        "wih": wih.astype(jnp.bfloat16),   # bf16 matmul operands (f32 accumulate)
        "whh": whh.astype(jnp.bfloat16),
        "bgi": bgi.astype(jnp.float32),
        "bhn": bhn.astype(jnp.float32),
    }


# --------------------------------------------------------------------------
# Public forward (matches ComplexGRU.forward)
# --------------------------------------------------------------------------
@functools.partial(jax.jit, static_argnames=("hidden_size", "time_chunk"))
def complex_gru_forward(x, packed, hidden_size,
                        h_rr=None, h_ir=None, h_ri=None, h_ii=None,
                        time_chunk=32):
    """x: complex64 (B, T, I) batch_first.  packed: pack_complex_gru_params(...).
    h_*: optional (1, B, H) f32.
    Returns (y complex64 (B, T, H), h_rr, h_ir, h_ri, h_ii each (1, B, H))."""
    B, T, I = x.shape
    H = hidden_size
    Hp = packed["bhn"].shape[-1] // 2
    Bp = _round_up(B, 8)          # sublane-aligned batch rows per stream

    # Time chunk: amortize grid-step overhead (~0.35 us/step).  Default 32 is
    # fine on 128 MiB VMEM (v5e/v6e); the vmem_limit budget covers v7x too.
    Tc = min(time_chunk, T)
    n_chunks = -(-T // Tc)
    T_pad = n_chunks * Tc

    # Stack real/imag along batch (rows [0:Bp]=real, [Bp:2Bp]=imag), time-major,
    # zero-pad batch to Bp and time to T_pad, flatten to (T_pad*2Bp, I) so the
    # in-kernel chunk projection is a plain 2-D matmul with no reshape.
    xr = jnp.transpose(jnp.real(x).astype(jnp.float32), (1, 0, 2))   # (T, B, I)
    xi = jnp.transpose(jnp.imag(x).astype(jnp.float32), (1, 0, 2))
    pad = ((0, T_pad - T), (0, Bp - B), (0, 0))
    x_tb = jnp.concatenate([jnp.pad(xr, pad), jnp.pad(xi, pad)], axis=1)
    x2d = x_tb.reshape(T_pad * 2 * Bp, I).astype(jnp.bfloat16)

    # Hidden layout: rows [0:Bp]=real-input streams, [Bp:2Bp]=imag-input
    # streams; cols [0:Hp]=gru_r, [Hp:2Hp]=gru_i.  Padded rows/cols start 0.
    h0 = jnp.zeros((2 * Bp, 2 * Hp), jnp.float32)

    def put(buf, r0, c0, hinit):
        if hinit is None:
            return buf
        return buf.at[r0:r0 + B, c0:c0 + H].set(hinit[0].astype(jnp.float32))

    h0 = put(h0, 0, 0, h_rr)      # real input  -> gru_r
    h0 = put(h0, Bp, 0, h_ir)     # imag input  -> gru_r
    h0 = put(h0, 0, Hp, h_ri)     # real input  -> gru_i
    h0 = put(h0, Bp, Hp, h_ii)    # imag input  -> gru_i

    y_slab, hN = _complex_gru_pallas(
        x2d, h0, packed["wih"], packed["whh"], packed["bgi"], packed["bhn"],
        T=T, T_pad=T_pad, Tc=Tc, Bp=Bp, Hp=Hp, I=I)

    # y comes back time-major (T_pad, Bp, 2Hp): one wrapper transpose, then
    # split the lane-concatenated Re|Im halves.
    y_bt = jnp.transpose(y_slab[:T, :B, :], (1, 0, 2))               # (B, T, 2Hp)
    y = jax.lax.complex(y_bt[..., :H], y_bt[..., Hp:Hp + H])         # (B, T, H)

    expand = lambda h: h[None]                                       # -> (1, B, H)
    return (y,
            expand(hN[:B, :H]),           # h_rr
            expand(hN[Bp:Bp + B, :H]),    # h_ir
            expand(hN[:B, Hp:Hp + H]),    # h_ri
            expand(hN[Bp:Bp + B, Hp:Hp + H]))  # h_ii


# --------------------------------------------------------------------------
# Pure-JAX reference (PyTorch GRU semantics, same precision policy: bf16
# matmul operands, f32 accumulate / elementwise)
# --------------------------------------------------------------------------
def _gru_ref(x_bti, h0, w_ih, w_hh, b_ih, b_hh):
    H = w_hh.shape[-1]
    wih_t = w_ih.T.astype(jnp.bfloat16)
    whh_t = w_hh.T.astype(jnp.bfloat16)

    def step(h, x_t):
        gi = jnp.dot(x_t.astype(jnp.bfloat16), wih_t,
                     preferred_element_type=jnp.float32) + b_ih
        gh = jnp.dot(h.astype(jnp.bfloat16), whh_t,
                     preferred_element_type=jnp.float32) + b_hh
        r = jax.nn.sigmoid(gi[:, :H] + gh[:, :H])
        z = jax.nn.sigmoid(gi[:, H:2 * H] + gh[:, H:2 * H])
        n = jnp.tanh(gi[:, 2 * H:] + r * gh[:, 2 * H:])
        h = (1.0 - z) * n + z * h
        return h, h

    hN, ys = jax.lax.scan(step, h0, jnp.transpose(x_bti, (1, 0, 2)))
    return jnp.transpose(ys, (1, 0, 2)), hN


if __name__ == "__main__":
    B, T, I, H = 2, 8, 16, 32

    key = jax.random.PRNGKey(0)
    k_xr, k_xi, k_pr, k_pi = jax.random.split(key, 4)

    x = jax.lax.complex(
        jax.random.normal(k_xr, (B, T, I), jnp.float32),
        jax.random.normal(k_xi, (B, T, I), jnp.float32))

    params_r = init_gru_params(k_pr, I, H)
    params_i = init_gru_params(k_pi, I, H)

    # Pack ONCE at init (hoisted out of the jitted forward per review).
    packed = pack_complex_gru_params(params_r, params_i)

    y, h_rr, h_ir, h_ri, h_ii = complex_gru_forward(x, packed, hidden_size=H)
    jax.block_until_ready((y, h_rr, h_ir, h_ri, h_ii))

    # Reference: four plain GRU runs + complex combine (PyTorch semantics).
    h0 = jnp.zeros((B, H), jnp.float32)
    xr, xi = jnp.real(x), jnp.imag(x)
    pr, pi = params_r, params_i
    Frr, hrr_ref = _gru_ref(xr, h0, pr["w_ih"], pr["w_hh"], pr["b_ih"], pr["b_hh"])
    Fir, hir_ref = _gru_ref(xi, h0, pr["w_ih"], pr["w_hh"], pr["b_ih"], pr["b_hh"])
    Fri, hri_ref = _gru_ref(xr, h0, pi["w_ih"], pi["w_hh"], pi["b_ih"], pi["b_hh"])
    Fii, hii_ref = _gru_ref(xi, h0, pi["w_ih"], pi["w_hh"], pi["b_ih"], pi["b_hh"])
    y_ref = jax.lax.complex(Frr - Fii, Fri + Fir)

    assert y.shape == (B, T, H) and y.dtype == jnp.complex64
    for h in (h_rr, h_ir, h_ri, h_ii):
        assert h.shape == (1, B, H)
    assert jnp.allclose(y, y_ref, atol=5e-3, rtol=5e-3)
    assert jnp.allclose(h_rr[0], hrr_ref, atol=5e-3, rtol=5e-3)
    assert jnp.allclose(h_ir[0], hir_ref, atol=5e-3, rtol=5e-3)
    assert jnp.allclose(h_ri[0], hri_ref, atol=5e-3, rtol=5e-3)
    assert jnp.allclose(h_ii[0], hii_ref, atol=5e-3, rtol=5e-3)

    print("KERNEL_OK")
</pallas_src>

<mosaic_0001>
module attributes {stable_mosaic.version = 11 : i64} {
  func.func @_fused_gru_kernel(%arg0: i32, %arg1: memref<128x16xbf16, #tpu.memory_space<vmem>>, %arg2: memref<16x256xf32, #tpu.memory_space<vmem>>, %arg3: memref<16x768xbf16, #tpu.memory_space<vmem>>, %arg4: memref<256x768xbf16, #tpu.memory_space<vmem>>, %arg5: memref<1x768xf32, #tpu.memory_space<vmem>>, %arg6: memref<1x256xf32, #tpu.memory_space<vmem>>, %arg7: memref<8x8x256xf32, #tpu.memory_space<vmem>>, %arg8: memref<16x256xf32, #tpu.memory_space<vmem>>, %arg9: memref<16x256xf32, #tpu.memory_space<vmem>>) attributes {dimension_semantics = [#tpu.dimension_semantics<arbitrary>], iteration_bounds = array<i64: 1>, scalar_prefetch = 0 : i64, scratch_operands = 1 : i64, tpu.core_type = #tpu.core_type<tc>, window_params = [{transform_indices = @transform_0, window_bounds = array<i64: 128, 16>}, {pipeline_mode = #tpu.pipeline_mode<synchronous>, transform_indices = @transform_1, window_bounds = array<i64: 16, 256>}, {pipeline_mode = #tpu.pipeline_mode<synchronous>, transform_indices = @transform_2, window_bounds = array<i64: 16, 768>}, {pipeline_mode = #tpu.pipeline_mode<synchronous>, transform_indices = @transform_3, window_bounds = array<i64: 256, 768>}, {pipeline_mode = #tpu.pipeline_mode<synchronous>, transform_indices = @transform_4, window_bounds = array<i64: 1, 768>}, {pipeline_mode = #tpu.pipeline_mode<synchronous>, transform_indices = @transform_5, window_bounds = array<i64: 1, 256>}, {transform_indices = @transform_6, window_bounds = array<i64: 8, 8, 256>}, {pipeline_mode = #tpu.pipeline_mode<synchronous>, transform_indices = @transform_7, window_bounds = array<i64: 16, 256>}]} {
    %c0_i32 = arith.constant 0 : i32
    %0 = arith.cmpi eq, %arg0, %c0_i32 : i32
    %1 = arith.extui %0 : i1 to i32
    %c0_i32_0 = arith.constant 0 : i32
    %2 = arith.cmpi ne, %1, %c0_i32_0 : i32
    scf.if %2 {
      %c0_49 = arith.constant 0 : index
      %c0_50 = arith.constant 0 : index
      %272 = vector.load %arg2[%c0_49, %c0_50] : memref<16x256xf32, #tpu.memory_space<vmem>>, vector<16x256xf32>
      %c0_51 = arith.constant 0 : index
      %c0_52 = arith.constant 0 : index
      %273 = vector.load %arg9[%c0_51, %c0_52] : memref<16x256xf32, #tpu.memory_space<vmem>>, vector<16x256xf32>
      tpu.vector_store %arg9[%c0_51, %c0_52], %272 {strides = array<i32>} : memref<16x256xf32, #tpu.memory_space<vmem>>, vector<16x256xf32>,
    } else {
    }
    %c0 = arith.constant 0 : index
    %c0_1 = arith.constant 0 : index
    %3 = vector.load %arg1[%c0, %c0_1] : memref<128x16xbf16, #tpu.memory_space<vmem>>, vector<128x16xbf16>
    %c0_2 = arith.constant 0 : index
    %c0_3 = arith.constant 0 : index
    %4 = vector.load %arg3[%c0_2, %c0_3] : memref<16x768xbf16, #tpu.memory_space<vmem>>, vector<16x768xbf16>
    %cst = arith.constant dense<0.000000e+00> : vector<128x768xf32>
    %5 = tpu.matmul %3, %4, %cst {dimension_numbers = #tpu.dot_dimension_numbers<[1], [0], [0], [1], [0, 0, 1, 1], [], []>} : vector<128x16xbf16>, vector<16x768xbf16>, vector<128x768xf32> -> vector<128x768xf32>
    %c0_4 = arith.constant 0 : index
    %c0_5 = arith.constant 0 : index
    %6 = vector.load %arg5[%c0_4, %c0_5] : memref<1x768xf32, #tpu.memory_space<vmem>>, vector<1x768xf32>
    %7 = vector.broadcast %6 : vector<1x768xf32> to vector<128x768xf32>
    %8 = arith.addf %5, %7 : vector<128x768xf32>
    %c0_6 = arith.constant 0 : index
    %c0_7 = arith.constant 0 : index
    %9 = vector.load %arg4[%c0_6, %c0_7] : memref<256x768xbf16, #tpu.memory_space<vmem>>, vector<256x768xbf16>
    %c0_8 = arith.constant 0 : index
    %c0_9 = arith.constant 0 : index
    %10 = vector.load %arg6[%c0_8, %c0_9] : memref<1x256xf32, #tpu.memory_space<vmem>>, vector<1x256xf32>
    %11 = vector.shape_cast %10 : vector<1x256xf32> to vector<1x256xf32>
    %12 = vector.broadcast %11 : vector<1x256xf32> to vector<16x256xf32>
    %c0_10 = arith.constant 0 : index
    %c0_11 = arith.constant 0 : index
    %13 = vector.load %arg9[%c0_10, %c0_11] : memref<16x256xf32, #tpu.memory_space<vmem>>, vector<16x256xf32>
    %14 = vector.extract_strided_slice %8 {offsets = [0, 0], sizes = [16, 768], strides = [1, 1]} : vector<128x768xf32> to vector<16x768xf32>
    %15 = arith.truncf %13 : vector<16x256xf32> to vector<16x256xbf16>
    %cst_12 = arith.constant dense<0.000000e+00> : vector<16x768xf32>
    %16 = tpu.matmul %15, %9, %cst_12 {dimension_numbers = #tpu.dot_dimension_numbers<[1], [0], [0], [1], [0, 0, 1, 1], [], []>} : vector<16x256xbf16>, vector<256x768xbf16>, vector<16x768xf32> -> vector<16x768xf32>
    %17 = vector.extract_strided_slice %14 {offsets = [0, 0], sizes = [16, 512], strides = [1, 1]} : vector<16x768xf32> to vector<16x512xf32>
    %18 = vector.extract_strided_slice %16 {offsets = [0, 0], sizes = [16, 512], strides = [1, 1]} : vector<16x768xf32> to vector<16x512xf32>
    %19 = arith.addf %17, %18 : vector<16x512xf32>
    %20 = arith.negf %19 : vector<16x512xf32>
    %21 = math.exp %20 : vector<16x512xf32>
    %cst_13 = arith.constant 1.000000e+00 : f32
    %22 = vector.broadcast %cst_13 : f32 to vector<16x512xf32>
    %23 = arith.addf %22, %21 : vector<16x512xf32>
    %24 = arith.divf %22, %23 : vector<16x512xf32>
    %25 = vector.extract_strided_slice %24 {offsets = [0, 0], sizes = [16, 256], strides = [1, 1]} : vector<16x512xf32> to vector<16x256xf32>
    %26 = vector.extract_strided_slice %24 {offsets = [0, 256], sizes = [16, 256], strides = [1, 1]} : vector<16x512xf32> to vector<16x256xf32>
    %27 = vector.extract_strided_slice %14 {offsets = [0, 512], sizes = [16, 256], strides = [1, 1]} : vector<16x768xf32> to vector<16x256xf32>
    %28 = vector.extract_strided_slice %16 {offsets = [0, 512], sizes = [16, 256], strides = [1, 1]} : vector<16x768xf32> to vector<16x256xf32>
    %29 = arith.addf %28, %12 : vector<16x256xf32>
    %30 = arith.mulf %25, %29 : vector<16x256xf32>
    %31 = arith.addf %27, %30 : vector<16x256xf32>
    %32 = math.tanh %31 : vector<16x256xf32>
    %33 = arith.subf %13, %32 : vector<16x256xf32>
    %34 = arith.mulf %26, %33 : vector<16x256xf32>
    %35 = arith.addf %32, %34 : vector<16x256xf32>
    %36 = vector.extract_strided_slice %35 {offsets = [0, 0], sizes = [8, 128], strides = [1, 1]} : vector<16x256xf32> to vector<8x128xf32>
    %37 = vector.extract_strided_slice %35 {offsets = [8, 128], sizes = [8, 128], strides = [1, 1]} : vector<16x256xf32> to vector<8x128xf32>
    %38 = arith.subf %36, %37 : vector<8x128xf32>
    %39 = vector.extract_strided_slice %35 {offsets = [0, 128], sizes = [8, 128], strides = [1, 1]} : vector<16x256xf32> to vector<8x128xf32>
    %40 = vector.extract_strided_slice %35 {offsets = [8, 0], sizes = [8, 128], strides = [1, 1]} : vector<16x256xf32> to vector<8x128xf32>
    %41 = arith.addf %39, %40 : vector<8x128xf32>
    %42 = tpu.concatenate %38, %41 in 1 : vector<8x128xf32>, vector<8x128xf32> -> vector<8x256xf32>
    %c0_14 = arith.constant 0 : index
    %c0_15 = arith.constant 0 : index
    %c0_16 = arith.constant 0 : index
    %43 = vector.load %arg7[%c0_14, %c0_15, %c0_16] : memref<8x8x256xf32, #tpu.memory_space<vmem>>, vector<1x8x256xf32>
    %44 = vector.shape_cast %43 : vector<1x8x256xf32> to vector<8x256xf32>
    %45 = vector.shape_cast %42 : vector<8x256xf32> to vector<1x8x256xf32>
    tpu.vector_store %arg7[%c0_14, %c0_15, %c0_16], %45 {strides = array<i32>} : memref<8x8x256xf32, #tpu.memory_space<vmem>>, vector<1x8x256xf32>,
    %46 = vector.extract_strided_slice %8 {offsets = [16, 0], sizes = [16, 768], strides = [1, 1]} : vector<128x768xf32> to vector<16x768xf32>
    %47 = arith.truncf %35 : vector<16x256xf32> to vector<16x256xbf16>
    %cst_17 = arith.constant dense<0.000000e+00> : vector<16x768xf32>
    %48 = tpu.matmul %47, %9, %cst_17 {dimension_numbers = #tpu.dot_dimension_numbers<[1], [0], [0], [1], [0, 0, 1, 1], [], []>} : vector<16x256xbf16>, vector<256x768xbf16>, vector<16x768xf32> -> vector<16x768xf32>
    %49 = vector.extract_strided_slice %46 {offsets = [0, 0], sizes = [16, 512], strides = [1, 1]} : vector<16x768xf32> to vector<16x512xf32>
    %50 = vector.extract_strided_slice %48 {offsets = [0, 0], sizes = [16, 512], strides = [1, 1]} : vector<16x768xf32> to vector<16x512xf32>
    %51 = arith.addf %49, %50 : vector<16x512xf32>
    %52 = arith.negf %51 : vector<16x512xf32>
    %53 = math.exp %52 : vector<16x512xf32>
    %cst_18 = arith.constant 1.000000e+00 : f32
    %54 = vector.broadcast %cst_18 : f32 to vector<16x512xf32>
    %55 = arith.addf %54, %53 : vector<16x512xf32>
    %56 = arith.divf %54, %55 : vector<16x512xf32>
    %57 = vector.extract_strided_slice %56 {offsets = [0, 0], sizes = [16, 256], strides = [1, 1]} : vector<16x512xf32> to vector<16x256xf32>
    %58 = vector.extract_strided_slice %56 {offsets = [0, 256], sizes = [16, 256], strides = [1, 1]} : vector<16x512xf32> to vector<16x256xf32>
    %59 = vector.extract_strided_slice %46 {offsets = [0, 512], sizes = [16, 256], strides = [1, 1]} : vector<16x768xf32> to vector<16x256xf32>
    %60 = vector.extract_strided_slice %48 {offsets = [0, 512], sizes = [16, 256], strides = [1, 1]} : vector<16x768xf32> to vector<16x256xf32>
    %61 = arith.addf %60, %12 : vector<16x256xf32>
    %62 = arith.mulf %57, %61 : vector<16x256xf32>
    %63 = arith.addf %59, %62 : vector<16x256xf32>
    %64 = math.tanh %63 : vector<16x256xf32>
    %65 = arith.subf %35, %64 : vector<16x256xf32>
    %66 = arith.mulf %58, %65 : vector<16x256xf32>
    %67 = arith.addf %64, %66 : vector<16x256xf32>
    %68 = vector.extract_strided_slice %67 {offsets = [0, 0], sizes = [8, 128], strides = [1, 1]} : vector<16x256xf32> to vector<8x128xf32>
    %69 = vector.extract_strided_slice %67 {offsets = [8, 128], sizes = [8, 128], strides = [1, 1]} : vector<16x256xf32> to vector<8x128xf32>
    %70 = arith.subf %68, %69 : vector<8x128xf32>
    %71 = vector.extract_strided_slice %67 {offsets = [0, 128], sizes = [8, 128], strides = [1, 1]} : vector<16x256xf32> to vector<8x128xf32>
    %72 = vector.extract_strided_slice %67 {offsets = [8, 0], sizes = [8, 128], strides = [1, 1]} : vector<16x256xf32> to vector<8x128xf32>
    %73 = arith.addf %71, %72 : vector<8x128xf32>
    %74 = tpu.concatenate %70, %73 in 1 : vector<8x128xf32>, vector<8x128xf32> -> vector<8x256xf32>
    %c1 = arith.constant 1 : index
    %c0_19 = arith.constant 0 : index
    %c0_20 = arith.constant 0 : index
    %75 = vector.load %arg7[%c1, %c0_19, %c0_20] : memref<8x8x256xf32, #tpu.memory_space<vmem>>, vector<1x8x256xf32>
    %76 = vector.shape_cast %75 : vector<1x8x256xf32> to vector<8x256xf32>
    %77 = vector.shape_cast %74 : vector<8x256xf32> to vector<1x8x256xf32>
    tpu.vector_store %arg7[%c1, %c0_19, %c0_20], %77 {strides = array<i32>} : memref<8x8x256xf32, #tpu.memory_space<vmem>>, vector<1x8x256xf32>,
    %78 = vector.extract_strided_slice %8 {offsets = [32, 0], sizes = [16, 768], strides = [1, 1]} : vector<128x768xf32> to vector<16x768xf32>
    %79 = arith.truncf %67 : vector<16x256xf32> to vector<16x256xbf16>
    %cst_21 = arith.constant dense<0.000000e+00> : vector<16x768xf32>
    %80 = tpu.matmul %79, %9, %cst_21 {dimension_numbers = #tpu.dot_dimension_numbers<[1], [0], [0], [1], [0, 0, 1, 1], [], []>} : vector<16x256xbf16>, vector<256x768xbf16>, vector<16x768xf32> -> vector<16x768xf32>
    %81 = vector.extract_strided_slice %78 {offsets = [0, 0], sizes = [16, 512], strides = [1, 1]} : vector<16x768xf32> to vector<16x512xf32>
    %82 = vector.extract_strided_slice %80 {offsets = [0, 0], sizes = [16, 512], strides = [1, 1]} : vector<16x768xf32> to vector<16x512xf32>
    %83 = arith.addf %81, %82 : vector<16x512xf32>
    %84 = arith.negf %83 : vector<16x512xf32>
    %85 = math.exp %84 : vector<16x512xf32>
    %cst_22 = arith.constant 1.000000e+00 : f32
    %86 = vector.broadcast %cst_22 : f32 to vector<16x512xf32>
    %87 = arith.addf %86, %85 : vector<16x512xf32>
    %88 = arith.divf %86, %87 : vector<16x512xf32>
    %89 = vector.extract_strided_slice %88 {offsets = [0, 0], sizes = [16, 256], strides = [1, 1]} : vector<16x512xf32> to vector<16x256xf32>
    %90 = vector.extract_strided_slice %88 {offsets = [0, 256], sizes = [16, 256], strides = [1, 1]} : vector<16x512xf32> to vector<16x256xf32>
    %91 = vector.extract_strided_slice %78 {offsets = [0, 512], sizes = [16, 256], strides = [1, 1]} : vector<16x768xf32> to vector<16x256xf32>
    %92 = vector.extract_strided_slice %80 {offsets = [0, 512], sizes = [16, 256], strides = [1, 1]} : vector<16x768xf32> to vector<16x256xf32>
    %93 = arith.addf %92, %12 : vector<16x256xf32>
    %94 = arith.mulf %89, %93 : vector<16x256xf32>
    %95 = arith.addf %91, %94 : vector<16x256xf32>
    %96 = math.tanh %95 : vector<16x256xf32>
    %97 = arith.subf %67, %96 : vector<16x256xf32>
    %98 = arith.mulf %90, %97 : vector<16x256xf32>
    %99 = arith.addf %96, %98 : vector<16x256xf32>
    %100 = vector.extract_strided_slice %99 {offsets = [0, 0], sizes = [8, 128], strides = [1, 1]} : vector<16x256xf32> to vector<8x128xf32>
    %101 = vector.extract_strided_slice %99 {offsets = [8, 128], sizes = [8, 128], strides = [1, 1]} : vector<16x256xf32> to vector<8x128xf32>
    %102 = arith.subf %100, %101 : vector<8x128xf32>
    %103 = vector.extract_strided_slice %99 {offsets = [0, 128], sizes = [8, 128], strides = [1, 1]} : vector<16x256xf32> to vector<8x128xf32>
    %104 = vector.extract_strided_slice %99 {offsets = [8, 0], sizes = [8, 128], strides = [1, 1]} : vector<16x256xf32> to vector<8x128xf32>
    %105 = arith.addf %103, %104 : vector<8x128xf32>
    %106 = tpu.concatenate %102, %105 in 1 : vector<8x128xf32>, vector<8x128xf32> -> vector<8x256xf32>
    %c2 = arith.constant 2 : index
    %c0_23 = arith.constant 0 : index
    %c0_24 = arith.constant 0 : index
    %107 = vector.load %arg7[%c2, %c0_23, %c0_24] : memref<8x8x256xf32, #tpu.memory_space<vmem>>, vector<1x8x256xf32>
    %108 = vector.shape_cast %107 : vector<1x8x256xf32> to vector<8x256xf32>
    %109 = vector.shape_cast %106 : vector<8x256xf32> to vector<1x8x256xf32>
    tpu.vector_store %arg7[%c2, %c0_23, %c0_24], %109 {strides = array<i32>} : memref<8x8x256xf32, #tpu.memory_space<vmem>>, vector<1x8x256xf32>,
    %110 = vector.extract_strided_slice %8 {offsets = [48, 0], sizes = [16, 768], strides = [1, 1]} : vector<128x768xf32> to vector<16x768xf32>
    %111 = arith.truncf %99 : vector<16x256xf32> to vector<16x256xbf16>
    %cst_25 = arith.constant dense<0.000000e+00> : vector<16x768xf32>
    %112 = tpu.matmul %111, %9, %cst_25 {dimension_numbers = #tpu.dot_dimension_numbers<[1], [0], [0], [1], [0, 0, 1, 1], [], []>} : vector<16x256xbf16>, vector<256x768xbf16>, vector<16x768xf32> -> vector<16x768xf32>
    %113 = vector.extract_strided_slice %110 {offsets = [0, 0], sizes = [16, 512], strides = [1, 1]} : vector<16x768xf32> to vector<16x512xf32>
    %114 = vector.extract_strided_slice %112 {offsets = [0, 0], sizes = [16, 512], strides = [1, 1]} : vector<16x768xf32> to vector<16x512xf32>
    %115 = arith.addf %113, %114 : vector<16x512xf32>
    %116 = arith.negf %115 : vector<16x512xf32>
    %117 = math.exp %116 : vector<16x512xf32>
    %cst_26 = arith.constant 1.000000e+00 : f32
    %118 = vector.broadcast %cst_26 : f32 to vector<16x512xf32>
    %119 = arith.addf %118, %117 : vector<16x512xf32>
    %120 = arith.divf %118, %119 : vector<16x512xf32>
    %121 = vector.extract_strided_slice %120 {offsets = [0, 0], sizes = [16, 256], strides = [1, 1]} : vector<16x512xf32> to vector<16x256xf32>
    %122 = vector.extract_strided_slice %120 {offsets = [0, 256], sizes = [16, 256], strides = [1, 1]} : vector<16x512xf32> to vector<16x256xf32>
    %123 = vector.extract_strided_slice %110 {offsets = [0, 512], sizes = [16, 256], strides = [1, 1]} : vector<16x768xf32> to vector<16x256xf32>
    %124 = vector.extract_strided_slice %112 {offsets = [0, 512], sizes = [16, 256], strides = [1, 1]} : vector<16x768xf32> to vector<16x256xf32>
    %125 = arith.addf %124, %12 : vector<16x256xf32>
    %126 = arith.mulf %121, %125 : vector<16x256xf32>
    %127 = arith.addf %123, %126 : vector<16x256xf32>
    %128 = math.tanh %127 : vector<16x256xf32>
    %129 = arith.subf %99, %128 : vector<16x256xf32>
    %130 = arith.mulf %122, %129 : vector<16x256xf32>
    %131 = arith.addf %128, %130 : vector<16x256xf32>
    %132 = vector.extract_strided_slice %131 {offsets = [0, 0], sizes = [8, 128], strides = [1, 1]} : vector<16x256xf32> to vector<8x128xf32>
    %133 = vector.extract_strided_slice %131 {offsets = [8, 128], sizes = [8, 128], strides = [1, 1]} : vector<16x256xf32> to vector<8x128xf32>
    %134 = arith.subf %132, %133 : vector<8x128xf32>
    %135 = vector.extract_strided_slice %131 {offsets = [0, 128], sizes = [8, 128], strides = [1, 1]} : vector<16x256xf32> to vector<8x128xf32>
    %136 = vector.extract_strided_slice %131 {offsets = [8, 0], sizes = [8, 128], strides = [1, 1]} : vector<16x256xf32> to vector<8x128xf32>
    %137 = arith.addf %135, %136 : vector<8x128xf32>
    %138 = tpu.concatenate %134, %137 in 1 : vector<8x128xf32>, vector<8x128xf32> -> vector<8x256xf32>
    %c3 = arith.constant 3 : index
    %c0_27 = arith.constant 0 : index
    %c0_28 = arith.constant 0 : index
    %139 = vector.load %arg7[%c3, %c0_27, %c0_28] : memref<8x8x256xf32, #tpu.memory_space<vmem>>, vector<1x8x256xf32>
    %140 = vector.shape_cast %139 : vector<1x8x256xf32> to vector<8x256xf32>
    %141 = vector.shape_cast %138 : vector<8x256xf32> to vector<1x8x256xf32>
    tpu.vector_store %arg7[%c3, %c0_27, %c0_28], %141 {strides = array<i32>} : memref<8x8x256xf32, #tpu.memory_space<vmem>>, vector<1x8x256xf32>,
    %142 = vector.extract_strided_slice %8 {offsets = [64, 0], sizes = [16, 768], strides = [1, 1]} : vector<128x768xf32> to vector<16x768xf32>
    %143 = arith.truncf %131 : vector<16x256xf32> to vector<16x256xbf16>
    %cst_29 = arith.constant dense<0.000000e+00> : vector<16x768xf32>
    %144 = tpu.matmul %143, %9, %cst_29 {dimension_numbers = #tpu.dot_dimension_numbers<[1], [0], [0], [1], [0, 0, 1, 1], [], []>} : vector<16x256xbf16>, vector<256x768xbf16>, vector<16x768xf32> -> vector<16x768xf32>
    %145 = vector.extract_strided_slice %142 {offsets = [0, 0], sizes = [16, 512], strides = [1, 1]} : vector<16x768xf32> to vector<16x512xf32>
    %146 = vector.extract_strided_slice %144 {offsets = [0, 0], sizes = [16, 512], strides = [1, 1]} : vector<16x768xf32> to vector<16x512xf32>
    %147 = arith.addf %145, %146 : vector<16x512xf32>
    %148 = arith.negf %147 : vector<16x512xf32>
    %149 = math.exp %148 : vector<16x512xf32>
    %cst_30 = arith.constant 1.000000e+00 : f32
    %150 = vector.broadcast %cst_30 : f32 to vector<16x512xf32>
    %151 = arith.addf %150, %149 : vector<16x512xf32>
    %152 = arith.divf %150, %151 : vector<16x512xf32>
    %153 = vector.extract_strided_slice %152 {offsets = [0, 0], sizes = [16, 256], strides = [1, 1]} : vector<16x512xf32> to vector<16x256xf32>
    %154 = vector.extract_strided_slice %152 {offsets = [0, 256], sizes = [16, 256], strides = [1, 1]} : vector<16x512xf32> to vector<16x256xf32>
    %155 = vector.extract_strided_slice %142 {offsets = [0, 512], sizes = [16, 256], strides = [1, 1]} : vector<16x768xf32> to vector<16x256xf32>
    %156 = vector.extract_strided_slice %144 {offsets = [0, 512], sizes = [16, 256], strides = [1, 1]} : vector<16x768xf32> to vector<16x256xf32>
    %157 = arith.addf %156, %12 : vector<16x256xf32>
    %158 = arith.mulf %153, %157 : vector<16x256xf32>
    %159 = arith.addf %155, %158 : vector<16x256xf32>
    %160 = math.tanh %159 : vector<16x256xf32>
    %161 = arith.subf %131, %160 : vector<16x256xf32>
    %162 = arith.mulf %154, %161 : vector<16x256xf32>
    %163 = arith.addf %160, %162 : vector<16x256xf32>
    %164 = vector.extract_strided_slice %163 {offsets = [0, 0], sizes = [8, 128], strides = [1, 1]} : vector<16x256xf32> to vector<8x128xf32>
    %165 = vector.extract_strided_slice %163 {offsets = [8, 128], sizes = [8, 128], strides = [1, 1]} : vector<16x256xf32> to vector<8x128xf32>
    %166 = arith.subf %164, %165 : vector<8x128xf32>
    %167 = vector.extract_strided_slice %163 {offsets = [0, 128], sizes = [8, 128], strides = [1, 1]} : vector<16x256xf32> to vector<8x128xf32>
    %168 = vector.extract_strided_slice %163 {offsets = [8, 0], sizes = [8, 128], strides = [1, 1]} : vector<16x256xf32> to vector<8x128xf32>
    %169 = arith.addf %167, %168 : vector<8x128xf32>
    %170 = tpu.concatenate %166, %169 in 1 : vector<8x128xf32>, vector<8x128xf32> -> vector<8x256xf32>
    %c4 = arith.constant 4 : index
    %c0_31 = arith.constant 0 : index
    %c0_32 = arith.constant 0 : index
    %171 = vector.load %arg7[%c4, %c0_31, %c0_32] : memref<8x8x256xf32, #tpu.memory_space<vmem>>, vector<1x8x256xf32>
    %172 = vector.shape_cast %171 : vector<1x8x256xf32> to vector<8x256xf32>
    %173 = vector.shape_cast %170 : vector<8x256xf32> to vector<1x8x256xf32>
    tpu.vector_store %arg7[%c4, %c0_31, %c0_32], %173 {strides = array<i32>} : memref<8x8x256xf32, #tpu.memory_space<vmem>>, vector<1x8x256xf32>,
    %174 = vector.extract_strided_slice %8 {offsets = [80, 0], sizes = [16, 768], strides = [1, 1]} : vector<128x768xf32> to vector<16x768xf32>
    %175 = arith.truncf %163 : vector<16x256xf32> to vector<16x256xbf16>
    %cst_33 = arith.constant dense<0.000000e+00> : vector<16x768xf32>
    %176 = tpu.matmul %175, %9, %cst_33 {dimension_numbers = #tpu.dot_dimension_numbers<[1], [0], [0], [1], [0, 0, 1, 1], [], []>} : vector<16x256xbf16>, vector<256x768xbf16>, vector<16x768xf32> -> vector<16x768xf32>
    %177 = vector.extract_strided_slice %174 {offsets = [0, 0], sizes = [16, 512], strides = [1, 1]} : vector<16x768xf32> to vector<16x512xf32>
    %178 = vector.extract_strided_slice %176 {offsets = [0, 0], sizes = [16, 512], strides = [1, 1]} : vector<16x768xf32> to vector<16x512xf32>
    %179 = arith.addf %177, %178 : vector<16x512xf32>
    %180 = arith.negf %179 : vector<16x512xf32>
    %181 = math.exp %180 : vector<16x512xf32>
    %cst_34 = arith.constant 1.000000e+00 : f32
    %182 = vector.broadcast %cst_34 : f32 to vector<16x512xf32>
    %183 = arith.addf %182, %181 : vector<16x512xf32>
    %184 = arith.divf %182, %183 : vector<16x512xf32>
    %185 = vector.extract_strided_slice %184 {offsets = [0, 0], sizes = [16, 256], strides = [1, 1]} : vector<16x512xf32> to vector<16x256xf32>
    %186 = vector.extract_strided_slice %184 {offsets = [0, 256], sizes = [16, 256], strides = [1, 1]} : vector<16x512xf32> to vector<16x256xf32>
    %187 = vector.extract_strided_slice %174 {offsets = [0, 512], sizes = [16, 256], strides = [1, 1]} : vector<16x768xf32> to vector<16x256xf32>
    %188 = vector.extract_strided_slice %176 {offsets = [0, 512], sizes = [16, 256], strides = [1, 1]} : vector<16x768xf32> to vector<16x256xf32>
    %189 = arith.addf %188, %12 : vector<16x256xf32>
    %190 = arith.mulf %185, %189 : vector<16x256xf32>
    %191 = arith.addf %187, %190 : vector<16x256xf32>
    %192 = math.tanh %191 : vector<16x256xf32>
    %193 = arith.subf %163, %192 : vector<16x256xf32>
    %194 = arith.mulf %186, %193 : vector<16x256xf32>
    %195 = arith.addf %192, %194 : vector<16x256xf32>
    %196 = vector.extract_strided_slice %195 {offsets = [0, 0], sizes = [8, 128], strides = [1, 1]} : vector<16x256xf32> to vector<8x128xf32>
    %197 = vector.extract_strided_slice %195 {offsets = [8, 128], sizes = [8, 128], strides = [1, 1]} : vector<16x256xf32> to vector<8x128xf32>
    %198 = arith.subf %196, %197 : vector<8x128xf32>
    %199 = vector.extract_strided_slice %195 {offsets = [0, 128], sizes = [8, 128], strides = [1, 1]} : vector<16x256xf32> to vector<8x128xf32>
    %200 = vector.extract_strided_slice %195 {offsets = [8, 0], sizes = [8, 128], strides = [1, 1]} : vector<16x256xf32> to vector<8x128xf32>
    %201 = arith.addf %199, %200 : vector<8x128xf32>
    %202 = tpu.concatenate %198, %201 in 1 : vector<8x128xf32>, vector<8x128xf32> -> vector<8x256xf32>
    %c5 = arith.constant 5 : index
    %c0_35 = arith.constant 0 : index
    %c0_36 = arith.constant 0 : index
    %203 = vector.load %arg7[%c5, %c0_35, %c0_36] : memref<8x8x256xf32, #tpu.memory_space<vmem>>, vector<1x8x256xf32>
    %204 = vector.shape_cast %203 : vector<1x8x256xf32> to vector<8x256xf32>
    %205 = vector.shape_cast %202 : vector<8x256xf32> to vector<1x8x256xf32>
    tpu.vector_store %arg7[%c5, %c0_35, %c0_36], %205 {strides = array<i32>} : memref<8x8x256xf32, #tpu.memory_space<vmem>>, vector<1x8x256xf32>,
    %206 = vector.extract_strided_slice %8 {offsets = [96, 0], sizes = [16, 768], strides = [1, 1]} : vector<128x768xf32> to vector<16x768xf32>
    %207 = arith.truncf %195 : vector<16x256xf32> to vector<16x256xbf16>
    %cst_37 = arith.constant dense<0.000000e+00> : vector<16x768xf32>
    %208 = tpu.matmul %207, %9, %cst_37 {dimension_numbers = #tpu.dot_dimension_numbers<[1], [0], [0], [1], [0, 0, 1, 1], [], []>} : vector<16x256xbf16>, vector<256x768xbf16>, vector<16x768xf32> -> vector<16x768xf32>
    %209 = vector.extract_strided_slice %206 {offsets = [0, 0], sizes = [16, 512], strides = [1, 1]} : vector<16x768xf32> to vector<16x512xf32>
    %210 = vector.extract_strided_slice %208 {offsets = [0, 0], sizes = [16, 512], strides = [1, 1]} : vector<16x768xf32> to vector<16x512xf32>
    %211 = arith.addf %209, %210 : vector<16x512xf32>
    %212 = arith.negf %211 : vector<16x512xf32>
    %213 = math.exp %212 : vector<16x512xf32>
    %cst_38 = arith.constant 1.000000e+00 : f32
    %214 = vector.broadcast %cst_38 : f32 to vector<16x512xf32>
    %215 = arith.addf %214, %213 : vector<16x512xf32>
    %216 = arith.divf %214, %215 : vector<16x512xf32>
    %217 = vector.extract_strided_slice %216 {offsets = [0, 0], sizes = [16, 256], strides = [1, 1]} : vector<16x512xf32> to vector<16x256xf32>
    %218 = vector.extract_strided_slice %216 {offsets = [0, 256], sizes = [16, 256], strides = [1, 1]} : vector<16x512xf32> to vector<16x256xf32>
    %219 = vector.extract_strided_slice %206 {offsets = [0, 512], sizes = [16, 256], strides = [1, 1]} : vector<16x768xf32> to vector<16x256xf32>
    %220 = vector.extract_strided_slice %208 {offsets = [0, 512], sizes = [16, 256], strides = [1, 1]} : vector<16x768xf32> to vector<16x256xf32>
    %221 = arith.addf %220, %12 : vector<16x256xf32>
    %222 = arith.mulf %217, %221 : vector<16x256xf32>
    %223 = arith.addf %219, %222 : vector<16x256xf32>
    %224 = math.tanh %223 : vector<16x256xf32>
    %225 = arith.subf %195, %224 : vector<16x256xf32>
    %226 = arith.mulf %218, %225 : vector<16x256xf32>
    %227 = arith.addf %224, %226 : vector<16x256xf32>
    %228 = vector.extract_strided_slice %227 {offsets = [0, 0], sizes = [8, 128], strides = [1, 1]} : vector<16x256xf32> to vector<8x128xf32>
    %229 = vector.extract_strided_slice %227 {offsets = [8, 128], sizes = [8, 128], strides = [1, 1]} : vector<16x256xf32> to vector<8x128xf32>
    %230 = arith.subf %228, %229 : vector<8x128xf32>
    %231 = vector.extract_strided_slice %227 {offsets = [0, 128], sizes = [8, 128], strides = [1, 1]} : vector<16x256xf32> to vector<8x128xf32>
    %232 = vector.extract_strided_slice %227 {offsets = [8, 0], sizes = [8, 128], strides = [1, 1]} : vector<16x256xf32> to vector<8x128xf32>
    %233 = arith.addf %231, %232 : vector<8x128xf32>
    %234 = tpu.concatenate %230, %233 in 1 : vector<8x128xf32>, vector<8x128xf32> -> vector<8x256xf32>
    %c6 = arith.constant 6 : index
    %c0_39 = arith.constant 0 : index
    %c0_40 = arith.constant 0 : index
    %235 = vector.load %arg7[%c6, %c0_39, %c0_40] : memref<8x8x256xf32, #tpu.memory_space<vmem>>, vector<1x8x256xf32>
    %236 = vector.shape_cast %235 : vector<1x8x256xf32> to vector<8x256xf32>
    %237 = vector.shape_cast %234 : vector<8x256xf32> to vector<1x8x256xf32>
    tpu.vector_store %arg7[%c6, %c0_39, %c0_40], %237 {strides = array<i32>} : memref<8x8x256xf32, #tpu.memory_space<vmem>>, vector<1x8x256xf32>,
    %238 = vector.extract_strided_slice %8 {offsets = [112, 0], sizes = [16, 768], strides = [1, 1]} : vector<128x768xf32> to vector<16x768xf32>
    %239 = arith.truncf %227 : vector<16x256xf32> to vector<16x256xbf16>
    %cst_41 = arith.constant dense<0.000000e+00> : vector<16x768xf32>
    %240 = tpu.matmul %239, %9, %cst_41 {dimension_numbers = #tpu.dot_dimension_numbers<[1], [0], [0], [1], [0, 0, 1, 1], [], []>} : vector<16x256xbf16>, vector<256x768xbf16>, vector<16x768xf32> -> vector<16x768xf32>
    %241 = vector.extract_strided_slice %238 {offsets = [0, 0], sizes = [16, 512], strides = [1, 1]} : vector<16x768xf32> to vector<16x512xf32>
    %242 = vector.extract_strided_slice %240 {offsets = [0, 0], sizes = [16, 512], strides = [1, 1]} : vector<16x768xf32> to vector<16x512xf32>
    %243 = arith.addf %241, %242 : vector<16x512xf32>
    %244 = arith.negf %243 : vector<16x512xf32>
    %245 = math.exp %244 : vector<16x512xf32>
    %cst_42 = arith.constant 1.000000e+00 : f32
    %246 = vector.broadcast %cst_42 : f32 to vector<16x512xf32>
    %247 = arith.addf %246, %245 : vector<16x512xf32>
    %248 = arith.divf %246, %247 : vector<16x512xf32>
    %249 = vector.extract_strided_slice %248 {offsets = [0, 0], sizes = [16, 256], strides = [1, 1]} : vector<16x512xf32> to vector<16x256xf32>
    %250 = vector.extract_strided_slice %248 {offsets = [0, 256], sizes = [16, 256], strides = [1, 1]} : vector<16x512xf32> to vector<16x256xf32>
    %251 = vector.extract_strided_slice %238 {offsets = [0, 512], sizes = [16, 256], strides = [1, 1]} : vector<16x768xf32> to vector<16x256xf32>
    %252 = vector.extract_strided_slice %240 {offsets = [0, 512], sizes = [16, 256], strides = [1, 1]} : vector<16x768xf32> to vector<16x256xf32>
    %253 = arith.addf %252, %12 : vector<16x256xf32>
    %254 = arith.mulf %249, %253 : vector<16x256xf32>
    %255 = arith.addf %251, %254 : vector<16x256xf32>
    %256 = math.tanh %255 : vector<16x256xf32>
    %257 = arith.subf %227, %256 : vector<16x256xf32>
    %258 = arith.mulf %250, %257 : vector<16x256xf32>
    %259 = arith.addf %256, %258 : vector<16x256xf32>
    %260 = vector.extract_strided_slice %259 {offsets = [0, 0], sizes = [8, 128], strides = [1, 1]} : vector<16x256xf32> to vector<8x128xf32>
    %261 = vector.extract_strided_slice %259 {offsets = [8, 128], sizes = [8, 128], strides = [1, 1]} : vector<16x256xf32> to vector<8x128xf32>
    %262 = arith.subf %260, %261 : vector<8x128xf32>
    %263 = vector.extract_strided_slice %259 {offsets = [0, 128], sizes = [8, 128], strides = [1, 1]} : vector<16x256xf32> to vector<8x128xf32>
    %264 = vector.extract_strided_slice %259 {offsets = [8, 0], sizes = [8, 128], strides = [1, 1]} : vector<16x256xf32> to vector<8x128xf32>
    %265 = arith.addf %263, %264 : vector<8x128xf32>
    %266 = tpu.concatenate %262, %265 in 1 : vector<8x128xf32>, vector<8x128xf32> -> vector<8x256xf32>
    %c7 = arith.constant 7 : index
    %c0_43 = arith.constant 0 : index
    %c0_44 = arith.constant 0 : index
    %267 = vector.load %arg7[%c7, %c0_43, %c0_44] : memref<8x8x256xf32, #tpu.memory_space<vmem>>, vector<1x8x256xf32>
    %268 = vector.shape_cast %267 : vector<1x8x256xf32> to vector<8x256xf32>
    %269 = vector.shape_cast %266 : vector<8x256xf32> to vector<1x8x256xf32>
    tpu.vector_store %arg7[%c7, %c0_43, %c0_44], %269 {strides = array<i32>} : memref<8x8x256xf32, #tpu.memory_space<vmem>>, vector<1x8x256xf32>,
    %c0_45 = arith.constant 0 : index
    %c0_46 = arith.constant 0 : index
    %270 = vector.load %arg9[%c0_45, %c0_46] : memref<16x256xf32, #tpu.memory_space<vmem>>, vector<16x256xf32>
    tpu.vector_store %arg9[%c0_45, %c0_46], %259 {strides = array<i32>} : memref<16x256xf32, #tpu.memory_space<vmem>>, vector<16x256xf32>,
    %c0_47 = arith.constant 0 : index
    %c0_48 = arith.constant 0 : index
    %271 = vector.load %arg8[%c0_47, %c0_48] : memref<16x256xf32, #tpu.memory_space<vmem>>, vector<16x256xf32>
    tpu.vector_store %arg8[%c0_47, %c0_48], %259 {strides = array<i32>} : memref<16x256xf32, #tpu.memory_space<vmem>>, vector<16x256xf32>,
    return
  }
  func.func @transform_0(%arg0: i32) -> (i32, i32) {
    %c0_i32 = arith.constant 0 : i32
    %c0_i32_0 = arith.constant 0 : i32
    return %arg0, %c0_i32 : i32, i32
  }
  func.func @transform_1(%arg0: i32) -> (i32, i32) {
    %c0_i32 = arith.constant 0 : i32
    %c0_i32_0 = arith.constant 0 : i32
    %c0_i32_1 = arith.constant 0 : i32
    return %c0_i32, %c0_i32_0 : i32, i32
  }
  func.func @transform_2(%arg0: i32) -> (i32, i32) {
    %c0_i32 = arith.constant 0 : i32
    %c0_i32_0 = arith.constant 0 : i32
    %c0_i32_1 = arith.constant 0 : i32
    return %c0_i32, %c0_i32_0 : i32, i32
  }
  func.func @transform_3(%arg0: i32) -> (i32, i32) {
    %c0_i32 = arith.constant 0 : i32
    %c0_i32_0 = arith.constant 0 : i32
    %c0_i32_1 = arith.constant 0 : i32
    return %c0_i32, %c0_i32_0 : i32, i32
  }
  func.func @transform_4(%arg0: i32) -> (i32, i32) {
    %c0_i32 = arith.constant 0 : i32
    %c0_i32_0 = arith.constant 0 : i32
    %c0_i32_1 = arith.constant 0 : i32
    return %c0_i32, %c0_i32_0 : i32, i32
  }
  func.func @transform_5(%arg0: i32) -> (i32, i32) {
    %c0_i32 = arith.constant 0 : i32
    %c0_i32_0 = arith.constant 0 : i32
    %c0_i32_1 = arith.constant 0 : i32
    return %c0_i32, %c0_i32_0 : i32, i32
  }
  func.func @transform_6(%arg0: i32) -> (i32, i32, i32) {
    %c0_i32 = arith.constant 0 : i32
    %c0_i32_0 = arith.constant 0 : i32
    %c0_i32_1 = arith.constant 0 : i32
    return %arg0, %c0_i32, %c0_i32_0 : i32, i32, i32
  }
  func.func @transform_7(%arg0: i32) -> (i32, i32) {
    %c0_i32 = arith.constant 0 : i32
    %c0_i32_0 = arith.constant 0 : i32
    %c0_i32_1 = arith.constant 0 : i32
    return %c0_i32, %c0_i32_0 : i32, i32
  }
}

</mosaic_0001>

<bundles_post_ra>
// kernel: custom-call.1
= control target key start
LH: loop header
LB: loop body
LE: loop exit
PB: predicated region body
PF: predicated region fallthrough
CT: control target
= control target key end

     0   :  { %s51_s0 = inlined_call_operand.hbm [shape: c64[2,8,16], index: 0, kind: input, shape index: {}]   ;;  %s52_s1 = inlined_call_operand.vmem [shape: f32[2,8,16], index: 1, kind: output, shape index: {}]  }
   0x1   :  { %s2_s8 = scalar_lea.hbm %s51_s0, 256 }
   0x2   :  { %3 = vsyncpa [#allocation0], 0  ;;  %s4_s11 = sshll.u32 %s52_s1, 4  ;;  %s5_s11 = int_to_ptr.vmem [resolvable:$true] %s4_s11 }
   0x3   :  { %s20_s12 = scalar_lea.vmem %s5_s11, 256  ;;  %p25_p1 = scmp.lt.s32.totalorder %s5_s11, %s5_s11 }
   0x4   :  { %p21_p0 = scmp.ne.s32.totalorder %s5_s11, %s20_s12  ;;  %p26_p2 = scmp.lt.s32.totalorder %s20_s12, %s20_s12 }
   0x6   :  { %p27_p3 = por %p26_p2, %p25_p1 }
   0x8   :  { %p28_p4 = pnand %p27_p3, %p21_p0 }
   0xa   :  { %31 = shalt.err (!%p28_p4)  }
   0xb   :  { %7 = dma.hbm_to_vmem [thread:$0]  %s2_s8, 256, %s5_s11, [#allocation0] }
   0xc   :  { %33 = dma.done.wait [#allocation0], 256  }
   0xd   :  { %34 = vsyncadd [#allocation0], 4294967040 }
   0xe   :  { %9 = vsyncpa [#allocation0], 1 }

// kernel: custom-call
= control target key start
LH: loop header
LB: loop body
LE: loop exit
PB: predicated region body
PF: predicated region fallthrough
CT: control target
= control target key end

     0   :  { %2 = vsyncpa [#allocation0], 0  ;;  %s47_s0 = inlined_call_operand.hbm [shape: c64[2,8,16], index: 0, kind: input, shape index: {}]   ;;  %s48_s1 = inlined_call_operand.vmem [shape: f32[2,8,16], index: 1, kind: output, shape index: {}]  }
   0x1   :  { %s3_s8 = sshll.u32 %s48_s1, 4  ;;  %s4_s8 = int_to_ptr.vmem [resolvable:$true] %s3_s8 }
   0x2   :  { %s17_s9 = scalar_lea.vmem %s4_s8, 256  ;;  %p22_p1 = scmp.lt.s32.totalorder %s4_s8, %s4_s8 }
   0x3   :  { %p18_p0 = scmp.ne.s32.totalorder %s4_s8, %s17_s9  ;;  %p23_p2 = scmp.lt.s32.totalorder %s17_s9, %s17_s9 }
   0x5   :  { %p24_p3 = por %p23_p2, %p22_p1 }
   0x7   :  { %p25_p4 = pnand %p24_p3, %p18_p0 }
   0x9   :  { %28 = shalt.err (!%p25_p4)  }
   0xa   :  { %6 = dma.hbm_to_vmem [thread:$0]  %s47_s0, 256, %s4_s8, [#allocation0] }
   0xb   :  { %29 = dma.done.wait [#allocation0], 256  }
   0xc   :  { %30 = vsyncadd [#allocation0], 4294967040 }
   0xd   :  { %8 = vsyncpa [#allocation0], 1 }

// kernel: custom-call.2
= control target key start
LH: loop header
LB: loop body
LE: loop exit
PB: predicated region body
PF: predicated region fallthrough
CT: control target
= control target key end

     0   :  { %s62_s0 = inlined_call_operand.vmem [shape: f32[2,8,32], index: 0, kind: input, shape index: {}]   ;;  %s63_s1 = inlined_call_operand.vmem [shape: f32[2,8,32], index: 1, kind: input, shape index: {}]   ;;  %s64_s2 = inlined_call_operand.vmem [shape: c64[2,8,32], index: 2, kind: output, shape index: {}]  }
   0x1   :  { %v5_v0 = vld [vmem:[%s62_s0] sm:$0xff]  ;;  %v18_v1 = vld [vmem:[%s62_s0 + $0x8] sm:$0xff] }
   0x2   :  { %v11_v2 = vld [vmem:[%s63_s1] sm:$0xff]  ;;  %6 = vst [vmem:[%s64_s2] sm:$0xff] %v5_v0  ;;  %19 = vst [vmem:[%s64_s2 + $0x8] sm:$0xff] %v18_v1  ;;  %v21_v3 = vld [vmem:[%s63_s1 + $0x8] sm:$0xff] }
   0x3   :  { %20 = vst [vmem:[%s64_s2 + $0x10] sm:$0xff] %v11_v2  ;;  %22 = vst [vmem:[%s64_s2 + $0x18] sm:$0xff] %v21_v3 }

// kernel: complex_gru_forward.1
= control target key start
LH: loop header
LB: loop body
LE: loop exit
PB: predicated region body
PF: predicated region fallthrough
CT: control target
= control target key end

     0   :  { %13 = vsyncpa [#allocation4], 0  ;;  %s3821_s24 = smov [#allocation3]   ;;  %s6052_s0 = inlined_call_operand.vmem [shape: bf16[128,16], index: 0, kind: input, shape index: {}]   ;;  %s6053_s1 = inlined_call_operand.vmem [shape: f32[16,256], index: 1, kind: input, shape index: {}]   ;;  %s6054_s2 = inlined_call_operand.vmem [shape: bf16[16,768], index: 2, kind: input, shape index: {}]   ;;  %s6055_s3 = inlined_call_operand.hbm [shape: bf16[256,768], index: 3, kind: input, shape index: {}]   ;;  %s6056_s4 = inlined_call_operand.vmem [shape: f32[1,768], index: 4, kind: input, shape index: {}]   ;;  %s6057_s5 = inlined_call_operand.vmem [shape: f32[1,256], index: 5, kind: input, shape index: {}]   ;;  %s6058_s6 = inlined_call_operand.vmem [shape: f32[8,8,256], index: 6, kind: output, shape index: {0}]   ;;  %s6059_s7 = inlined_call_operand.vmem [shape: f32[16,256], index: 7, kind: output, shape index: {1}]  }
   0x1   :  { %s25_s25 = sshll.u32 %s3821_s24, 4  ;;  %s26_s25 = int_to_ptr.vmem [resolvable:$true] %s25_s25 }
   0x2   :  { %s3807_s26 = scalar_lea.vmem %s26_s25, 12288  ;;  %p3812_p1 = scmp.lt.s32.totalorder %s26_s25, %s26_s25 }
   0x3   :  { %p3808_p0 = scmp.ne.s32.totalorder %s26_s25, %s3807_s26  ;;  %p3813_p2 = scmp.lt.s32.totalorder %s3807_s26, %s3807_s26 }
   0x5   :  { %p3814_p3 = por %p3813_p2, %p3812_p1 }
   0x7   :  { %p3815_p4 = pnand %p3814_p3, %p3808_p0 }
   0x9   :  { %3818 = shalt.err (!%p3815_p4)
}
   0xa   :  { %s3822_s27 = smov 384   ;;  %s3823_s28 = smov 24  }
   0xb   :  { %31 = dma.hbm_to_vmem [thread:$0]  %s6055_s3, 12288, %s26_s25, [#allocation4], %s3822_s27, %s3822_s27, %s3823_s28  }
   0xc   :  { %3819 = dma.done.wait [#allocation4], 12288  }
   0xd   :  { %3820 = vsyncadd [#allocation4], 4294955008  ;;  %v3824_v0 = vmov 0   ;;  %v3126_v1 = vld [vmem:[%s6054_s2 + $0x4] ss:$24 sps:$4 sm:$0xff]   ;;  %vm176_vm0 = vcmask 130048  }
   0xe   :  { %233 = vmatprep.mubr.bf16.mxu0 %v3824_v0  ;;  %273 = vmatprep.mubr.bf16.mxu1 %v3824_v0  ;;  %v3128_v2 = vld [vmem:[%s6054_s2] ss:$24 sps:$4 sm:$0xff]   ;;  %v3133_v6 = vld [vmem:[%s6054_s2 + $0xc] ss:$24 sps:$4 sm:$0xff]   ;;  %v3140_v9 = vld [vmem:[%s6054_s2 + $0x10] ss:$24 sps:$4 sm:$0xff]  }
   0xf   :  { %215 = vmatprep.subr.bf16.mxu0 %v3126_v1  ;;  %3120 = vmatprep.subr.bf16.mxu1 %v3126_v1  ;;  %v3129_v3 = vld [vmem:[%s6052_s0] sm:$0xff]   ;;  %v3134_v7 = vld [vmem:[%s6052_s0 + $0x8] sm:$0xff]   ;;  %v3914_v12 = vld [vmem:[#allocation3 + $0x15c] ss:$24 sps:$4 sm:$0xff]  }
  0x10   :  { %216 = vmatpush1.bf16.msra.mxu0 %v3128_v2  ;;  %3121 = vmatpush1.bf16.msra.mxu1 %v3128_v2  ;;  %v3882_v4 = vld [vmem:[%s6052_s0 + $0x20] sm:$0xff]   ;;  %v3901_v8 = vld [vmem:[%s6052_s0 + $0x28] sm:$0xff]   ;;  %v3136_v13 = vld [vmem:[%s6052_s0 + $0x10] sm:$0xff]  }
  0x11   :  { %v3131_v5 = vld [vmem:[%s6054_s2 + $0x8] ss:$24 sps:$4 sm:$0xff]   ;;  %328 = vmatprep.subr.bf16.mxu1 %v3133_v6  ;;  %v3142_v10 = vld [vmem:[%s6054_s2 + $0x14] ss:$24 sps:$4 sm:$0xff]   ;;  %v3936_v15 = vld [vmem:[%s6052_s0 + $0x18] sm:$0xff]  }
  0x12   :  { %v3909_v11 = vld [vmem:[#allocation3 + $0x154] ss:$24 sps:$4 sm:$0xff]   ;;  %441 = vmatprep.subr.bf16.mxu0 %v3142_v10  ;;  %v3941_v16 = vld [vmem:[%s6052_s0 + $0x38] sm:$0xff]   ;;  %v3949_v17 = vld [vmem:[#allocation3 + $0x150] ss:$24 sps:$4 sm:$0xff]  }
  0x13   :  { %2922 = vmatmul.mubr.msk.bf16.vlgmr.msra.gmra.mxu0 %vm176_vm0, %v3129_v3  ;;  %2926 = vmatmul.mubr.msk.bf16.vlgmr.msra.gmra.mxu1 %vm176_vm0, %v3882_v4  ;;  %6284 = vst [vmem:[#allocation6_spill] sm:$0xff] %v3909_v11  ;;  %v3926_v14 = vld [vmem:[%s6052_s0 + $0x30] sm:$0xff]   ;;  %v3953_v19 = vld [vmem:[#allocation3 + $0x124] ss:$24 sps:$4 sm:$0xff]   ;;  %v3959_v21 = vld [vmem:[#allocation3 + $0x120] ss:$24 sps:$4 sm:$0xff]  }
  0x14   :  { %243 = vmatprep.mubr.bf16.mxu0 %v3824_v0  ;;  %329 = vmatpush1.bf16.msra.mxu1 %v3131_v5  ;;  %v3951_v18 = vld [vmem:[#allocation3 + $0x158] ss:$24 sps:$4 sm:$0xff]   ;;  %v3955_v20 = vld [vmem:[#allocation3 + $0x12c] ss:$24 sps:$4 sm:$0xff]   ;;  %v3963_v22 = vld [vmem:[#allocation3 + $0x128] ss:$24 sps:$4 sm:$0xff]  }
  0x15   :  { %283 = vmatprep.mubr.bf16.mxu1 %v3824_v0  ;;  %442 = vmatpush1.bf16.msra.mxu0 %v3140_v9  ;;  %v3965_v23 = vld [vmem:[#allocation3 + $0xf4] ss:$24 sps:$4 sm:$0xff]   ;;  %v3973_v25 = vld [vmem:[#allocation3 + $0xf0] ss:$24 sps:$4 sm:$0xff]   ;;  %v3979_v27 = vld [vmem:[#allocation3 + $0xc4] ss:$24 sps:$4 sm:$0xff]  }
  0x16   :  { %1134 = vmatprep.subr.bf16.mxu1 %v3909_v11  ;;  %1177 = vmatprep.subr.bf16.mxu0 %v3914_v12  ;;  %v3969_v24 = vld [vmem:[#allocation3 + $0xfc] ss:$24 sps:$4 sm:$0xff]   ;;  %v3977_v26 = vld [vmem:[#allocation3 + $0xf8] ss:$24 sps:$4 sm:$0xff]   ;;  %v3983_v28 = vld [vmem:[#allocation3 + $0xcc] ss:$24 sps:$4 sm:$0xff]  }
  0x17   :  { %v3987_v29 = vld [vmem:[#allocation3 + $0xc0] ss:$24 sps:$4 sm:$0xff]   ;;  %v3993_v31 = vld [vmem:[#allocation3 + $0x94] ss:$24 sps:$4 sm:$0xff]   ;;  %v4001_v33 = vld [vmem:[#allocation3 + $0x90] ss:$24 sps:$4 sm:$0xff]  }
  0x18   :  { %v3991_v30 = vld [vmem:[#allocation3 + $0xc8] ss:$24 sps:$4 sm:$0xff]   ;;  %v3997_v32 = vld [vmem:[#allocation3 + $0x9c] ss:$24 sps:$4 sm:$0xff]   ;;  %v4005_v34 = vld [vmem:[#allocation3 + $0x98] ss:$24 sps:$4 sm:$0xff]  }
  0x19   :  { %v4007_v35 = vld [vmem:[#allocation3 + $0x64] ss:$24 sps:$4 sm:$0xff]   ;;  %v4015_v37 = vld [vmem:[#allocation3 + $0x60] ss:$24 sps:$4 sm:$0xff]   ;;  %v4023_v39 = vld [vmem:[#allocation3 + $0x34] ss:$24 sps:$4 sm:$0xff]  }
  0x1a   :  { %v4011_v36 = vld [vmem:[#allocation3 + $0x6c] ss:$24 sps:$4 sm:$0xff]   ;;  %v4019_v38 = vld [vmem:[#allocation3 + $0x68] ss:$24 sps:$4 sm:$0xff]   ;;  %v4025_v40 = vld [vmem:[#allocation3 + $0x3c] ss:$24 sps:$4 sm:$0xff]  }
  0x1b   :  { %2923 = vmatmul.mubr.msk.bf16.gmra.mxu0 %vm176_vm0, %v3134_v7  ;;  %2927 = vmatmul.mubr.msk.bf16.gmra.mxu1 %vm176_vm0, %v3901_v8  ;;  %v4029_v41 = vld [vmem:[#allocation3 + $0x30] ss:$24 sps:$4 sm:$0xff]   ;;  %v4035_v43 = vld [vmem:[#allocation3 + $0x4] ss:$24 sps:$4 sm:$0xff]   ;;  %v4045_v45 = vld [vmem:[#allocation3] ss:$24 sps:$4 sm:$0xff]  }
  0x1c   :  { %253 = vmatprep.mubr.bf16.mxu0 %v3824_v0  ;;  %293 = vmatprep.mubr.bf16.mxu1 %v3824_v0  ;;  %v4033_v42 = vld [vmem:[#allocation3 + $0x38] ss:$24 sps:$4 sm:$0xff]   ;;  %v4039_v44 = vld [vmem:[#allocation3 + $0xc] ss:$24 sps:$4 sm:$0xff]   ;;  %v4049_v46 = vld [vmem:[#allocation3 + $0x8] ss:$24 sps:$4 sm:$0xff]  }
  0x1d   :  { %v4051_v47 = vld [vmem:[#allocation3 + $0x2d4] ss:$24 sps:$4 sm:$0xff]   ;;  %v4059_v49 = vld [vmem:[#allocation3 + $0x2d0] ss:$24 sps:$4 sm:$0xff]   ;;  %v4065_v51 = vld [vmem:[#allocation3 + $0x2a4] ss:$24 sps:$4 sm:$0xff]  }
  0x1e   :  { %v4055_v48 = vld [vmem:[#allocation3 + $0x2dc] ss:$24 sps:$4 sm:$0xff]   ;;  %v4063_v50 = vld [vmem:[#allocation3 + $0x2d8] ss:$24 sps:$4 sm:$0xff]   ;;  %v4069_v52 = vld [vmem:[#allocation3 + $0x2ac] ss:$24 sps:$4 sm:$0xff]  }
  0x1f   :  { %v4075_v53 = vld [vmem:[#allocation3 + $0x2a0] ss:$24 sps:$4 sm:$0xff]   ;;  %v4081_v55 = vld [vmem:[#allocation3 + $0x274] ss:$24 sps:$4 sm:$0xff]   ;;  %v4089_v57 = vld [vmem:[#allocation3 + $0x270] ss:$24 sps:$4 sm:$0xff]  }
  0x20   :  { %v4079_v54 = vld [vmem:[#allocation3 + $0x2a8] ss:$24 sps:$4 sm:$0xff]   ;;  %v4085_v56 = vld [vmem:[#allocation3 + $0x27c] ss:$24 sps:$4 sm:$0xff]   ;;  %v4093_v58 = vld [vmem:[#allocation3 + $0x278] ss:$24 sps:$4 sm:$0xff]  }
  0x21   :  { %v4095_v59 = vld [vmem:[#allocation3 + $0x244] ss:$24 sps:$4 sm:$0xff]   ;;  %v4107_v61 = vld [vmem:[#allocation3 + $0x240] ss:$24 sps:$4 sm:$0xff]   ;;  %v4113_v63 = vld [vmem:[#allocation3 + $0x214] ss:$24 sps:$4 sm:$0xff]  }
  0x22   :  { %v4099_v60 = vld [vmem:[#allocation3 + $0x24c] ss:$24 sps:$4 sm:$0xff]   ;;  %v4109_v62 = vld [vmem:[#allocation3 + $0x248] ss:$24 sps:$4 sm:$0xff]   ;;  %v4115_v1 = vld [vmem:[#allocation3 + $0x21c] ss:$24 sps:$4 sm:$0xff]  }
  0x23   :  { %2924 = vmatmul.mubr.msk.bf16.gmra.mxu0 %vm176_vm0, %v3136_v13  ;;  %2928 = vmatmul.mubr.msk.bf16.gmra.mxu1 %vm176_vm0, %v3926_v14  ;;  %6285 = vst [vmem:[#allocation7_spill] sm:$0xff] %v4109_v62  ;;  %6286 = vst [vmem:[#allocation8_spill] sm:$0xff] %v4115_v1  ;;  %v4121_v2 = vld [vmem:[#allocation3 + $0x210] ss:$24 sps:$4 sm:$0xff]   ;;  %v4129_v5 = vld [vmem:[#allocation3 + $0x1ec] ss:$24 sps:$4 sm:$0xff]  }
  0x24   :  { %263 = vmatprep.mubr.bf16.mxu0 %v3824_v0  ;;  %303 = vmatprep.mubr.bf16.mxu1 %v3824_v0  ;;  %6288 = vst [vmem:[#allocation10_spill] sm:$0xff] %v4129_v5  ;;  %v4137_v6 = vld [vmem:[#allocation3 + $0x1e0] ss:$24 sps:$4 sm:$0xff]   ;;  %v4145_v9 = vld [vmem:[#allocation3 + $0x1bc] ss:$24 sps:$4 sm:$0xff]   ;;  %v4152_v10 = vld [vmem:[%s6053_s1 + $0x8] sm:$0xff] }
  0x25   :  { %6290 = vst [vmem:[#allocation12_spill] sm:$0xff] %v4145_v9  ;;  %6291 = vst [vmem:[#allocation13_spill] sm:$0xff] %v4152_v10 }
  0x2b   :  { %2925 = vmatmul.mubr.msk.bf16.gmra.mxu0 %vm176_vm0, %v3936_v15  ;;  %2929 = vmatmul.mubr.msk.bf16.gmra.mxu1 %vm176_vm0, %v3941_v16 }
  0x2c   :  { %346 = vmatprep.mubr.bf16.mxu1 %v3824_v0  ;;  %459 = vmatprep.mubr.bf16.mxu0 %v3824_v0 }
  0x33   :  { %2930 = vmatmul.mubr.msk.bf16.vlgmr.msra.gmra.mxu1 %vm176_vm0, %v3129_v3  ;;  %2938 = vmatmul.mubr.msk.bf16.vlgmr.msra.gmra.mxu0 %vm176_vm0, %v3129_v3  ;;  %v4123_v3 = vld [vmem:[#allocation3 + $0x218] ss:$24 sps:$4 sm:$0xff]  }
  0x34   :  { %1135 = vmatpush1.bf16.msra.mxu1 %v3949_v17  ;;  %1178 = vmatpush1.bf16.msra.mxu0 %v3951_v18  ;;  %6287 = vst [vmem:[#allocation9_spill] sm:$0xff] %v4123_v3 }
  0x35   :  { %1136 = vmatprep.subr.bf16.mxu1 %v3953_v19  ;;  %1179 = vmatprep.subr.bf16.mxu0 %v3955_v20 }
  0x36   :  { %356 = vmatprep.mubr.bf16.mxu1 %v3824_v0  ;;  %469 = vmatprep.mubr.bf16.mxu0 %v3824_v0 }
  0x38   :  { %1137 = vmatpush1.bf16.msra.mxu1 %v3959_v21  ;;  %1180 = vmatpush1.bf16.msra.mxu0 %v3963_v22 }
  0x39   :  { %1138 = vmatprep.subr.bf16.mxu1 %v3965_v23  ;;  %1181 = vmatprep.subr.bf16.mxu0 %v3969_v24 }
  0x3b   :  { %2931 = vmatmul.mubr.msk.bf16.gmra.mxu1 %vm176_vm0, %v3134_v7  ;;  %2939 = vmatmul.mubr.msk.bf16.gmra.mxu0 %vm176_vm0, %v3134_v7  ;;  %v4139_v7 = vld [vmem:[#allocation3 + $0x1e8] ss:$24 sps:$4 sm:$0xff]  }
  0x3c   :  { %1139 = vmatpush1.bf16.msra.mxu1 %v3973_v25  ;;  %1182 = vmatpush1.bf16.msra.mxu0 %v3977_v26  ;;  %6289 = vst [vmem:[#allocation11_spill] sm:$0xff] %v4139_v7 }
  0x3d   :  { %1140 = vmatprep.subr.bf16.mxu1 %v3979_v27  ;;  %1183 = vmatprep.subr.bf16.mxu0 %v3983_v28 }
  0x3e   :  { %366 = vmatprep.mubr.bf16.mxu1 %v3824_v0  ;;  %479 = vmatprep.mubr.bf16.mxu0 %v3824_v0 }
  0x40   :  { %1141 = vmatpush1.bf16.msra.mxu1 %v3987_v29  ;;  %1184 = vmatpush1.bf16.msra.mxu0 %v3991_v30 }
  0x41   :  { %1142 = vmatprep.subr.bf16.mxu1 %v3993_v31  ;;  %1185 = vmatprep.subr.bf16.mxu0 %v3997_v32 }
  0x43   :  { %2932 = vmatmul.mubr.msk.bf16.gmra.mxu1 %vm176_vm0, %v3136_v13  ;;  %2940 = vmatmul.mubr.msk.bf16.gmra.mxu0 %vm176_vm0, %v3136_v13  ;;  %v4157_v13 = vld [vmem:[%s6053_s1 + $0x18] sm:$0xff] }
  0x44   :  { %1143 = vmatpush1.bf16.msra.mxu1 %v4001_v33  ;;  %1186 = vmatpush1.bf16.msra.mxu0 %v4005_v34  ;;  %6292 = vst [vmem:[#allocation14_spill] sm:$0xff] %v4157_v13 }
  0x45   :  { %1144 = vmatprep.subr.bf16.mxu1 %v4007_v35  ;;  %1187 = vmatprep.subr.bf16.mxu0 %v4011_v36 }
  0x46   :  { %376 = vmatprep.mubr.bf16.mxu1 %v3824_v0  ;;  %489 = vmatprep.mubr.bf16.mxu0 %v3824_v0 }
  0x48   :  { %1145 = vmatpush1.bf16.msra.mxu1 %v4015_v37  ;;  %1188 = vmatpush1.bf16.msra.mxu0 %v4019_v38 }
  0x49   :  { %1146 = vmatprep.subr.bf16.mxu1 %v4023_v39  ;;  %1189 = vmatprep.subr.bf16.mxu0 %v4025_v40 }
  0x4b   :  { %2933 = vmatmul.mubr.msk.bf16.gmra.mxu1 %vm176_vm0, %v3936_v15  ;;  %2941 = vmatmul.mubr.msk.bf16.gmra.mxu0 %vm176_vm0, %v3936_v15  ;;  %v4163_v15 = vld [vmem:[#allocation3 + $0x1b8] ss:$24 sps:$4 sm:$0xff]  }
  0x4c   :  { %1147 = vmatpush1.bf16.msra.mxu1 %v4029_v41  ;;  %1190 = vmatpush1.bf16.msra.mxu0 %v4033_v42  ;;  %6293 = vst [vmem:[#allocation15_spill] sm:$0xff] %v4163_v15 }
  0x4d   :  { %1148 = vmatprep.subr.bf16.mxu1 %v4035_v43  ;;  %1191 = vmatprep.subr.bf16.mxu0 %v4039_v44 }
  0x4e   :  { %386 = vmatprep.mubr.bf16.mxu1 %v3824_v0  ;;  %499 = vmatprep.mubr.bf16.mxu0 %v3824_v0 }
  0x50   :  { %1149 = vmatpush1.bf16.msra.mxu1 %v4045_v45  ;;  %1192 = vmatpush1.bf16.msra.mxu0 %v4049_v46 }
  0x51   :  { %1150 = vmatprep.subr.bf16.mxu1 %v4051_v47  ;;  %1193 = vmatprep.subr.bf16.mxu0 %v4055_v48 }
  0x53   :  { %2934 = vmatmul.mubr.msk.bf16.gmra.mxu1 %vm176_vm0, %v3882_v4  ;;  %2942 = vmatmul.mubr.msk.bf16.gmra.mxu0 %vm176_vm0, %v3882_v4  ;;  %v4127_v4 = vld [vmem:[#allocation3 + $0x1e4] ss:$24 sps:$4 sm:$0xff]  }
  0x54   :  { %1151 = vmatpush2.bf16.msra.mxu1 %v4059_v49  ;;  %1194 = vmatpush2.bf16.msra.mxu0 %v4063_v50 }
  0x55   :  { %1152 = vmatprep.subr.bf16.mxu1 %v4065_v51  ;;  %1195 = vmatprep.subr.bf16.mxu0 %v4069_v52 }
  0x56   :  { %396 = vmatprep.mubr.bf16.mxu1 %v3824_v0  ;;  %509 = vmatprep.mubr.bf16.mxu0 %v3824_v0 }
  0x58   :  { %1153 = vmatpush2.bf16.msra.mxu1 %v4075_v53  ;;  %1196 = vmatpush2.bf16.msra.mxu0 %v4079_v54 }
  0x59   :  { %1154 = vmatprep.subr.bf16.mxu1 %v4081_v55  ;;  %1197 = vmatprep.subr.bf16.mxu0 %v4085_v56 }
  0x5b   :  { %2935 = vmatmul.mubr.msk.bf16.gmra.mxu1 %vm176_vm0, %v3901_v8  ;;  %2943 = vmatmul.mubr.msk.bf16.gmra.mxu0 %vm176_vm0, %v3901_v8  ;;  %v4143_v8 = vld [vmem:[#allocation3 + $0x1b4] ss:$24 sps:$4 sm:$0xff]  }
  0x5c   :  { %1155 = vmatpush2.bf16.msra.mxu1 %v4089_v57  ;;  %1198 = vmatpush2.bf16.msra.mxu0 %v4093_v58 }
  0x5d   :  { %1156 = vmatprep.subr.bf16.mxu1 %v4095_v59  ;;  %1199 = vmatprep.subr.bf16.mxu0 %v4099_v60 }
  0x5e   :  { %406 = vmatprep.mubr.bf16.mxu1 %v3824_v0  ;;  %519 = vmatprep.mubr.bf16.mxu0 %v3824_v0 }
  0x60   :  { %1157 = vmatpush2.bf16.msra.mxu1 %v4107_v61  ;;  %1200 = vmatpush2.bf16.msra.mxu0 %v4109_v62  ;;  %v4206_v62 = vld [vmem:[#allocation3 + $0x134] ss:$24 sps:$4 sm:$0xff]  }
  0x61   :  { %1158 = vmatprep.subr.bf16.mxu1 %v4113_v63  ;;  %1201 = vmatprep.subr.bf16.mxu0 %v4115_v1  ;;  %v4186_v1 = vld [vmem:[%s6053_s1] sm:$0xff] }
  0x62   :  { %6295 = vst [vmem:[#allocation17_spill] sm:$0xff] %v4186_v1 }
  0x63   :  { %2936 = vmatmul.mubr.msk.bf16.gmra.mxu1 %vm176_vm0, %v3926_v14  ;;  %2944 = vmatmul.mubr.msk.bf16.gmra.mxu0 %vm176_vm0, %v3926_v14  ;;  %v4161_v14 = vld [vmem:[#allocation3 + $0x1b0] ss:$24 sps:$4 sm:$0xff]  }
  0x64   :  { %1159 = vmatpush2.bf16.msra.mxu1 %v4121_v2  ;;  %1202 = vmatpush2.bf16.msra.mxu0 %v4123_v3  ;;  %v653_v3 = vpack.c.bf16 %v4157_v13, %v4152_v10  ;;  %v4191_v13 = vld [vmem:[%s6053_s1 + $0x10] sm:$0xff] }
  0x65   :  { %1160 = vmatprep.subr.bf16.mxu1 %v4127_v4  ;;  %1203 = vmatprep.subr.bf16.mxu0 %v4129_v5  ;;  %v4169_v5 = vld [vmem:[#allocation3 + $0x18c] ss:$24 sps:$4 sm:$0xff]   ;;  %6296 = vst [vmem:[#allocation18_spill] sm:$0xff] %v4191_v13  ;;  %v4199_v10 = vpack.c.bf16 %v4191_v13, %v4186_v1  ;;  %v4212_v13 = vld [vmem:[#allocation3 + $0x130] ss:$24 sps:$4 sm:$0xff]  }
  0x66   :  { %416 = vmatprep.mubr.bf16.mxu1 %v3824_v0  ;;  %529 = vmatprep.mubr.bf16.mxu0 %v3824_v0  ;;  %v4167_v0 = vld [vmem:[#allocation3 + $0x184] ss:$24 sps:$4 sm:$0xff]  }
  0x67   :  { %v4215_v1 = vld [vmem:[#allocation3 + $0x104] ss:$24 sps:$4 sm:$0xff]  }
  0x68   :  { %1161 = vmatpush2.bf16.msra.mxu1 %v4137_v6  ;;  %1204 = vmatpush2.bf16.msra.mxu0 %v4139_v7  ;;  %v4177_v7 = vld [vmem:[#allocation3 + $0x180] ss:$24 sps:$4 sm:$0xff]  }
  0x69   :  { %1162 = vmatprep.subr.bf16.mxu1 %v4143_v8  ;;  %1205 = vmatprep.subr.bf16.mxu0 %v4145_v9  ;;  %v4181_v9 = vld [vmem:[#allocation3 + $0x188] ss:$24 sps:$4 sm:$0xff]  }
  0x6a   :  { %6294 = vst [vmem:[#allocation16_spill] sm:$0xff] %v4181_v9 }
  0x6b   :  { %2937 = vmatmul.mubr.msk.bf16.gmra.mxu1 %vm176_vm0, %v3941_v16  ;;  %2945 = vmatmul.mubr.msk.bf16.gmra.mxu0 %vm176_vm0, %v3941_v16  ;;  %v4195_v16 = vld [vmem:[#allocation3 + $0x164] ss:$24 sps:$4 sm:$0xff]  }
  0x6c   :  { %1163 = vmatpush2.bf16.msra.mxu1 %v4161_v14  ;;  %1206 = vmatpush2.bf16.msra.mxu0 %v4163_v15  ;;  %v4203_v15 = vld [vmem:[#allocation3 + $0x160] ss:$24 sps:$4 sm:$0xff]  }
  0x6d   :  { %1164 = vmatprep.subr.bf16.mxu1 %v4167_v0  ;;  %1207 = vmatprep.subr.bf16.mxu0 %v4169_v5 }
  0x6e   :  { %1166 = vmatprep.mubr.bf16.mxu1 %v653_v3  ;;  %1209 = vmatprep.mubr.bf16.mxu0 %v653_v3 }
  0x70   :  { %1165 = vmatpush2.bf16.msra.mxu1 %v4177_v7  ;;  %1208 = vmatpush2.bf16.msra.mxu0 %v4181_v9  ;;  %v4223_v9 = vld [vmem:[#allocation3 + $0xd4] ss:$24 sps:$4 sm:$0xff]  }
  0x71   :  { %1220 = vmatprep.subr.bf16.mxu1 %v4195_v16  ;;  %1353 = vmatprep.subr.bf16.mxu0 %v3909_v11  ;;  %v4220_v11 = vld [vmem:[#allocation3 + $0x100] ss:$24 sps:$4 sm:$0xff]  }
  0x73   :  { %1167 = vmatmul.mubr.bf16.vlgmr.msra.gmra.mxu1 %v4199_v10  ;;  %1210 = vmatmul.mubr.bf16.vlgmr.msra.gmra.mxu0 %v4199_v10 }
  0x74   :  { %1221 = vmatpush1.bf16.msra.mxu1 %v4203_v15  ;;  %1252 = vmatprep.mubr.bf16.mxu1 %v653_v3  ;;  %v4228_v3 = vld [vmem:[#allocation3 + $0xd0] ss:$24 sps:$4 sm:$0xff]  }
  0x75   :  { %1222 = vmatprep.subr.bf16.mxu1 %v4206_v62  ;;  %1354 = vmatpush1.bf16.msra.mxu0 %v3949_v17  ;;  %v4231_v17 = vld [vmem:[#allocation3 + $0xa4] ss:$24 sps:$4 sm:$0xff]  }
  0x76   :  { %1355 = vmatprep.subr.bf16.mxu0 %v3953_v19  ;;  %v4236_v19 = vld [vmem:[#allocation3 + $0xa0] ss:$24 sps:$4 sm:$0xff]  }
  0x78   :  { %1223 = vmatpush1.bf16.msra.mxu1 %v4212_v13 }
  0x79   :  { %1224 = vmatprep.subr.bf16.mxu1 %v4215_v1  ;;  %1356 = vmatpush1.bf16.msra.mxu0 %v3959_v21  ;;  %v4239_v21 = vld [vmem:[#allocation3 + $0x74] ss:$24 sps:$4 sm:$0xff]  }
  0x7a   :  { %1357 = vmatprep.subr.bf16.mxu0 %v3965_v23  ;;  %v4244_v23 = vld [vmem:[#allocation3 + $0x70] ss:$24 sps:$4 sm:$0xff]  }
  0x7c   :  { %1225 = vmatpush1.bf16.msra.mxu1 %v4220_v11 }
  0x7d   :  { %1226 = vmatprep.subr.bf16.mxu1 %v4223_v9  ;;  %1358 = vmatpush1.bf16.msra.mxu0 %v3973_v25  ;;  %v4247_v25 = vld [vmem:[#allocation3 + $0x44] ss:$24 sps:$4 sm:$0xff]  }
  0x7e   :  { %1359 = vmatprep.subr.bf16.mxu0 %v3979_v27  ;;  %v4252_v27 = vld [vmem:[#allocation3 + $0x40] ss:$24 sps:$4 sm:$0xff]  }
  0x80   :  { %1227 = vmatpush1.bf16.msra.mxu1 %v4228_v3 }
  0x81   :  { %1228 = vmatprep.subr.bf16.mxu1 %v4231_v17  ;;  %1360 = vmatpush1.bf16.msra.mxu0 %v3987_v29  ;;  %v4255_v29 = vld [vmem:[#allocation3 + $0x14] ss:$24 sps:$4 sm:$0xff]  }
  0x82   :  { %1361 = vmatprep.subr.bf16.mxu0 %v3993_v31  ;;  %v4260_v31 = vld [vmem:[#allocation3 + $0x10] ss:$24 sps:$4 sm:$0xff]  }
  0x84   :  { %1229 = vmatpush1.bf16.msra.mxu1 %v4236_v19 }
  0x85   :  { %1230 = vmatprep.subr.bf16.mxu1 %v4239_v21  ;;  %1362 = vmatpush1.bf16.msra.mxu0 %v4001_v33  ;;  %v4263_v33 = vld [vmem:[#allocation3 + $0x2e4] ss:$24 sps:$4 sm:$0xff]  }
  0x86   :  { %1363 = vmatprep.subr.bf16.mxu0 %v4007_v35  ;;  %v4268_v35 = vld [vmem:[#allocation3 + $0x2e0] ss:$24 sps:$4 sm:$0xff]  }
  0x88   :  { %1231 = vmatpush1.bf16.msra.mxu1 %v4244_v23 }
  0x89   :  { %1232 = vmatprep.subr.bf16.mxu1 %v4247_v25  ;;  %1364 = vmatpush1.bf16.msra.mxu0 %v4015_v37  ;;  %v4271_v37 = vld [vmem:[#allocation3 + $0x2b4] ss:$24 sps:$4 sm:$0xff]  }
  0x8a   :  { %1365 = vmatprep.subr.bf16.mxu0 %v4023_v39  ;;  %v4276_v39 = vld [vmem:[#allocation3 + $0x2b0] ss:$24 sps:$4 sm:$0xff]  }
  0x8c   :  { %1233 = vmatpush1.bf16.msra.mxu1 %v4252_v27 }
  0x8d   :  { %1234 = vmatprep.subr.bf16.mxu1 %v4255_v29  ;;  %1366 = vmatpush1.bf16.msra.mxu0 %v4029_v41  ;;  %v4279_v41 = vld [vmem:[#allocation3 + $0x284] ss:$24 sps:$4 sm:$0xff]  }
  0x8e   :  { %1367 = vmatprep.subr.bf16.mxu0 %v4035_v43  ;;  %v4284_v43 = vld [vmem:[#allocation3 + $0x280] ss:$24 sps:$4 sm:$0xff]  }
  0x90   :  { %1235 = vmatpush1.bf16.msra.mxu1 %v4260_v31 }
  0x91   :  { %1236 = vmatprep.subr.bf16.mxu1 %v4263_v33  ;;  %1368 = vmatpush1.bf16.msra.mxu0 %v4045_v45  ;;  %v4287_v45 = vld [vmem:[#allocation3 + $0x254] ss:$24 sps:$4 sm:$0xff]  }
  0x92   :  { %1369 = vmatprep.subr.bf16.mxu0 %v4051_v47  ;;  %v4292_v47 = vld [vmem:[#allocation3 + $0x250] ss:$24 sps:$4 sm:$0xff]  }
  0x94   :  { %1237 = vmatpush2.bf16.msra.mxu1 %v4268_v35 }
  0x95   :  { %1238 = vmatprep.subr.bf16.mxu1 %v4271_v37  ;;  %1370 = vmatpush2.bf16.msra.mxu0 %v4059_v49  ;;  %v4295_v49 = vld [vmem:[#allocation3 + $0x224] ss:$24 sps:$4 sm:$0xff]  }
  0x96   :  { %1371 = vmatprep.subr.bf16.mxu0 %v4065_v51  ;;  %v4300_v51 = vld [vmem:[#allocation3 + $0x220] ss:$24 sps:$4 sm:$0xff]  }
  0x98   :  { %1239 = vmatpush2.bf16.msra.mxu1 %v4276_v39 }
  0x99   :  { %1240 = vmatprep.subr.bf16.mxu1 %v4279_v41  ;;  %1372 = vmatpush2.bf16.msra.mxu0 %v4075_v53  ;;  %v4303_v53 = vld [vmem:[#allocation3 + $0x1f4] ss:$24 sps:$4 sm:$0xff]  }
  0x9a   :  { %1373 = vmatprep.subr.bf16.mxu0 %v4081_v55  ;;  %v4308_v55 = vld [vmem:[#allocation3 + $0x1f0] ss:$24 sps:$4 sm:$0xff]  }
  0x9c   :  { %1241 = vmatpush2.bf16.msra.mxu1 %v4284_v43 }
  0x9d   :  { %1242 = vmatprep.subr.bf16.mxu1 %v4287_v45  ;;  %1374 = vmatpush2.bf16.msra.mxu0 %v4089_v57  ;;  %v4311_v57 = vld [vmem:[#allocation3 + $0x1c4] ss:$24 sps:$4 sm:$0xff]  }
  0x9e   :  { %1375 = vmatprep.subr.bf16.mxu0 %v4095_v59  ;;  %v4316_v59 = vld [vmem:[#allocation3 + $0x1c0] ss:$24 sps:$4 sm:$0xff]  }
  0xa0   :  { %1243 = vmatpush2.bf16.msra.mxu1 %v4292_v47 }
  0xa1   :  { %1244 = vmatprep.subr.bf16.mxu1 %v4295_v49  ;;  %1376 = vmatpush2.bf16.msra.mxu0 %v4107_v61  ;;  %v4319_v61 = vld [vmem:[#allocation3 + $0x194] ss:$24 sps:$4 sm:$0xff]  }
  0xa2   :  { %1377 = vmatprep.subr.bf16.mxu0 %v4113_v63  ;;  %6297 = vst [vmem:[#allocation19_spill] sm:$0xff] %v4319_v61  ;;  %v4324_v63 = vld [vmem:[#allocation3 + $0x190] ss:$24 sps:$4 sm:$0xff]  }
  0xa3   :  { %6298 = vst [vmem:[#allocation20_spill] sm:$0xff] %v4324_v63 }
  0xa4   :  { %1245 = vmatpush2.bf16.msra.mxu1 %v4300_v51 }
  0xa5   :  { %1246 = vmatprep.subr.bf16.mxu1 %v4303_v53  ;;  %1378 = vmatpush2.bf16.msra.mxu0 %v4121_v2 }
  0xa6   :  { %1379 = vmatprep.subr.bf16.mxu0 %v4127_v4 }
  0xa8   :  { %1247 = vmatpush2.bf16.msra.mxu1 %v4308_v55 }
  0xa9   :  { %1248 = vmatprep.subr.bf16.mxu1 %v4311_v57  ;;  %1380 = vmatpush2.bf16.msra.mxu0 %v4137_v6 }
  0xaa   :  { %1381 = vmatprep.subr.bf16.mxu0 %v4143_v8 }
  0xac   :  { %1249 = vmatpush2.bf16.msra.mxu1 %v4316_v59 }
  0xad   :  { %1250 = vmatprep.subr.bf16.mxu1 %v4319_v61  ;;  %1382 = vmatpush2.bf16.msra.mxu0 %v4161_v14 }
  0xae   :  { %1383 = vmatprep.subr.bf16.mxu0 %v4167_v0 }
  0xb0   :  { %1251 = vmatpush2.bf16.msra.mxu1 %v4324_v63 }
  0xb1   :  { %1396 = vmatprep.subr.bf16.mxu1 %v3914_v12  ;;  %1384 = vmatpush2.bf16.msra.mxu0 %v4177_v7  ;;  %v76_v12 = vlaneseq }
  0xb2   :  { %1439 = vmatprep.subr.bf16.mxu0 %v4195_v16 }
  0xb3   :  { %1253 = vmatmul.mubr.bf16.vlgmr.msra.gmra.mxu1 %v4199_v10 }
  0xb4   :  { %1397 = vmatpush1.bf16.msra.mxu1 %v3951_v18  ;;  %v4344_v18 = vshrl.u32 %v76_v12, 7 }
  0xb5   :  { %1398 = vmatprep.subr.bf16.mxu1 %v3955_v20 }
  0xb6   :  { %v6074_v20 = vsub.s32 0, %v4344_v18 }
  0xb8   :  { %1399 = vmatpush1.bf16.msra.mxu1 %v3963_v22  ;;  %v4353_v22 = vld [vmem:[%s6056_s4] sm:$0x3f] }
  0xb9   :  { %1400 = vmatprep.subr.bf16.mxu1 %v3969_v24  ;;  %v6073_v24 = vsub.s32 1, %v4344_v18 }
  0xbc   :  { %1401 = vmatpush1.bf16.msra.mxu1 %v3977_v26  ;;  %v4360_v26 = vrot.slane %v4353_v22, %v6074_v20 }
  0xbd   :  { %1402 = vmatprep.subr.bf16.mxu1 %v3983_v28  ;;  %v4367_v28 = vrot.slane %v4353_v22, %v6073_v24  ;;  %v6316_v24 = vld [vmem:[#allocation10_spill] sm:$0xff] }
  0xc0   :  { %1403 = vmatpush1.bf16.msra.mxu1 %v3991_v30 }
  0xc1   :  { %1404 = vmatprep.subr.bf16.mxu1 %v3997_v32 }
  0xc4   :  { %1405 = vmatpush1.bf16.msra.mxu1 %v4005_v34 }
  0xc5   :  { %1406 = vmatprep.subr.bf16.mxu1 %v4011_v36 }
  0xc8   :  { %1407 = vmatpush1.bf16.msra.mxu1 %v4019_v38 }
  0xc9   :  { %1408 = vmatprep.subr.bf16.mxu1 %v4025_v40 }
  0xcc   :  { %1409 = vmatpush1.bf16.msra.mxu1 %v4033_v42 }
  0xcd   :  { %1410 = vmatprep.subr.bf16.mxu1 %v4039_v44 }
  0xd0   :  { %1411 = vmatpush1.bf16.msra.mxu1 %v4049_v46 }
  0xd1   :  { %1412 = vmatprep.subr.bf16.mxu1 %v4055_v48 }
  0xd3   :  { %v4369_v30 = vpop.f32.mrf.mxu0  ;;  %v275_v32 = vpop.f32.mrf.mxu1 }
  0xd4   :  { %v4372_v34 = vadd.f32 %v275_v32, %v4360_v26  ;;  %1413 = vmatpush2.bf16.msra.mxu1 %v4063_v50  ;;  %v6309_v32 = vld [vmem:[#allocation7_spill] sm:$0xff] }
  0xd5   :  { %v4375_v36 = vpop.f32.mrf.mxu0  ;;  %v277_v38 = vpop.f32.mrf.mxu1  ;;  %1414 = vmatprep.subr.bf16.mxu1 %v4069_v52 }
  0xd6   :  { %6299 = vst [vmem:[#allocation21_spill] sm:$0xff] %v4372_v34  ;;  %v4379_v40 = vadd.f32 %v277_v38, %v4367_v28 }
  0xd7   :  { %v4381_v42 = vpop.f32.mrf.mxu0  ;;  %v279_v44 = vpop.f32.mrf.mxu1 }
  0xd8   :  { %6300 = vst [vmem:[#allocation22_spill] sm:$0xff] %v4379_v40  ;;  %v4384_v46 = vadd.f32 %v279_v44, %v4360_v26  ;;  %1415 = vmatpush2.bf16.msra.mxu1 %v4079_v54  ;;  %v6310_v44 = vld [vmem:[#allocation8_spill] sm:$0xff] }
  0xd9   :  { %v4387_v48 = vpop.f32.mrf.mxu0  ;;  %v281_v2 = vpop.f32.mrf.mxu1  ;;  %1416 = vmatprep.subr.bf16.mxu1 %v4085_v56 }
  0xda   :  { %6301 = vst [vmem:[#allocation23_spill] sm:$0xff] %v4384_v46  ;;  %v4391_v50 = vadd.f32 %v281_v2, %v4367_v28 }
  0xdb   :  { %v245_v52 = vpop.f32.mrf.mxu0  ;;  %v285_v4 = vpop.f32.mrf.mxu1 }
  0xdc   :  { %6302 = vst [vmem:[#allocation24_spill] sm:$0xff] %v4391_v50  ;;  %v4394_v6 = vadd.f32 %v245_v52, %v4360_v26  ;;  %v4397_v7 = vadd.f32 %v285_v4, %v4360_v26  ;;  %1417 = vmatpush2.bf16.msra.mxu1 %v4093_v58  ;;  %v6333_v50 = vld [vmem:[#allocation6_spill] sm:$0xff] }
  0xdd   :  { %v247_v8 = vpop.f32.mrf.mxu0  ;;  %v287_v54 = vpop.f32.mrf.mxu1  ;;  %1418 = vmatprep.subr.bf16.mxu1 %v4099_v60 }
  0xde   :  { %6303 = vst [vmem:[#allocation25_spill] sm:$0xff] %v4394_v6  ;;  %6304 = vst [vmem:[#allocation26_spill] sm:$0xff] %v4397_v7  ;;  %v4402_v10 = vadd.f32 %v247_v8, %v4367_v28  ;;  %v4405_v56 = vadd.f32 %v287_v54, %v4367_v28 }
  0xdf   :  { %v249_v14 = vpop.f32.mrf.mxu0  ;;  %v289_v0 = vpop.f32.mrf.mxu1 }
  0xe0   :  { %6305 = vst [vmem:[#allocation27_spill] sm:$0xff] %v4402_v10  ;;  %6306 = vst [vmem:[#allocation28_spill] sm:$0xff] %v4405_v56  ;;  %v4408_v16 = vadd.f32 %v249_v14, %v4360_v26  ;;  %v4411_v12 = vadd.f32 %v289_v0, %v4360_v26  ;;  %1419 = vmatpush2.bf16.msra.mxu1 %v6309_v32  ;;  %v6315_v14 = vld [vmem:[#allocation9_spill] sm:$0xff] }
  0xe1   :  { %v251_v58 = vpop.f32.mrf.mxu0  ;;  %v291_v38 = vpop.f32.mrf.mxu1  ;;  %1420 = vmatprep.subr.bf16.mxu1 %v6310_v44 }
  0xe2   :  { %6307 = vst [vmem:[#allocation29_spill] sm:$0xff] %v4408_v16  ;;  %6308 = vst [vmem:[#allocation30_spill] sm:$0xff] %v4411_v12  ;;  %v4416_v60 = vadd.f32 %v251_v58, %v4367_v28  ;;  %v4419_v2 = vadd.f32 %v291_v38, %v4367_v28  ;;  %v6322_v12 = vld [vmem:[#allocation12_spill] sm:$0xff] }
  0xe3   :  { %v255_v52 = vpop.f32.mrf.mxu0  ;;  %v295_v4 = vpop.f32.mrf.mxu1 }
  0xe4   :  { %6311 = vst [vmem:[#allocation7_spill] sm:$0xff] %v4416_v60  ;;  %6312 = vst [vmem:[#allocation8_spill] sm:$0xff] %v4419_v2  ;;  %v4422_v8 = vadd.f32 %v255_v52, %v4360_v26  ;;  %v4425_v54 = vadd.f32 %v295_v4, %v4360_v26  ;;  %1421 = vmatpush2.bf16.msra.mxu1 %v6315_v14 }
  0xe5   :  { %v257_v0 = vpop.f32.mrf.mxu0  ;;  %v297_v32 = vpop.f32.mrf.mxu1  ;;  %1422 = vmatprep.subr.bf16.mxu1 %v6316_v24 }
  0xe6   :  { %6313 = vst [vmem:[#allocation31_spill] sm:$0xff] %v4422_v8  ;;  %6314 = vst [vmem:[#allocation32_spill] sm:$0xff] %v4425_v54  ;;  %v4430_v58 = vadd.f32 %v257_v0, %v4367_v28  ;;  %v4433_v38 = vadd.f32 %v297_v32, %v4367_v28  ;;  %v6321_v54 = vld [vmem:[#allocation11_spill] sm:$0xff] }
  0xe7   :  { %v259_v44 = vpop.f32.mrf.mxu0  ;;  %v299_v20 = vpop.f32.mrf.mxu1 }
  0xe8   :  { %6317 = vst [vmem:[#allocation9_spill] sm:$0xff] %v4430_v58  ;;  %6318 = vst [vmem:[#allocation10_spill] sm:$0xff] %v4433_v38  ;;  %v4436_v52 = vadd.f32 %v259_v44, %v4360_v26  ;;  %v4439_v4 = vadd.f32 %v299_v20, %v4360_v26  ;;  %1423 = vmatpush2.bf16.msra.mxu1 %v6321_v54 }
  0xe9   :  { %v261_v14 = vpop.f32.mrf.mxu0  ;;  %v301_v2 = vpop.f32.mrf.mxu1  ;;  %1424 = vmatprep.subr.bf16.mxu1 %v6322_v12 }
  0xea   :  { %6319 = vst [vmem:[#allocation33_spill] sm:$0xff] %v4436_v52  ;;  %6320 = vst [vmem:[#allocation34_spill] sm:$0xff] %v4439_v4  ;;  %v4444_v24 = vadd.f32 %v261_v14, %v4367_v28  ;;  %v4447_v0 = vadd.f32 %v301_v2, %v4367_v28  ;;  %v6327_v4 = vld [vmem:[#allocation15_spill] sm:$0xff] }
  0xeb   :  { %v265_v32 = vpop.f32.mrf.mxu0  ;;  %v305_v38 = vpop.f32.mrf.mxu1 }
  0xec   :  { %6323 = vst [vmem:[#allocation11_spill] sm:$0xff] %v4444_v24  ;;  %6324 = vst [vmem:[#allocation12_spill] sm:$0xff] %v4447_v0  ;;  %v4450_v44 = vadd.f32 %v265_v32, %v4360_v26  ;;  %v4453_v20 = vadd.f32 %v305_v38, %v4360_v26  ;;  %1425 = vmatpush2.bf16.msra.mxu1 %v6327_v4 }
  0xed   :  { %v267_v54 = vpop.f32.mrf.mxu0  ;;  %v307_v56 = vpop.f32.mrf.mxu1  ;;  %1426 = vmatprep.subr.bf16.mxu1 %v4169_v5 }
  0xee   :  { %6325 = vst [vmem:[#allocation35_spill] sm:$0xff] %v4450_v44  ;;  %6326 = vst [vmem:[#allocation36_spill] sm:$0xff] %v4453_v20  ;;  %v4458_v12 = vadd.f32 %v267_v54, %v4367_v28  ;;  %v4461_v2 = vadd.f32 %v307_v56, %v4367_v28  ;;  %v6332_v20 = vld [vmem:[#allocation16_spill] sm:$0xff] }
  0xef   :  { %v269_v14 = vpop.f32.mrf.mxu0  ;;  %v309_v0 = vpop.f32.mrf.mxu1 }
  0xf0   :  { %6328 = vst [vmem:[#allocation15_spill] sm:$0xff] %v4458_v12  ;;  %6329 = vst [vmem:[#allocation37_spill] sm:$0xff] %v4461_v2  ;;  %v4464_v32 = vadd.f32 %v269_v14, %v4360_v26  ;;  %v4467_v38 = vadd.f32 %v309_v0, %v4360_v26  ;;  %1427 = vmatpush2.bf16.msra.mxu1 %v6332_v20  ;;  %v86_v20 = vsub.s32 2, %v4344_v18 }
  0xf1   :  { %v271_v4 = vpop.f32.mrf.mxu0  ;;  %v311_v7 = vpop.f32.mrf.mxu1  ;;  %1573 = vmatprep.subr.bf16.mxu1 %v6333_v50 }
  0xf2   :  { %6330 = vst [vmem:[#allocation38_spill] sm:$0xff] %v4464_v32  ;;  %6331 = vst [vmem:[#allocation39_spill] sm:$0xff] %v4467_v38  ;;  %v4472_v5 = vadd.f32 %v271_v4, %v4367_v28  ;;  %v4475_v56 = vadd.f32 %v311_v7, %v4367_v28  ;;  %v94_v38 = vsub.s32 4, %v4344_v18  ;;  %v90_v4 = vsub.s32 3, %v4344_v18 }
  0xf3   :  { %v4477_v54 = vpop.f32.mrf.mxu1  ;;  %v4479_v2 = vpop.f32.mrf.mxu0  ;;  %v98_v7 = vsub.s32 5, %v4344_v18  ;;  %v4498_v34 = vrot.slane %v4353_v22, %v86_v20 }
  0xf4   :  { %6334 = vst [vmem:[#allocation16_spill] sm:$0xff] %v4472_v5  ;;  %6335 = vst [vmem:[#allocation6_spill] sm:$0xff] %v4475_v56  ;;  %v4501_v5 = vrot.slane %v4353_v22, %v94_v38  ;;  %v4504_v44 = vrot.slane %v4353_v22, %v90_v4 }
  0xf5   :  { %v4481_v14 = vpop.f32.mrf.mxu1  ;;  %v4483_v0 = vpop.f32.mrf.mxu0  ;;  %v4507_v24 = vrot.slane %v4353_v22, %v98_v7 }
  0xf7   :  { %v4487_v46 = vpop.f32.mrf.mxu1  ;;  %v4489_v50 = vpop.f32.mrf.mxu0 }
  0xf9   :  { %v4493_v56 = vpop.f32.mrf.mxu1  ;;  %v4495_v40 = vpop.f32.mrf.mxu0 }
  0xfb   :  { %v358_v32 = vpop.f32.mrf.mxu1  ;;  %v471_v12 = vpop.f32.mrf.mxu0 }
  0xfc   :  { %v4510_v52 = vadd.f32 %v358_v32, %v4498_v34  ;;  %v4513_v58 = vadd.f32 %v471_v12, %v4501_v5 }
  0xfd   :  { %v360_v8 = vpop.f32.mrf.mxu1  ;;  %v473_v20 = vpop.f32.mrf.mxu0 }
  0xfe   :  { %6336 = vst [vmem:[#allocation40_spill] sm:$0xff] %v4510_v52  ;;  %6337 = vst [vmem:[#allocation41_spill] sm:$0xff] %v4513_v58  ;;  %v4516_v60 = vadd.f32 %v360_v8, %v4504_v44  ;;  %v4519_v38 = vadd.f32 %v473_v20, %v4507_v24 }
  0xff   :  { %v362_v16 = vpop.f32.mrf.mxu1  ;;  %v475_v4 = vpop.f32.mrf.mxu0 }
 0x100   :  { %6338 = vst [vmem:[#allocation42_spill] sm:$0xff] %v4516_v60  ;;  %6339 = vst [vmem:[#allocation43_spill] sm:$0xff] %v4519_v38  ;;  %v4522_v10 = vadd.f32 %v362_v16, %v4498_v34  ;;  %v4525_v22 = vadd.f32 %v475_v4, %v4501_v5 }
 0x101   :  { %v364_v32 = vpop.f32.mrf.mxu1  ;;  %v477_v7 = vpop.f32.mrf.mxu0 }
 0x102   :  { %6340 = vst [vmem:[#allocation44_spill] sm:$0xff] %v4522_v10  ;;  %6341 = vst [vmem:[#allocation45_spill] sm:$0xff] %v4525_v22  ;;  %v4528_v12 = vadd.f32 %v364_v32, %v4504_v44  ;;  %v4531_v58 = vadd.f32 %v477_v7, %v4507_v24 }
 0x103   :  { %v368_v8 = vpop.f32.mrf.mxu1  ;;  %v481_v60 = vpop.f32.mrf.mxu0 }
 0x104   :  { %6342 = vst [vmem:[#allocation46_spill] sm:$0xff] %v4528_v12  ;;  %6343 = vst [vmem:[#allocation47_spill] sm:$0xff] %v4531_v58  ;;  %v4534_v20 = vadd.f32 %v368_v8, %v4498_v34  ;;  %v4537_v38 = vadd.f32 %v481_v60, %v4501_v5 }
 0x105   :  { %v370_v16 = vpop.f32.mrf.mxu1  ;;  %v483_v10 = vpop.f32.mrf.mxu0 }
 0x106   :  { %6344 = vst [vmem:[#allocation48_spill] sm:$0xff] %v4534_v20  ;;  %6345 = vst [vmem:[#allocation49_spill] sm:$0xff] %v4537_v38  ;;  %v4540_v4 = vadd.f32 %v370_v16, %v4504_v44  ;;  %v4543_v22 = vadd.f32 %v483_v10, %v4507_v24 }
 0x107   :  { %v372_v32 = vpop.f32.mrf.mxu1  ;;  %v485_v12 = vpop.f32.mrf.mxu0 }
 0x108   :  { %6346 = vst [vmem:[#allocation50_spill] sm:$0xff] %v4540_v4  ;;  %6347 = vst [vmem:[#allocation51_spill] sm:$0xff] %v4543_v22  ;;  %v4546_v7 = vadd.f32 %v372_v32, %v4498_v34  ;;  %v4549_v58 = vadd.f32 %v485_v12, %v4501_v5 }
 0x109   :  { %v374_v8 = vpop.f32.mrf.mxu1  ;;  %v487_v20 = vpop.f32.mrf.mxu0 }
 0x10a   :  { %6348 = vst [vmem:[#allocation52_spill] sm:$0xff] %v4546_v7  ;;  %6349 = vst [vmem:[#allocation53_spill] sm:$0xff] %v4549_v58  ;;  %v4552_v60 = vadd.f32 %v374_v8, %v4504_v44  ;;  %v4555_v38 = vadd.f32 %v487_v20, %v4507_v24 }
 0x10b   :  { %v378_v16 = vpop.f32.mrf.mxu1  ;;  %v491_v4 = vpop.f32.mrf.mxu0 }
 0x10c   :  { %6350 = vst [vmem:[#allocation54_spill] sm:$0xff] %v4552_v60  ;;  %6351 = vst [vmem:[#allocation55_spill] sm:$0xff] %v4555_v38  ;;  %v4558_v10 = vadd.f32 %v378_v16, %v4498_v34  ;;  %v4561_v22 = vadd.f32 %v491_v4, %v4501_v5 }
 0x10d   :  { %v380_v32 = vpop.f32.mrf.mxu1  ;;  %v493_v7 = vpop.f32.mrf.mxu0 }
 0x10e   :  { %6352 = vst [vmem:[#allocation56_spill] sm:$0xff] %v4558_v10  ;;  %6353 = vst [vmem:[#allocation57_spill] sm:$0xff] %v4561_v22  ;;  %v4564_v12 = vadd.f32 %v380_v32, %v4504_v44  ;;  %v4567_v58 = vadd.f32 %v493_v7, %v4507_v24 }
 0x10f   :  { %v382_v8 = vpop.f32.mrf.mxu1  ;;  %v495_v60 = vpop.f32.mrf.mxu0 }
 0x110   :  { %6354 = vst [vmem:[#allocation58_spill] sm:$0xff] %v4564_v12  ;;  %6355 = vst [vmem:[#allocation59_spill] sm:$0xff] %v4567_v58  ;;  %v4570_v20 = vadd.f32 %v382_v8, %v4498_v34  ;;  %v4573_v38 = vadd.f32 %v495_v60, %v4501_v5 }
 0x111   :  { %v384_v16 = vpop.f32.mrf.mxu1  ;;  %v497_v10 = vpop.f32.mrf.mxu0 }
 0x112   :  { %6356 = vst [vmem:[#allocation60_spill] sm:$0xff] %v4570_v20  ;;  %6357 = vst [vmem:[#allocation61_spill] sm:$0xff] %v4573_v38  ;;  %v4576_v4 = vadd.f32 %v384_v16, %v4504_v44  ;;  %v4579_v22 = vadd.f32 %v497_v10, %v4507_v24 }
 0x113   :  { %v388_v32 = vpop.f32.mrf.mxu1  ;;  %v501_v12 = vpop.f32.mrf.mxu0 }
 0x114   :  { %6358 = vst [vmem:[#allocation62_spill] sm:$0xff] %v4576_v4  ;;  %6359 = vst [vmem:[#allocation63_spill] sm:$0xff] %v4579_v22  ;;  %v4582_v7 = vadd.f32 %v388_v32, %v4498_v34  ;;  %v4585_v58 = vadd.f32 %v501_v12, %v4501_v5 }
 0x115   :  { %v390_v8 = vpop.f32.mrf.mxu1  ;;  %v503_v20 = vpop.f32.mrf.mxu0 }
 0x116   :  { %6360 = vst [vmem:[#allocation64_spill] sm:$0xff] %v4582_v7  ;;  %6361 = vst [vmem:[#allocation65_spill] sm:$0xff] %v4585_v58  ;;  %v4588_v60 = vadd.f32 %v390_v8, %v4504_v44  ;;  %v4591_v38 = vadd.f32 %v503_v20, %v4507_v24 }
 0x117   :  { %v392_v16 = vpop.f32.mrf.mxu1  ;;  %v505_v4 = vpop.f32.mrf.mxu0 }
 0x118   :  { %6362 = vst [vmem:[#allocation66_spill] sm:$0xff] %v4588_v60  ;;  %6363 = vst [vmem:[#allocation67_spill] sm:$0xff] %v4591_v38  ;;  %v4594_v10 = vadd.f32 %v392_v16, %v4498_v34  ;;  %v4597_v22 = vadd.f32 %v505_v4, %v4501_v5 }
 0x119   :  { %v394_v32 = vpop.f32.mrf.mxu1  ;;  %v507_v7 = vpop.f32.mrf.mxu0 }
 0x11a   :  { %6364 = vst [vmem:[#allocation68_spill] sm:$0xff] %v4594_v10  ;;  %6365 = vst [vmem:[#allocation69_spill] sm:$0xff] %v4597_v22  ;;  %v4600_v12 = vadd.f32 %v394_v32, %v4504_v44  ;;  %v4603_v58 = vadd.f32 %v507_v7, %v4507_v24 }
 0x11b   :  { %v398_v8 = vpop.f32.mrf.mxu1  ;;  %v511_v60 = vpop.f32.mrf.mxu0 }
 0x11c   :  { %6366 = vst [vmem:[#allocation70_spill] sm:$0xff] %v4600_v12  ;;  %6367 = vst [vmem:[#allocation71_spill] sm:$0xff] %v4603_v58  ;;  %v4606_v20 = vadd.f32 %v398_v8, %v4498_v34  ;;  %v4609_v38 = vadd.f32 %v511_v60, %v4501_v5 }
 0x11d   :  { %v400_v16 = vpop.f32.mrf.mxu1  ;;  %v513_v10 = vpop.f32.mrf.mxu0 }
 0x11e   :  { %6368 = vst [vmem:[#allocation72_spill] sm:$0xff] %v4606_v20  ;;  %6369 = vst [vmem:[#allocation73_spill] sm:$0xff] %v4609_v38  ;;  %v4612_v4 = vadd.f32 %v400_v16, %v4504_v44  ;;  %v4615_v22 = vadd.f32 %v513_v10, %v4507_v24 }
 0x11f   :  { %v402_v32 = vpop.f32.mrf.mxu1  ;;  %v515_v12 = vpop.f32.mrf.mxu0 }
 0x120   :  { %6370 = vst [vmem:[#allocation74_spill] sm:$0xff] %v4612_v4  ;;  %6371 = vst [vmem:[#allocation75_spill] sm:$0xff] %v4615_v22  ;;  %v4618_v7 = vadd.f32 %v402_v32, %v4498_v34  ;;  %v4621_v58 = vadd.f32 %v515_v12, %v4501_v5 }
 0x121   :  { %v404_v8 = vpop.f32.mrf.mxu1  ;;  %v517_v20 = vpop.f32.mrf.mxu0 }
 0x122   :  { %6372 = vst [vmem:[#allocation76_spill] sm:$0xff] %v4618_v7  ;;  %6373 = vst [vmem:[#allocation77_spill] sm:$0xff] %v4621_v58  ;;  %v4624_v60 = vadd.f32 %v404_v8, %v4504_v44  ;;  %v4627_v38 = vadd.f32 %v517_v20, %v4507_v24 }
 0x123   :  { %v408_v16 = vpop.f32.mrf.mxu1  ;;  %v521_v4 = vpop.f32.mrf.mxu0 }
 0x124   :  { %6374 = vst [vmem:[#allocation78_spill] sm:$0xff] %v4624_v60  ;;  %6375 = vst [vmem:[#allocation79_spill] sm:$0xff] %v4627_v38  ;;  %v4630_v10 = vadd.f32 %v408_v16, %v4498_v34  ;;  %v4633_v22 = vadd.f32 %v521_v4, %v4501_v5 }
 0x125   :  { %v410_v32 = vpop.f32.mrf.mxu1  ;;  %v523_v7 = vpop.f32.mrf.mxu0 }
 0x126   :  { %6376 = vst [vmem:[#allocation80_spill] sm:$0xff] %v4630_v10  ;;  %6377 = vst [vmem:[#allocation81_spill] sm:$0xff] %v4633_v22  ;;  %v4636_v12 = vadd.f32 %v410_v32, %v4504_v44  ;;  %v4639_v58 = vadd.f32 %v523_v7, %v4507_v24 }
 0x127   :  { %v412_v8 = vpop.f32.mrf.mxu1  ;;  %v525_v60 = vpop.f32.mrf.mxu0 }
 0x128   :  { %6378 = vst [vmem:[#allocation82_spill] sm:$0xff] %v4636_v12  ;;  %6379 = vst [vmem:[#allocation83_spill] sm:$0xff] %v4639_v58  ;;  %v4642_v20 = vadd.f32 %v412_v8, %v4498_v34  ;;  %v4645_v38 = vadd.f32 %v525_v60, %v4501_v5 }
 0x129   :  { %v414_v16 = vpop.f32.mrf.mxu1  ;;  %v527_v10 = vpop.f32.mrf.mxu0 }
 0x12a   :  { %6380 = vst [vmem:[#allocation84_spill] sm:$0xff] %v4642_v20  ;;  %6381 = vst [vmem:[#allocation85_spill] sm:$0xff] %v4645_v38  ;;  %v4648_v4 = vadd.f32 %v414_v16, %v4504_v44  ;;  %v4651_v22 = vadd.f32 %v527_v10, %v4507_v24 }
 0x12b   :  { %v418_v32 = vpop.f32.mrf.mxu1  ;;  %v531_v12 = vpop.f32.mrf.mxu0 }
 0x12c   :  { %6382 = vst [vmem:[#allocation86_spill] sm:$0xff] %v4648_v4  ;;  %6383 = vst [vmem:[#allocation87_spill] sm:$0xff] %v4651_v22  ;;  %v4654_v7 = vadd.f32 %v418_v32, %v4498_v34  ;;  %v4657_v58 = vadd.f32 %v531_v12, %v4501_v5 }
 0x12d   :  { %v420_v8 = vpop.f32.mrf.mxu1  ;;  %v533_v20 = vpop.f32.mrf.mxu0 }
 0x12e   :  { %6384 = vst [vmem:[#allocation88_spill] sm:$0xff] %v4654_v7  ;;  %6385 = vst [vmem:[#allocation89_spill] sm:$0xff] %v4657_v58  ;;  %v4660_v60 = vadd.f32 %v420_v8, %v4504_v44  ;;  %v4663_v38 = vadd.f32 %v533_v20, %v4507_v24  ;;  %v236_v20 = vadd.f32 %v4369_v30, %v4360_v26 }
 0x12f   :  { %v422_v16 = vpop.f32.mrf.mxu1  ;;  %v535_v4 = vpop.f32.mrf.mxu0 }
 0x130   :  { %6386 = vst [vmem:[#allocation90_spill] sm:$0xff] %v4660_v60  ;;  %6387 = vst [vmem:[#allocation91_spill] sm:$0xff] %v4663_v38  ;;  %v4666_v10 = vadd.f32 %v422_v16, %v4498_v34  ;;  %v4669_v22 = vadd.f32 %v535_v4, %v4501_v5  ;;  %v238_v16 = vadd.f32 %v4375_v36, %v4367_v28 }
 0x131   :  { %v424_v32 = vpop.f32.mrf.mxu1  ;;  %v537_v7 = vpop.f32.mrf.mxu0  ;;  %v240_v4 = vadd.f32 %v4381_v42, %v4360_v26  ;;  %v349_v26 = vadd.f32 %v4477_v54, %v4498_v34 }
 0x132   :  { %6388 = vst [vmem:[#allocation92_spill] sm:$0xff] %v4666_v10  ;;  %6389 = vst [vmem:[#allocation93_spill] sm:$0xff] %v4669_v22  ;;  %v4672_v12 = vadd.f32 %v424_v32, %v4504_v44  ;;  %v4675_v58 = vadd.f32 %v537_v7, %v4507_v24  ;;  %v242_v32 = vadd.f32 %v4387_v48, %v4367_v28 }
 0x133   :  { %v1168_v8 = vpop.f32.mrf.mxu1  ;;  %v1211_v30 = vpop.f32.mrf.mxu0 }
 0x134   :  { %6390 = vst [vmem:[#allocation94_spill] sm:$0xff] %v4672_v12  ;;  %6391 = vst [vmem:[#allocation95_spill] sm:$0xff] %v4675_v58  ;;  %v1263_v10 = vadd.f32 %v1168_v8, %v236_v20  ;;  %v1265_v28 = vadd.f32 %v1211_v30, %v349_v26 }
 0x135   :  { %v1170_v60 = vpop.f32.mrf.mxu1  ;;  %v1213_v36 = vpop.f32.mrf.mxu0 }
 0x136   :  { %v1264_v22 = vadd.f32 %v1170_v60, %v238_v16  ;;  %v3042_v7 = vmul.f32 -1.442695, %v1263_v10  ;;  %v351_v60 = vadd.f32 %v4481_v14, %v4504_v44 }
 0x137   :  { %v1172_v38 = vpop.f32.mrf.mxu1  ;;  %v1215_v42 = vpop.f32.mrf.mxu0 }
 0x138   :  { %v1267_v58 = vadd.f32 %v1172_v38, %v240_v4  ;;  %v3043_v12 = vmul.f32 -1.442695, %v1264_v22  ;;  %3287 = vpow2.f32 %v3042_v7  ;;  %v1266_v38 = vadd.f32 %v1213_v36, %v351_v60 }
 0x139   :  { %v1174_v52 = vpop.f32.mrf.mxu1  ;;  %v6393_v7 = vsub.s32 1, %v4344_v18 }
 0x13a   :  { %v1268_v6 = vadd.f32 %v1174_v52, %v242_v32  ;;  %v3046_v63 = vmul.f32 -1.442695, %v1267_v58  ;;  %3289 = vpow2.f32 %v3043_v12  ;;  %v353_v52 = vadd.f32 %v4487_v46, %v4498_v34  ;;  %v1217_v58 = vpop.f32.mrf.mxu0 }
 0x13b   :  { %v3045_v54 = vmul.f32 -1.442695, %v1266_v38 }
 0x13c   :  { %v3047_v61 = vmul.f32 -1.442695, %v1268_v6  ;;  %3291 = vpow2.f32 %v3046_v63  ;;  %v355_v63 = vadd.f32 %v4493_v56, %v4504_v44  ;;  %v3044_v6 = vmul.f32 -1.442695, %v1265_v28  ;;  %v636_v44 = vld [vmem:[%s6057_s5] sm:$0x3] }
 0x13d   :  { %v6392_v56 = vsub.s32 0, %v4344_v18  ;;  %v4702_v30 = vrot.slane %v636_v44, %v6393_v7  ;;  %v464_v18 = vadd.f32 %v4483_v0, %v4507_v24  ;;  %v468_v0 = vadd.f32 %v4495_v40, %v4507_v24 }
 0x13e   :  { %3293 = vpow2.f32 %v3047_v61  ;;  %v1269_v61 = vadd.f32 %v1215_v42, %v353_v52  ;;  %v1270_v8 = vadd.f32 %v1217_v58, %v355_v63  ;;  %v462_v52 = vadd.f32 %v4479_v2, %v4501_v5 }
 0x13f   :  { %3295 = vpow2.f32 %v3044_v6  ;;  %v4698_v32 = vrot.slane %v636_v44, %v6392_v56 }
 0x140   :  { %v3048_v14 = vmul.f32 -1.442695, %v1269_v61  ;;  %v3049_v34 = vmul.f32 -1.442695, %v1270_v8 }
 0x145   :  { %v3288_v48 = vpop.eup %3287 }
 0x146   :  { %v1295_v10 = vadd.f32 1.0, %v3288_v48 }
 0x147   :  { %v3290_v22 = vpop.eup %3289 }
 0x148   :  { %v1296_v20 = vadd.f32 1.0, %v3290_v22  ;;  %3297 = vrcp.f32 %v1295_v10 }
 0x149   :  { %v3292_v12 = vpop.eup %3291  ;;  %3299 = vpow2.f32 %v3045_v54 }
 0x14a   :  { %v1299_v4 = vadd.f32 1.0, %v3292_v12  ;;  %3301 = vrcp.f32 %v1296_v20  ;;  %v466_v20 = vadd.f32 %v4489_v50, %v4501_v5 }
 0x14b   :  { %v3294_v16 = vpop.eup %3293  ;;  %3303 = vpow2.f32 %v3048_v14 }
 0x14c   :  { %v1300_v46 = vadd.f32 1.0, %v3294_v16  ;;  %3305 = vrcp.f32 %v1299_v4  ;;  %v3296_v26 = vpop.eup %3295 }
 0x14d   :  { %3307 = vpow2.f32 %v3049_v34  ;;  %v1297_v63 = vadd.f32 1.0, %v3296_v26 }
 0x14e   :  { %3309 = vrcp.f32 %v1300_v46 }
 0x155   :  { %v3298_v60 = vpop.eup %3297 }
 0x156   :  { %v3300_v48 = vpop.eup %3299 }
 0x157   :  { %v3302_v22 = vpop.eup %3301  ;;  %v1298_v16 = vadd.f32 1.0, %v3300_v48 }
 0x158   :  { %v3304_v61 = vpop.eup %3303 }
 0x159   :  { %v3306_v8 = vpop.eup %3305  ;;  %v1301_v56 = vadd.f32 1.0, %v3304_v61 }
 0x15a   :  { %v3308_v14 = vpop.eup %3307 }
 0x15b   :  { %v3310_v44 = vpop.eup %3309  ;;  %v1302_v26 = vadd.f32 1.0, %v3308_v14 }
 0x173   :  { %v1254_v36 = vpop.f32.mrf.mxu1 }
 0x174   :  { %v1319_v42 = vadd.f32 %v1254_v36, %v4698_v32 }
 0x175   :  { %v1256_v28 = vpop.f32.mrf.mxu1 }
 0x176   :  { %v1323_v38 = vmul.f32 %v3298_v60, %v1319_v42  ;;  %v1320_v58 = vadd.f32 %v1256_v28, %v4702_v30  ;;  %v6394_v60 = vld [vmem:[#allocation17_spill] sm:$0xff] }
 0x177   :  { %v1258_v6 = vpop.f32.mrf.mxu1 }
 0x178   :  { %v1327_v10 = vadd.f32 %v1323_v38, %v462_v52  ;;  %v1324_v12 = vmul.f32 %v3302_v22, %v1320_v58  ;;  %v1321_v54 = vadd.f32 %v1258_v6, %v4698_v32  ;;  %v6395_v38 = vld [vmem:[#allocation13_spill] sm:$0xff]  ;;  %v6396_v6 = vld [vmem:[#allocation18_spill] sm:$0xff] }
 0x179   :  { %v1260_v2 = vpop.f32.mrf.mxu1 }
 0x17a   :  { %3311 = vtanh.f32 %v1327_v10  ;;  %v1328_v4 = vadd.f32 %v1324_v12, %v464_v18  ;;  %v1325_v34 = vmul.f32 %v3306_v8, %v1321_v54  ;;  %v1322_v46 = vadd.f32 %v1260_v2, %v4702_v30  ;;  %v6397_v12 = vld [vmem:[#allocation14_spill] sm:$0xff] }
 0x17b   :  { %3313 = vrcp.f32 %v1297_v63 }
 0x17c   :  { %3315 = vtanh.f32 %v1328_v4  ;;  %v1329_v7 = vadd.f32 %v1325_v34, %v466_v20  ;;  %v1326_v36 = vmul.f32 %v3310_v44, %v1322_v46 }
 0x17d   :  { %3317 = vrcp.f32 %v1298_v16 }
 0x17e   :  { %3319 = vtanh.f32 %v1329_v7  ;;  %v1330_v5 = vadd.f32 %v1326_v36, %v468_v0  ;;  %v4748_v0 = vld [vmem:[#allocation3 + $0x150] ss:$24 sps:$4 sm:$0xff]   ;;  %v4751_v7 = vld [vmem:[#allocation3 + $0x124] ss:$24 sps:$4 sm:$0xff]   ;;  %v4756_v36 = vld [vmem:[#allocation3 + $0x120] ss:$24 sps:$4 sm:$0xff]  }
 0x17f   :  { %3321 = vrcp.f32 %v1301_v56 }
 0x180   :  { %3323 = vtanh.f32 %v1330_v5  ;;  %v4863_v5 = vld [vmem:[#allocation3 + $0x184] ss:$24 sps:$4 sm:$0xff]  }
 0x181   :  { %3325 = vrcp.f32 %v1302_v26  ;;  %v4767_v26 = vld [vmem:[#allocation3 + $0xc4] ss:$24 sps:$4 sm:$0xff]   ;;  %6411 = vst [vmem:[#allocation103_spill] sm:$0xff] %v4863_v5 }
 0x187   :  { %v3312_v50 = vpop.eup %3311 }
 0x188   :  { %v3314_v42 = vpop.eup %3313  ;;  %v1335_v28 = vsub.f32 %v6394_v60, %v3312_v50  ;;  %v4880_v60 = vld [vmem:[#allocation3 + $0x12c] ss:$24 sps:$4 sm:$0xff]  }
 0x189   :  { %v3316_v48 = vpop.eup %3315  ;;  %6417 = vst [vmem:[#allocation107_spill] sm:$0xff] %v4880_v60 }
 0x18a   :  { %v3318_v52 = vpop.eup %3317  ;;  %v1336_v58 = vsub.f32 %v6395_v38, %v3316_v48  ;;  %v1339_v22 = vmul.f32 %v3314_v42, %v1335_v28  ;;  %v4877_v42 = vld [vmem:[#allocation3 + $0x158] ss:$24 sps:$4 sm:$0xff]   ;;  %v4883_v28 = vld [vmem:[#allocation3 + $0x128] ss:$24 sps:$4 sm:$0xff]   ;;  %v4892_v38 = vld [vmem:[#allocation3 + $0xcc] ss:$24 sps:$4 sm:$0xff]  }
 0x18b   :  { %v3320_v40 = vpop.eup %3319  ;;  %6416 = vst [vmem:[#allocation106_spill] sm:$0xff] %v4877_v42  ;;  %6418 = vst [vmem:[#allocation108_spill] sm:$0xff] %v4883_v28 }
 0x18c   :  { %v3322_v24 = vpop.eup %3321  ;;  %v1340_v63 = vmul.f32 %v3318_v52, %v1336_v58  ;;  %v1337_v61 = vsub.f32 %v6396_v6, %v3320_v40  ;;  %v4719_v18 = vadd.f32 %v3312_v50, %v1339_v22  ;;  %v4870_v50 = vld [vmem:[#allocation3 + $0x180] ss:$24 sps:$4 sm:$0xff]   ;;  %6421 = vst [vmem:[#allocation111_spill] sm:$0xff] %v4892_v38  ;;  %v4898_v22 = vld [vmem:[#allocation3 + $0x9c] ss:$24 sps:$4 sm:$0xff]  }
 0x18d   :  { %v3324_v10 = vpop.eup %3323  ;;  %6414 = vst [vmem:[#allocation104_spill] sm:$0xff] %v4870_v50  ;;  %v4889_v52 = vld [vmem:[#allocation3 + $0xf8] ss:$24 sps:$4 sm:$0xff]   ;;  %v4895_v58 = vld [vmem:[#allocation3 + $0xc8] ss:$24 sps:$4 sm:$0xff]   ;;  %6423 = vst [vmem:[#allocation113_spill] sm:$0xff] %v4898_v22 }
 0x18e   :  { %v1338_v54 = vsub.f32 %v6397_v12, %v3324_v10  ;;  %v4722_v8 = vadd.f32 %v3316_v48, %v1340_v63  ;;  %v1341_v20 = vmul.f32 %v3322_v24, %v1337_v61  ;;  %v3326_v16 = vpop.eup %3325  ;;  %v4886_v48 = vld [vmem:[#allocation3 + $0xfc] ss:$24 sps:$4 sm:$0xff]   ;;  %6420 = vst [vmem:[#allocation110_spill] sm:$0xff] %v4889_v52  ;;  %6422 = vst [vmem:[#allocation112_spill] sm:$0xff] %v4895_v58  ;;  %v4904_v24 = vld [vmem:[#allocation3 + $0x6c] ss:$24 sps:$4 sm:$0xff]  }
 0x18f   :  { %6419 = vst [vmem:[#allocation109_spill] sm:$0xff] %v4886_v48  ;;  %6425 = vst [vmem:[#allocation115_spill] sm:$0xff] %v4904_v24  ;;  %v4907_v63 = vld [vmem:[#allocation3 + $0x68] ss:$24 sps:$4 sm:$0xff]   ;;  %v4910_v6 = vld [vmem:[#allocation3 + $0x3c] ss:$24 sps:$4 sm:$0xff]  }
 0x190   :  { %v1342_v2 = vmul.f32 %v3326_v16, %v1338_v54  ;;  %v4724_v14 = vadd.f32 %v3320_v40, %v1341_v20  ;;  %v4901_v40 = vld [vmem:[#allocation3 + $0x98] ss:$24 sps:$4 sm:$0xff]   ;;  %6426 = vst [vmem:[#allocation116_spill] sm:$0xff] %v4907_v63  ;;  %6427 = vst [vmem:[#allocation117_spill] sm:$0xff] %v4910_v6  ;;  %v4919_v12 = vld [vmem:[#allocation3 + $0x8] ss:$24 sps:$4 sm:$0xff]  }
 0x191   :  { %6424 = vst [vmem:[#allocation114_spill] sm:$0xff] %v4901_v40  ;;  %v4913_v61 = vld [vmem:[#allocation3 + $0x38] ss:$24 sps:$4 sm:$0xff]   ;;  %6430 = vst [vmem:[#allocation120_spill] sm:$0xff] %v4919_v12  ;;  %v4922_v54 = vld [vmem:[#allocation3 + $0x2dc] ss:$24 sps:$4 sm:$0xff]  }
 0x192   :  { %v4726_v4 = vadd.f32 %v3324_v10, %v1342_v2  ;;  %v1348_v34 = vadd.f32 %v4724_v14, %v4722_v8  ;;  %v4739_v56 = vpack.c.bf16 %v4724_v14, %v4719_v18  ;;  %6428 = vst [vmem:[#allocation118_spill] sm:$0xff] %v4913_v61  ;;  %v4916_v10 = vld [vmem:[#allocation3 + $0xc] ss:$24 sps:$4 sm:$0xff]   ;;  %6431 = vst [vmem:[#allocation121_spill] sm:$0xff] %v4922_v54  ;;  %v4925_v20 = vld [vmem:[#allocation3 + $0x2d8] ss:$24 sps:$4 sm:$0xff]  }
 0x193   :  { %6429 = vst [vmem:[#allocation119_spill] sm:$0xff] %v4916_v10  ;;  %6432 = vst [vmem:[#allocation122_spill] sm:$0xff] %v4925_v20  ;;  %v4928_v16 = vld [vmem:[#allocation3 + $0x2ac] ss:$24 sps:$4 sm:$0xff]   ;;  %v4931_v2 = vld [vmem:[#allocation3 + $0x2a8] ss:$24 sps:$4 sm:$0xff]  }
 0x194   :  { %v1352_v46 = vpack.c.bf16 %v4726_v4, %v4722_v8  ;;  %v1347_v44 = vsub.f32 %v4719_v18, %v4726_v4  ;;  %1350 = vst [vmem:[%s6058_s6 + $0x8] sm:$0xff] %v1348_v34  ;;  %6433 = vst [vmem:[#allocation123_spill] sm:$0xff] %v4928_v16  ;;  %v4934_v34 = vld [vmem:[#allocation3 + $0x27c] ss:$24 sps:$4 sm:$0xff]  }
 0x195   :  { %6434 = vst [vmem:[#allocation124_spill] sm:$0xff] %v4931_v2  ;;  %6435 = vst [vmem:[#allocation125_spill] sm:$0xff] %v4934_v34 }
 0x196   :  { %1385 = vmatprep.mubr.bf16.mxu0 %v1352_v46  ;;  %1428 = vmatprep.mubr.bf16.mxu1 %v1352_v46  ;;  %1349 = vst [vmem:[%s6058_s6] sm:$0xff] %v1347_v44  ;;  %v4940_v44 = vld [vmem:[#allocation3 + $0x24c] ss:$24 sps:$4 sm:$0xff]  }
 0x197   :  { %1386 = vmatmul.mubr.bf16.vlgmr.msra.gmra.mxu0 %v4739_v56  ;;  %1429 = vmatmul.mubr.bf16.vlgmr.msra.gmra.mxu1 %v4739_v56  ;;  %6437 = vst [vmem:[#allocation127_spill] sm:$0xff] %v4940_v44 }
 0x198   :  { %1440 = vmatpush1.bf16.msra.mxu0 %v4203_v15  ;;  %1471 = vmatprep.mubr.bf16.mxu0 %v1352_v46  ;;  %v4759_v15 = vld [vmem:[#allocation3 + $0xf4] ss:$24 sps:$4 sm:$0xff]   ;;  %v4937_v46 = vld [vmem:[#allocation3 + $0x278] ss:$24 sps:$4 sm:$0xff]  }
 0x199   :  { %1441 = vmatprep.subr.bf16.mxu0 %v4206_v62  ;;  %1574 = vmatpush1.bf16.msra.mxu1 %v4748_v0  ;;  %v4764_v62 = vld [vmem:[#allocation3 + $0xf0] ss:$24 sps:$4 sm:$0xff]   ;;  %6436 = vst [vmem:[#allocation126_spill] sm:$0xff] %v4937_v46 }
 0x19a   :  { %1575 = vmatprep.subr.bf16.mxu1 %v4751_v7 }
 0x19c   :  { %1442 = vmatpush1.bf16.msra.mxu0 %v4212_v13  ;;  %v4775_v13 = vld [vmem:[#allocation3 + $0x94] ss:$24 sps:$4 sm:$0xff]  }
 0x19d   :  { %1443 = vmatprep.subr.bf16.mxu0 %v4215_v1  ;;  %1576 = vmatpush1.bf16.msra.mxu1 %v4756_v36  ;;  %v4772_v1 = vld [vmem:[#allocation3 + $0xc0] ss:$24 sps:$4 sm:$0xff]  }
 0x19e   :  { %1577 = vmatprep.subr.bf16.mxu1 %v4759_v15 }
 0x1a0   :  { %1444 = vmatpush1.bf16.msra.mxu0 %v4220_v11  ;;  %v4780_v11 = vld [vmem:[#allocation3 + $0x90] ss:$24 sps:$4 sm:$0xff]  }
 0x1a1   :  { %1445 = vmatprep.subr.bf16.mxu0 %v4223_v9  ;;  %1578 = vmatpush1.bf16.msra.mxu1 %v4764_v62  ;;  %v4783_v9 = vld [vmem:[#allocation3 + $0x64] ss:$24 sps:$4 sm:$0xff]  }
 0x1a2   :  { %1579 = vmatprep.subr.bf16.mxu1 %v4767_v26 }
 0x1a4   :  { %1446 = vmatpush1.bf16.msra.mxu0 %v4228_v3  ;;  %v4788_v3 = vld [vmem:[#allocation3 + $0x60] ss:$24 sps:$4 sm:$0xff]  }
 0x1a5   :  { %1447 = vmatprep.subr.bf16.mxu0 %v4231_v17  ;;  %1580 = vmatpush1.bf16.msra.mxu1 %v4772_v1  ;;  %v4791_v17 = vld [vmem:[#allocation3 + $0x34] ss:$24 sps:$4 sm:$0xff]  }
 0x1a6   :  { %1581 = vmatprep.subr.bf16.mxu1 %v4775_v13 }
 0x1a8   :  { %1448 = vmatpush1.bf16.msra.mxu0 %v4236_v19  ;;  %v4796_v19 = vld [vmem:[#allocation3 + $0x30] ss:$24 sps:$4 sm:$0xff]  }
 0x1a9   :  { %1449 = vmatprep.subr.bf16.mxu0 %v4239_v21  ;;  %1582 = vmatpush1.bf16.msra.mxu1 %v4780_v11  ;;  %v4799_v21 = vld [vmem:[#allocation3 + $0x4] ss:$24 sps:$4 sm:$0xff]  }
 0x1aa   :  { %1583 = vmatprep.subr.bf16.mxu1 %v4783_v9 }
 0x1ac   :  { %1450 = vmatpush1.bf16.msra.mxu0 %v4244_v23  ;;  %v4804_v23 = vld [vmem:[#allocation3] ss:$24 sps:$4 sm:$0xff]  }
 0x1ad   :  { %1451 = vmatprep.subr.bf16.mxu0 %v4247_v25  ;;  %1584 = vmatpush1.bf16.msra.mxu1 %v4788_v3  ;;  %v4807_v25 = vld [vmem:[#allocation3 + $0x2d4] ss:$24 sps:$4 sm:$0xff]  }
 0x1ae   :  { %1585 = vmatprep.subr.bf16.mxu1 %v4791_v17 }
 0x1b0   :  { %1452 = vmatpush1.bf16.msra.mxu0 %v4252_v27  ;;  %v4812_v27 = vld [vmem:[#allocation3 + $0x2d0] ss:$24 sps:$4 sm:$0xff]  }
 0x1b1   :  { %1453 = vmatprep.subr.bf16.mxu0 %v4255_v29  ;;  %1586 = vmatpush1.bf16.msra.mxu1 %v4796_v19  ;;  %v4815_v29 = vld [vmem:[#allocation3 + $0x2a4] ss:$24 sps:$4 sm:$0xff]  }
 0x1b2   :  { %1587 = vmatprep.subr.bf16.mxu1 %v4799_v21  ;;  %6398 = vst [vmem:[#allocation17_spill] sm:$0xff] %v4815_v29 }
 0x1b4   :  { %1454 = vmatpush1.bf16.msra.mxu0 %v4260_v31  ;;  %v4820_v31 = vld [vmem:[#allocation3 + $0x2a0] ss:$24 sps:$4 sm:$0xff]  }
 0x1b5   :  { %1455 = vmatprep.subr.bf16.mxu0 %v4263_v33  ;;  %1588 = vmatpush1.bf16.msra.mxu1 %v4804_v23  ;;  %6399 = vst [vmem:[#allocation13_spill] sm:$0xff] %v4820_v31  ;;  %v4823_v33 = vld [vmem:[#allocation3 + $0x274] ss:$24 sps:$4 sm:$0xff]  }
 0x1b6   :  { %1589 = vmatprep.subr.bf16.mxu1 %v4807_v25  ;;  %6400 = vst [vmem:[#allocation18_spill] sm:$0xff] %v4823_v33 }
 0x1b8   :  { %1456 = vmatpush2.bf16.msra.mxu0 %v4268_v35  ;;  %v4828_v35 = vld [vmem:[#allocation3 + $0x270] ss:$24 sps:$4 sm:$0xff]  }
 0x1b9   :  { %1457 = vmatprep.subr.bf16.mxu0 %v4271_v37  ;;  %1590 = vmatpush2.bf16.msra.mxu1 %v4812_v27  ;;  %6401 = vst [vmem:[#allocation14_spill] sm:$0xff] %v4828_v35  ;;  %v4831_v37 = vld [vmem:[#allocation3 + $0x244] ss:$24 sps:$4 sm:$0xff]  }
 0x1ba   :  { %1591 = vmatprep.subr.bf16.mxu1 %v4815_v29  ;;  %6402 = vst [vmem:[#allocation96_spill] sm:$0xff] %v4831_v37 }
 0x1bc   :  { %1458 = vmatpush2.bf16.msra.mxu0 %v4276_v39  ;;  %v4836_v39 = vld [vmem:[#allocation3 + $0x240] ss:$24 sps:$4 sm:$0xff]  }
 0x1bd   :  { %1459 = vmatprep.subr.bf16.mxu0 %v4279_v41  ;;  %1592 = vmatpush2.bf16.msra.mxu1 %v4820_v31  ;;  %6403 = vst [vmem:[#allocation97_spill] sm:$0xff] %v4836_v39  ;;  %v4839_v41 = vld [vmem:[#allocation3 + $0x214] ss:$24 sps:$4 sm:$0xff]  }
 0x1be   :  { %1593 = vmatprep.subr.bf16.mxu1 %v4823_v33  ;;  %6404 = vst [vmem:[#allocation98_spill] sm:$0xff] %v4839_v41 }
 0x1c0   :  { %1460 = vmatpush2.bf16.msra.mxu0 %v4284_v43  ;;  %v4844_v43 = vld [vmem:[#allocation3 + $0x210] ss:$24 sps:$4 sm:$0xff]  }
 0x1c1   :  { %1461 = vmatprep.subr.bf16.mxu0 %v4287_v45  ;;  %1594 = vmatpush2.bf16.msra.mxu1 %v4828_v35  ;;  %6405 = vst [vmem:[#allocation99_spill] sm:$0xff] %v4844_v43  ;;  %v4847_v45 = vld [vmem:[#allocation3 + $0x1e4] ss:$24 sps:$4 sm:$0xff]  }
 0x1c2   :  { %1595 = vmatprep.subr.bf16.mxu1 %v4831_v37  ;;  %6406 = vst [vmem:[#allocation100_spill] sm:$0xff] %v4847_v45 }
 0x1c4   :  { %1462 = vmatpush2.bf16.msra.mxu0 %v4292_v47  ;;  %v4852_v47 = vld [vmem:[#allocation3 + $0x1e0] ss:$24 sps:$4 sm:$0xff]  }
 0x1c5   :  { %1463 = vmatprep.subr.bf16.mxu0 %v4295_v49  ;;  %1596 = vmatpush2.bf16.msra.mxu1 %v4836_v39  ;;  %6407 = vst [vmem:[#allocation101_spill] sm:$0xff] %v4852_v47  ;;  %v4855_v49 = vld [vmem:[#allocation3 + $0x1b4] ss:$24 sps:$4 sm:$0xff]  }
 0x1c6   :  { %1597 = vmatprep.subr.bf16.mxu1 %v4839_v41  ;;  %6408 = vst [vmem:[#allocation102_spill] sm:$0xff] %v4855_v49 }
 0x1c8   :  { %1464 = vmatpush2.bf16.msra.mxu0 %v4300_v51  ;;  %v6409_v51 = vld [vmem:[#allocation19_spill] sm:$0xff] }
 0x1c9   :  { %1465 = vmatprep.subr.bf16.mxu0 %v4303_v53  ;;  %1598 = vmatpush2.bf16.msra.mxu1 %v4844_v43  ;;  %v4860_v53 = vld [vmem:[#allocation3 + $0x1b0] ss:$24 sps:$4 sm:$0xff]  }
 0x1ca   :  { %1599 = vmatprep.subr.bf16.mxu1 %v4847_v45  ;;  %6410 = vst [vmem:[#allocation19_spill] sm:$0xff] %v4860_v53 }
 0x1cc   :  { %1466 = vmatpush2.bf16.msra.mxu0 %v4308_v55  ;;  %v6412_v55 = vld [vmem:[#allocation20_spill] sm:$0xff] }
 0x1cd   :  { %1467 = vmatprep.subr.bf16.mxu0 %v4311_v57  ;;  %1600 = vmatpush2.bf16.msra.mxu1 %v4852_v47  ;;  %v4867_v57 = vld [vmem:[#allocation3 + $0x15c] ss:$24 sps:$4 sm:$0xff]  }
 0x1ce   :  { %1601 = vmatprep.subr.bf16.mxu1 %v4855_v49  ;;  %6413 = vst [vmem:[#allocation20_spill] sm:$0xff] %v4867_v57 }
 0x1d0   :  { %1468 = vmatpush2.bf16.msra.mxu0 %v4316_v59  ;;  %v4873_v59 = vld [vmem:[#allocation3 + $0x164] ss:$24 sps:$4 sm:$0xff]  }
 0x1d1   :  { %1469 = vmatprep.subr.bf16.mxu0 %v6409_v51  ;;  %1602 = vmatpush2.bf16.msra.mxu1 %v4860_v53  ;;  %6415 = vst [vmem:[#allocation105_spill] sm:$0xff] %v4873_v59  ;;  %v4946_v51 = vld [vmem:[#allocation3 + $0x21c] ss:$24 sps:$4 sm:$0xff]  }
 0x1d2   :  { %1603 = vmatprep.subr.bf16.mxu1 %v4863_v5  ;;  %6439 = vst [vmem:[#allocation129_spill] sm:$0xff] %v4946_v51 }
 0x1d4   :  { %1470 = vmatpush2.bf16.msra.mxu0 %v6412_v55  ;;  %v4949_v55 = vld [vmem:[#allocation3 + $0x218] ss:$24 sps:$4 sm:$0xff]  }
 0x1d5   :  { %1616 = vmatprep.subr.bf16.mxu0 %v4867_v57  ;;  %1604 = vmatpush2.bf16.msra.mxu1 %v4870_v50  ;;  %6440 = vst [vmem:[#allocation130_spill] sm:$0xff] %v4949_v55 }
 0x1d6   :  { %1659 = vmatprep.subr.bf16.mxu1 %v4873_v59 }
 0x1d7   :  { %1472 = vmatmul.mubr.bf16.vlgmr.msra.gmra.mxu0 %v4739_v56  ;;  %v4943_v56 = vld [vmem:[#allocation3 + $0x248] ss:$24 sps:$4 sm:$0xff]  }
 0x1d8   :  { %1617 = vmatpush1.bf16.msra.mxu0 %v4877_v42  ;;  %6438 = vst [vmem:[#allocation128_spill] sm:$0xff] %v4943_v56 }
 0x1d9   :  { %1618 = vmatprep.subr.bf16.mxu0 %v4880_v60 }
 0x1dc   :  { %1619 = vmatpush1.bf16.msra.mxu0 %v4883_v28 }
 0x1dd   :  { %1620 = vmatprep.subr.bf16.mxu0 %v4886_v48 }
 0x1e0   :  { %1621 = vmatpush1.bf16.msra.mxu0 %v4889_v52 }
 0x1e1   :  { %1622 = vmatprep.subr.bf16.mxu0 %v4892_v38  ;;  %v6452_v38 = vld [vmem:[#allocation40_spill] sm:$0xff] }
 0x1e4   :  { %1623 = vmatpush1.bf16.msra.mxu0 %v4895_v58 }
 0x1e5   :  { %1624 = vmatprep.subr.bf16.mxu0 %v4898_v22 }
 0x1e8   :  { %1625 = vmatpush1.bf16.msra.mxu0 %v4901_v40 }
 0x1e9   :  { %1626 = vmatprep.subr.bf16.mxu0 %v4904_v24 }
 0x1ec   :  { %1627 = vmatpush1.bf16.msra.mxu0 %v4907_v63  ;;  %v6451_v63 = vld [vmem:[#allocation7_spill] sm:$0xff] }
 0x1ed   :  { %1628 = vmatprep.subr.bf16.mxu0 %v4910_v6 }
 0x1f0   :  { %1629 = vmatpush1.bf16.msra.mxu0 %v4913_v61  ;;  %v6450_v61 = vld [vmem:[#allocation29_spill] sm:$0xff] }
 0x1f1   :  { %1630 = vmatprep.subr.bf16.mxu0 %v4916_v10 }
 0x1f4   :  { %1631 = vmatpush1.bf16.msra.mxu0 %v4919_v12 }
 0x1f5   :  { %1632 = vmatprep.subr.bf16.mxu0 %v4922_v54  ;;  %v6449_v54 = vld [vmem:[#allocation27_spill] sm:$0xff] }
 0x1f8   :  { %1633 = vmatpush2.bf16.msra.mxu0 %v4925_v20 }
 0x1f9   :  { %1634 = vmatprep.subr.bf16.mxu0 %v4928_v16 }
 0x1fc   :  { %1635 = vmatpush2.bf16.msra.mxu0 %v4931_v2 }
 0x1fd   :  { %1636 = vmatprep.subr.bf16.mxu0 %v4934_v34  ;;  %v4952_v34 = vld [vmem:[#allocation3 + $0x1ec] ss:$24 sps:$4 sm:$0xff]  }
 0x1fe   :  { %6441 = vst [vmem:[#allocation131_spill] sm:$0xff] %v4952_v34 }
 0x200   :  { %1637 = vmatpush2.bf16.msra.mxu0 %v4937_v46  ;;  %v4955_v46 = vld [vmem:[#allocation3 + $0x1e8] ss:$24 sps:$4 sm:$0xff]  }
 0x201   :  { %1638 = vmatprep.subr.bf16.mxu0 %v4940_v44  ;;  %6442 = vst [vmem:[#allocation132_spill] sm:$0xff] %v4955_v46  ;;  %v4958_v44 = vld [vmem:[#allocation3 + $0x1bc] ss:$24 sps:$4 sm:$0xff]  }
 0x202   :  { %6443 = vst [vmem:[#allocation133_spill] sm:$0xff] %v4958_v44 }
 0x204   :  { %1639 = vmatpush2.bf16.msra.mxu0 %v4943_v56  ;;  %v4961_v56 = vld [vmem:[#allocation3 + $0x1b8] ss:$24 sps:$4 sm:$0xff]  }
 0x205   :  { %1640 = vmatprep.subr.bf16.mxu0 %v4946_v51  ;;  %6444 = vst [vmem:[#allocation134_spill] sm:$0xff] %v4961_v56  ;;  %v4964_v51 = vld [vmem:[#allocation3 + $0x18c] ss:$24 sps:$4 sm:$0xff]  }
 0x206   :  { %6445 = vst [vmem:[#allocation135_spill] sm:$0xff] %v4964_v51 }
 0x208   :  { %1641 = vmatpush2.bf16.msra.mxu0 %v4949_v55  ;;  %v4967_v55 = vld [vmem:[#allocation3 + $0x188] ss:$24 sps:$4 sm:$0xff]  }
 0x209   :  { %1642 = vmatprep.subr.bf16.mxu0 %v4952_v34  ;;  %6446 = vst [vmem:[#allocation136_spill] sm:$0xff] %v4967_v55  ;;  %v4970_v34 = vld [vmem:[#allocation3 + $0x154] ss:$24 sps:$4 sm:$0xff]  }
 0x20a   :  { %6447 = vst [vmem:[#allocation137_spill] sm:$0xff] %v4970_v34 }
 0x20c   :  { %1643 = vmatpush2.bf16.msra.mxu0 %v4955_v46 }
 0x20d   :  { %1644 = vmatprep.subr.bf16.mxu0 %v4958_v44  ;;  %v6448_v44 = vld [vmem:[#allocation25_spill] sm:$0xff] }
 0x210   :  { %1645 = vmatpush2.bf16.msra.mxu0 %v4961_v56 }
 0x211   :  { %1646 = vmatprep.subr.bf16.mxu0 %v4964_v51 }
 0x214   :  { %1647 = vmatpush2.bf16.msra.mxu0 %v4967_v55 }
 0x215   :  { %1793 = vmatprep.subr.bf16.mxu0 %v4970_v34 }
 0x257   :  { %v1387_v46 = vpop.f32.mrf.mxu0  ;;  %v1430_v40 = vpop.f32.mrf.mxu1 }
 0x258   :  { %v1482_v20 = vadd.f32 %v1387_v46, %v6448_v44  ;;  %v1484_v46 = vadd.f32 %v1430_v40, %v6452_v38 }
 0x259   :  { %v1389_v2 = vpop.f32.mrf.mxu0  ;;  %v1432_v34 = vpop.f32.mrf.mxu1 }
 0x25a   :  { %v1483_v12 = vadd.f32 %v1389_v2, %v6449_v54  ;;  %v3050_v10 = vmul.f32 -1.442695, %v1482_v20  ;;  %v6453_v54 = vld [vmem:[#allocation42_spill] sm:$0xff] }
 0x25b   :  { %v1391_v16 = vpop.f32.mrf.mxu0  ;;  %v1434_v58 = vpop.f32.mrf.mxu1  ;;  %v1485_v2 = vadd.f32 %v1432_v34, %v6453_v54 }
 0x25c   :  { %v1486_v6 = vadd.f32 %v1391_v16, %v6450_v61  ;;  %v3051_v51 = vmul.f32 -1.442695, %v1483_v12  ;;  %3327 = vpow2.f32 %v3050_v10  ;;  %v3052_v61 = vmul.f32 -1.442695, %v1484_v46  ;;  %v6454_v12 = vld [vmem:[#allocation44_spill] sm:$0xff] }
 0x25d   :  { %v1393_v56 = vpop.f32.mrf.mxu0  ;;  %v1436_v20 = vpop.f32.mrf.mxu1  ;;  %v1488_v16 = vadd.f32 %v1434_v58, %v6454_v12 }
 0x25e   :  { %v1487_v24 = vadd.f32 %v1393_v56, %v6451_v63  ;;  %v3054_v55 = vmul.f32 -1.442695, %v1486_v6  ;;  %3329 = vpow2.f32 %v3051_v51  ;;  %v3053_v6 = vmul.f32 -1.442695, %v1485_v2  ;;  %v6455_v56 = vld [vmem:[#allocation46_spill] sm:$0xff] }
 0x25f   :  { %v1489_v51 = vadd.f32 %v1436_v20, %v6455_v56 }
 0x260   :  { %v3055_v22 = vmul.f32 -1.442695, %v1487_v24  ;;  %3331 = vpow2.f32 %v3054_v55 }
 0x261   :  { %v3057_v38 = vmul.f32 -1.442695, %v1489_v51 }
 0x262   :  { %3333 = vpow2.f32 %v3055_v22  ;;  %v3056_v22 = vmul.f32 -1.442695, %v1488_v16 }
 0x263   :  { %3335 = vpow2.f32 %v3052_v61 }
 0x269   :  { %v3328_v44 = vpop.eup %3327 }
 0x26a   :  { %v1514_v63 = vadd.f32 1.0, %v3328_v44 }
 0x26b   :  { %v3330_v52 = vpop.eup %3329 }
 0x26c   :  { %v1515_v24 = vadd.f32 1.0, %v3330_v52  ;;  %3337 = vrcp.f32 %v1514_v63 }
 0x26d   :  { %v3332_v10 = vpop.eup %3331  ;;  %3339 = vpow2.f32 %v3053_v6 }
 0x26e   :  { %v1518_v48 = vadd.f32 1.0, %v3332_v10  ;;  %3341 = vrcp.f32 %v1515_v24  ;;  %v6456_v10 = vld [vmem:[#allocation41_spill] sm:$0xff] }
 0x26f   :  { %v3334_v55 = vpop.eup %3333  ;;  %3343 = vpow2.f32 %v3056_v22 }
 0x270   :  { %v1519_v40 = vadd.f32 1.0, %v3334_v55  ;;  %3345 = vrcp.f32 %v1518_v48  ;;  %v3336_v34 = vpop.eup %3335 }
 0x271   :  { %3347 = vpow2.f32 %v3057_v38  ;;  %v1516_v12 = vadd.f32 1.0, %v3336_v34  ;;  %v6457_v38 = vld [vmem:[#allocation43_spill] sm:$0xff] }
 0x272   :  { %3349 = vrcp.f32 %v1519_v40 }
 0x279   :  { %v3338_v44 = vpop.eup %3337 }
 0x27a   :  { %v3340_v52 = vpop.eup %3339 }
 0x27b   :  { %v3342_v61 = vpop.eup %3341  ;;  %v1517_v24 = vadd.f32 1.0, %v3340_v52 }
 0x27c   :  { %v3344_v63 = vpop.eup %3343 }
 0x27d   :  { %v3346_v51 = vpop.eup %3345  ;;  %v1520_v34 = vadd.f32 1.0, %v3344_v63 }
 0x27e   :  { %v3348_v22 = vpop.eup %3347 }
 0x297   :  { %v1473_v58 = vpop.f32.mrf.mxu0 }
 0x298   :  { %v1538_v46 = vadd.f32 %v1473_v58, %v4698_v32 }
 0x299   :  { %v1475_v54 = vpop.f32.mrf.mxu0 }
 0x29a   :  { %v1542_v2 = vmul.f32 %v3338_v44, %v1538_v46  ;;  %v1539_v20 = vadd.f32 %v1475_v54, %v4702_v30  ;;  %v3350_v44 = vpop.eup %3349  ;;  %v6458_v54 = vld [vmem:[#allocation45_spill] sm:$0xff] }
 0x29b   :  { %v1477_v16 = vpop.f32.mrf.mxu0 }
 0x29c   :  { %v1546_v6 = vadd.f32 %v1542_v2, %v6456_v10  ;;  %v1543_v56 = vmul.f32 %v3342_v61, %v1539_v20  ;;  %v1540_v48 = vadd.f32 %v1477_v16, %v4698_v32  ;;  %v1521_v20 = vadd.f32 1.0, %v3348_v22  ;;  %v6459_v61 = vld [vmem:[#allocation47_spill] sm:$0xff] }
 0x29d   :  { %v1479_v55 = vpop.f32.mrf.mxu0 }
 0x29e   :  { %3351 = vtanh.f32 %v1546_v6  ;;  %v1547_v40 = vadd.f32 %v1543_v56, %v6457_v38  ;;  %v1544_v58 = vmul.f32 %v3346_v51, %v1540_v48  ;;  %v1541_v46 = vadd.f32 %v1479_v55, %v4702_v30 }
 0x29f   :  { %3353 = vrcp.f32 %v1516_v12 }
 0x2a0   :  { %3355 = vtanh.f32 %v1547_v40  ;;  %v1548_v28 = vadd.f32 %v1544_v58, %v6458_v54  ;;  %v1545_v2 = vmul.f32 %v3350_v44, %v1541_v46 }
 0x2a1   :  { %3357 = vrcp.f32 %v1517_v24 }
 0x2a2   :  { %3359 = vtanh.f32 %v1548_v28  ;;  %v1549_v52 = vadd.f32 %v1545_v2, %v6459_v61  ;;  %v5022_v61 = vld [vmem:[#allocation3 + $0x134] ss:$24 sps:$4 sm:$0xff]  }
 0x2a3   :  { %3361 = vrcp.f32 %v1520_v34 }
 0x2a4   :  { %3363 = vtanh.f32 %v1549_v52  ;;  %v5027_v52 = vld [vmem:[#allocation3 + $0x130] ss:$24 sps:$4 sm:$0xff]  }
 0x2a5   :  { %3365 = vrcp.f32 %v1521_v20  ;;  %v5019_v20 = vld [vmem:[#allocation3 + $0x160] ss:$24 sps:$4 sm:$0xff]  }
 0x2ab   :  { %v3352_v16 = vpop.eup %3351 }
 0x2ac   :  { %v3354_v10 = vpop.eup %3353  ;;  %v1554_v6 = vsub.f32 %v4719_v18, %v3352_v16 }
 0x2ad   :  { %v3356_v56 = vpop.eup %3355 }
 0x2ae   :  { %v3358_v48 = vpop.eup %3357  ;;  %v1555_v12 = vsub.f32 %v4722_v8, %v3356_v56  ;;  %v1558_v63 = vmul.f32 %v3354_v10, %v1554_v6  ;;  %v5035_v10 = vld [vmem:[#allocation3 + $0x100] ss:$24 sps:$4 sm:$0xff]   ;;  %v5038_v6 = vld [vmem:[#allocation3 + $0xd4] ss:$24 sps:$4 sm:$0xff]  }
 0x2af   :  { %v3360_v51 = vpop.eup %3359 }
 0x2b0   :  { %v3362_v55 = vpop.eup %3361  ;;  %v1559_v38 = vmul.f32 %v3358_v48, %v1555_v12  ;;  %v1556_v24 = vsub.f32 %v4724_v14, %v3360_v51  ;;  %v4992_v28 = vadd.f32 %v3352_v16, %v1558_v63  ;;  %v5030_v16 = vld [vmem:[#allocation3 + $0x104] ss:$24 sps:$4 sm:$0xff]   ;;  %v5051_v12 = vld [vmem:[#allocation3 + $0xa0] ss:$24 sps:$4 sm:$0xff]   ;;  %v5054_v63 = vld [vmem:[#allocation3 + $0x74] ss:$24 sps:$4 sm:$0xff]  }
 0x2b1   :  { %v3364_v22 = vpop.eup %3363  ;;  %v5046_v48 = vld [vmem:[#allocation3 + $0xa4] ss:$24 sps:$4 sm:$0xff]  }
 0x2b2   :  { %v1557_v40 = vsub.f32 %v4726_v4, %v3364_v22  ;;  %v4995_v58 = vadd.f32 %v3356_v56, %v1559_v38  ;;  %v1560_v46 = vmul.f32 %v3362_v55, %v1556_v24  ;;  %v3366_v44 = vpop.eup %3365  ;;  %v5043_v56 = vld [vmem:[#allocation3 + $0xd0] ss:$24 sps:$4 sm:$0xff]   ;;  %v5062_v55 = vld [vmem:[#allocation3 + $0x44] ss:$24 sps:$4 sm:$0xff]   ;;  %v5067_v38 = vld [vmem:[#allocation3 + $0x40] ss:$24 sps:$4 sm:$0xff]  }
 0x2b3   :  { %v5070_v24 = vld [vmem:[#allocation3 + $0x14] ss:$24 sps:$4 sm:$0xff]  }
 0x2b4   :  { %v1561_v18 = vmul.f32 %v3366_v44, %v1557_v40  ;;  %v4997_v34 = vadd.f32 %v3360_v51, %v1560_v46  ;;  %v5059_v51 = vld [vmem:[#allocation3 + $0x70] ss:$24 sps:$4 sm:$0xff]   ;;  %v5078_v40 = vld [vmem:[#allocation3 + $0x2e4] ss:$24 sps:$4 sm:$0xff]   ;;  %v5083_v46 = vld [vmem:[#allocation3 + $0x2e0] ss:$24 sps:$4 sm:$0xff]  }
 0x2b5   :  { %v5086_v44 = vld [vmem:[#allocation3 + $0x2b4] ss:$24 sps:$4 sm:$0xff]  }
 0x2b6   :  { %v4999_v54 = vadd.f32 %v3364_v22, %v1561_v18  ;;  %v1567_v8 = vadd.f32 %v4997_v34, %v4995_v58  ;;  %v5012_v4 = vpack.c.bf16 %v4997_v34, %v4992_v28  ;;  %v5075_v22 = vld [vmem:[#allocation3 + $0x10] ss:$24 sps:$4 sm:$0xff]  }
 0x2b7   :  { %v5091_v18 = vld [vmem:[#allocation3 + $0x2b0] ss:$24 sps:$4 sm:$0xff]  }
 0x2b8   :  { %v1572_v14 = vpack.c.bf16 %v4999_v54, %v4995_v58  ;;  %v1566_v2 = vsub.f32 %v4992_v28, %v4999_v54  ;;  %3059 = vst [vmem:[%s6058_s6 + $0x18] sm:$0xff] %v1567_v8  ;;  %6460 = vst [vmem:[#allocation25_spill] sm:$0xff] %v5091_v18  ;;  %v5094_v8 = vld [vmem:[#allocation3 + $0x284] ss:$24 sps:$4 sm:$0xff]  }
 0x2b9   :  { %6461 = vst [vmem:[#allocation27_spill] sm:$0xff] %v5094_v8 }
 0x2ba   :  { %1605 = vmatprep.mubr.bf16.mxu1 %v1572_v14  ;;  %1648 = vmatprep.mubr.bf16.mxu0 %v1572_v14  ;;  %3058 = vst [vmem:[%s6058_s6 + $0x10] sm:$0xff] %v1566_v2  ;;  %v5102_v2 = vld [vmem:[#allocation3 + $0x254] ss:$24 sps:$4 sm:$0xff]  }
 0x2bb   :  { %1606 = vmatmul.mubr.bf16.vlgmr.msra.gmra.mxu1 %v5012_v4  ;;  %1649 = vmatmul.mubr.bf16.vlgmr.msra.gmra.mxu0 %v5012_v4  ;;  %6463 = vst [vmem:[#allocation7_spill] sm:$0xff] %v5102_v2 }
 0x2bc   :  { %1660 = vmatpush1.bf16.msra.mxu1 %v5019_v20  ;;  %1691 = vmatprep.mubr.bf16.mxu1 %v1572_v14  ;;  %v5099_v14 = vld [vmem:[#allocation3 + $0x280] ss:$24 sps:$4 sm:$0xff]  }
 0x2bd   :  { %1661 = vmatprep.subr.bf16.mxu1 %v5022_v61  ;;  %1794 = vmatpush1.bf16.msra.mxu0 %v4748_v0  ;;  %6462 = vst [vmem:[#allocation29_spill] sm:$0xff] %v5099_v14 }
 0x2be   :  { %1795 = vmatprep.subr.bf16.mxu0 %v4751_v7 }
 0x2c0   :  { %1662 = vmatpush1.bf16.msra.mxu1 %v5027_v52 }
 0x2c1   :  { %1663 = vmatprep.subr.bf16.mxu1 %v5030_v16  ;;  %1796 = vmatpush1.bf16.msra.mxu0 %v4756_v36 }
 0x2c2   :  { %1797 = vmatprep.subr.bf16.mxu0 %v4759_v15 }
 0x2c4   :  { %1664 = vmatpush1.bf16.msra.mxu1 %v5035_v10 }
 0x2c5   :  { %1665 = vmatprep.subr.bf16.mxu1 %v5038_v6  ;;  %1798 = vmatpush1.bf16.msra.mxu0 %v4764_v62 }
 0x2c6   :  { %1799 = vmatprep.subr.bf16.mxu0 %v4767_v26 }
 0x2c8   :  { %1666 = vmatpush1.bf16.msra.mxu1 %v5043_v56 }
 0x2c9   :  { %1667 = vmatprep.subr.bf16.mxu1 %v5046_v48  ;;  %1800 = vmatpush1.bf16.msra.mxu0 %v4772_v1 }
 0x2ca   :  { %1801 = vmatprep.subr.bf16.mxu0 %v4775_v13 }
 0x2cc   :  { %1668 = vmatpush1.bf16.msra.mxu1 %v5051_v12 }
 0x2cd   :  { %1669 = vmatprep.subr.bf16.mxu1 %v5054_v63  ;;  %1802 = vmatpush1.bf16.msra.mxu0 %v4780_v11 }
 0x2ce   :  { %1803 = vmatprep.subr.bf16.mxu0 %v4783_v9 }
 0x2d0   :  { %1670 = vmatpush1.bf16.msra.mxu1 %v5059_v51 }
 0x2d1   :  { %1671 = vmatprep.subr.bf16.mxu1 %v5062_v55  ;;  %1804 = vmatpush1.bf16.msra.mxu0 %v4788_v3 }
 0x2d2   :  { %1805 = vmatprep.subr.bf16.mxu0 %v4791_v17 }
 0x2d4   :  { %1672 = vmatpush1.bf16.msra.mxu1 %v5067_v38 }
 0x2d5   :  { %1673 = vmatprep.subr.bf16.mxu1 %v5070_v24  ;;  %1806 = vmatpush1.bf16.msra.mxu0 %v4796_v19 }
 0x2d6   :  { %1807 = vmatprep.subr.bf16.mxu0 %v4799_v21 }
 0x2d8   :  { %1674 = vmatpush1.bf16.msra.mxu1 %v5075_v22 }
 0x2d9   :  { %1675 = vmatprep.subr.bf16.mxu1 %v5078_v40  ;;  %1808 = vmatpush1.bf16.msra.mxu0 %v4804_v23 }
 0x2da   :  { %1809 = vmatprep.subr.bf16.mxu0 %v4807_v25 }
 0x2dc   :  { %1676 = vmatpush2.bf16.msra.mxu1 %v5083_v46 }
 0x2dd   :  { %1677 = vmatprep.subr.bf16.mxu1 %v5086_v44  ;;  %1810 = vmatpush2.bf16.msra.mxu0 %v4812_v27 }
 0x2de   :  { %1811 = vmatprep.subr.bf16.mxu0 %v4815_v29 }
 0x2e0   :  { %1678 = vmatpush2.bf16.msra.mxu1 %v5091_v18  ;;  %v5107_v18 = vld [vmem:[#allocation3 + $0x250] ss:$24 sps:$4 sm:$0xff]  }
 0x2e1   :  { %1679 = vmatprep.subr.bf16.mxu1 %v5094_v8  ;;  %1812 = vmatpush2.bf16.msra.mxu0 %v4820_v31  ;;  %6464 = vst [vmem:[#allocation40_spill] sm:$0xff] %v5107_v18  ;;  %v5110_v8 = vld [vmem:[#allocation3 + $0x224] ss:$24 sps:$4 sm:$0xff]  }
 0x2e2   :  { %1813 = vmatprep.subr.bf16.mxu0 %v4823_v33  ;;  %6465 = vst [vmem:[#allocation42_spill] sm:$0xff] %v5110_v8 }
 0x2e4   :  { %1680 = vmatpush2.bf16.msra.mxu1 %v5099_v14  ;;  %v5115_v14 = vld [vmem:[#allocation3 + $0x220] ss:$24 sps:$4 sm:$0xff]  }
 0x2e5   :  { %1681 = vmatprep.subr.bf16.mxu1 %v5102_v2  ;;  %1814 = vmatpush2.bf16.msra.mxu0 %v4828_v35  ;;  %6466 = vst [vmem:[#allocation44_spill] sm:$0xff] %v5115_v14  ;;  %v5118_v2 = vld [vmem:[#allocation3 + $0x1f4] ss:$24 sps:$4 sm:$0xff]  }
 0x2e6   :  { %1815 = vmatprep.subr.bf16.mxu0 %v4831_v37  ;;  %6467 = vst [vmem:[#allocation46_spill] sm:$0xff] %v5118_v2  ;;  %v6507_v35 = vld [vmem:[#allocation48_spill] sm:$0xff] }
 0x2e8   :  { %1682 = vmatpush2.bf16.msra.mxu1 %v5107_v18  ;;  %v5123_v18 = vld [vmem:[#allocation3 + $0x1f0] ss:$24 sps:$4 sm:$0xff]  }
 0x2e9   :  { %1683 = vmatprep.subr.bf16.mxu1 %v5110_v8  ;;  %1816 = vmatpush2.bf16.msra.mxu0 %v4836_v39  ;;  %6468 = vst [vmem:[#allocation41_spill] sm:$0xff] %v5123_v18  ;;  %v5126_v8 = vld [vmem:[#allocation3 + $0x1c4] ss:$24 sps:$4 sm:$0xff]  }
 0x2ea   :  { %1817 = vmatprep.subr.bf16.mxu0 %v4839_v41  ;;  %6469 = vst [vmem:[#allocation43_spill] sm:$0xff] %v5126_v8  ;;  %v6506_v41 = vld [vmem:[#allocation11_spill] sm:$0xff] }
 0x2ec   :  { %1684 = vmatpush2.bf16.msra.mxu1 %v5115_v14  ;;  %v5131_v14 = vld [vmem:[#allocation3 + $0x1c0] ss:$24 sps:$4 sm:$0xff]  }
 0x2ed   :  { %1685 = vmatprep.subr.bf16.mxu1 %v5118_v2  ;;  %1818 = vmatpush2.bf16.msra.mxu0 %v4844_v43  ;;  %6470 = vst [vmem:[#allocation45_spill] sm:$0xff] %v5131_v14  ;;  %v5134_v2 = vld [vmem:[#allocation3 + $0x194] ss:$24 sps:$4 sm:$0xff]  }
 0x2ee   :  { %1819 = vmatprep.subr.bf16.mxu0 %v4847_v45  ;;  %6471 = vst [vmem:[#allocation47_spill] sm:$0xff] %v5134_v2 }
 0x2f0   :  { %1686 = vmatpush2.bf16.msra.mxu1 %v5123_v18  ;;  %v5139_v18 = vld [vmem:[#allocation3 + $0x190] ss:$24 sps:$4 sm:$0xff]  }
 0x2f1   :  { %1687 = vmatprep.subr.bf16.mxu1 %v5126_v8  ;;  %1820 = vmatpush2.bf16.msra.mxu0 %v4852_v47  ;;  %6472 = vst [vmem:[#allocation138_spill] sm:$0xff] %v5139_v18 }
 0x2f2   :  { %1821 = vmatprep.subr.bf16.mxu0 %v4855_v49 }
 0x2f4   :  { %1688 = vmatpush2.bf16.msra.mxu1 %v5131_v14  ;;  %v6476_v14 = vld [vmem:[#allocation111_spill] sm:$0xff] }
 0x2f5   :  { %1689 = vmatprep.subr.bf16.mxu1 %v5134_v2  ;;  %1822 = vmatpush2.bf16.msra.mxu0 %v4860_v53  ;;  %v6473_v2 = vld [vmem:[#allocation108_spill] sm:$0xff]  ;;  %v6474_v53 = vld [vmem:[#allocation109_spill] sm:$0xff] }
 0x2f6   :  { %1823 = vmatprep.subr.bf16.mxu0 %v4863_v5  ;;  %v6475_v5 = vld [vmem:[#allocation110_spill] sm:$0xff] }
 0x2f8   :  { %1690 = vmatpush2.bf16.msra.mxu1 %v5139_v18  ;;  %v6477_v18 = vld [vmem:[#allocation112_spill] sm:$0xff] }
 0x2f9   :  { %1836 = vmatprep.subr.bf16.mxu1 %v4867_v57  ;;  %1824 = vmatpush2.bf16.msra.mxu0 %v4870_v50  ;;  %v6478_v57 = vld [vmem:[#allocation113_spill] sm:$0xff]  ;;  %v6479_v50 = vld [vmem:[#allocation114_spill] sm:$0xff] }
 0x2fa   :  { %1879 = vmatprep.subr.bf16.mxu0 %v4873_v59  ;;  %v6480_v59 = vld [vmem:[#allocation115_spill] sm:$0xff] }
 0x2fb   :  { %1692 = vmatmul.mubr.bf16.vlgmr.msra.gmra.mxu1 %v5012_v4  ;;  %v6481_v4 = vld [vmem:[#allocation116_spill] sm:$0xff] }
 0x2fc   :  { %1837 = vmatpush1.bf16.msra.mxu1 %v4877_v42  ;;  %v6482_v42 = vld [vmem:[#allocation117_spill] sm:$0xff] }
 0x2fd   :  { %1838 = vmatprep.subr.bf16.mxu1 %v4880_v60  ;;  %v6483_v60 = vld [vmem:[#allocation118_spill] sm:$0xff] }
 0x300   :  { %1839 = vmatpush1.bf16.msra.mxu1 %v6473_v2  ;;  %v6484_v2 = vld [vmem:[#allocation119_spill] sm:$0xff] }
 0x301   :  { %1840 = vmatprep.subr.bf16.mxu1 %v6474_v53  ;;  %v6485_v53 = vld [vmem:[#allocation120_spill] sm:$0xff] }
 0x304   :  { %1841 = vmatpush1.bf16.msra.mxu1 %v6475_v5  ;;  %v6486_v5 = vld [vmem:[#allocation121_spill] sm:$0xff] }
 0x305   :  { %1842 = vmatprep.subr.bf16.mxu1 %v6476_v14  ;;  %v6487_v14 = vld [vmem:[#allocation122_spill] sm:$0xff] }
 0x308   :  { %1843 = vmatpush1.bf16.msra.mxu1 %v6477_v18  ;;  %v6488_v18 = vld [vmem:[#allocation123_spill] sm:$0xff] }
 0x309   :  { %1844 = vmatprep.subr.bf16.mxu1 %v6478_v57  ;;  %v6489_v57 = vld [vmem:[#allocation124_spill] sm:$0xff] }
 0x30c   :  { %1845 = vmatpush1.bf16.msra.mxu1 %v6479_v50  ;;  %v6490_v50 = vld [vmem:[#allocation125_spill] sm:$0xff] }
 0x30d   :  { %1846 = vmatprep.subr.bf16.mxu1 %v6480_v59  ;;  %v6491_v59 = vld [vmem:[#allocation126_spill] sm:$0xff] }
 0x310   :  { %1847 = vmatpush1.bf16.msra.mxu1 %v6481_v4  ;;  %v6492_v4 = vld [vmem:[#allocation127_spill] sm:$0xff] }
 0x311   :  { %1848 = vmatprep.subr.bf16.mxu1 %v6482_v42  ;;  %v6493_v42 = vld [vmem:[#allocation128_spill] sm:$0xff] }
 0x314   :  { %1849 = vmatpush1.bf16.msra.mxu1 %v6483_v60  ;;  %v6494_v60 = vld [vmem:[#allocation129_spill] sm:$0xff] }
 0x315   :  { %1850 = vmatprep.subr.bf16.mxu1 %v6484_v2  ;;  %v6495_v2 = vld [vmem:[#allocation130_spill] sm:$0xff] }
 0x318   :  { %1851 = vmatpush1.bf16.msra.mxu1 %v6485_v53  ;;  %v6496_v53 = vld [vmem:[#allocation131_spill] sm:$0xff] }
 0x319   :  { %1852 = vmatprep.subr.bf16.mxu1 %v6486_v5  ;;  %v6497_v5 = vld [vmem:[#allocation132_spill] sm:$0xff] }
 0x31c   :  { %1853 = vmatpush2.bf16.msra.mxu1 %v6487_v14  ;;  %v6498_v14 = vld [vmem:[#allocation133_spill] sm:$0xff] }
 0x31d   :  { %1854 = vmatprep.subr.bf16.mxu1 %v6488_v18  ;;  %v6499_v18 = vld [vmem:[#allocation134_spill] sm:$0xff] }
 0x320   :  { %1855 = vmatpush2.bf16.msra.mxu1 %v6489_v57  ;;  %v6500_v57 = vld [vmem:[#allocation135_spill] sm:$0xff] }
 0x321   :  { %1856 = vmatprep.subr.bf16.mxu1 %v6490_v50  ;;  %v6501_v50 = vld [vmem:[#allocation136_spill] sm:$0xff] }
 0x324   :  { %1857 = vmatpush2.bf16.msra.mxu1 %v6491_v59  ;;  %v6502_v59 = vld [vmem:[#allocation137_spill] sm:$0xff] }
 0x325   :  { %1858 = vmatprep.subr.bf16.mxu1 %v6492_v4 }
 0x328   :  { %1859 = vmatpush2.bf16.msra.mxu1 %v6493_v42 }
 0x329   :  { %1860 = vmatprep.subr.bf16.mxu1 %v6494_v60  ;;  %v6503_v60 = vld [vmem:[#allocation31_spill] sm:$0xff] }
 0x32c   :  { %1861 = vmatpush2.bf16.msra.mxu1 %v6495_v2  ;;  %v6504_v2 = vld [vmem:[#allocation9_spill] sm:$0xff] }
 0x32d   :  { %1862 = vmatprep.subr.bf16.mxu1 %v6496_v53 }
 0x330   :  { %1863 = vmatpush2.bf16.msra.mxu1 %v6497_v5  ;;  %v6505_v5 = vld [vmem:[#allocation33_spill] sm:$0xff] }
 0x331   :  { %1864 = vmatprep.subr.bf16.mxu1 %v6498_v14 }
 0x334   :  { %1865 = vmatpush2.bf16.msra.mxu1 %v6499_v18 }
 0x335   :  { %1866 = vmatprep.subr.bf16.mxu1 %v6500_v57 }
 0x338   :  { %1867 = vmatpush2.bf16.msra.mxu1 %v6501_v50 }
 0x339   :  { %2013 = vmatprep.subr.bf16.mxu1 %v6502_v59 }
 0x37b   :  { %v1607_v4 = vpop.f32.mrf.mxu1  ;;  %v1650_v39 = vpop.f32.mrf.mxu0 }
 0x37c   :  { %v1702_v47 = vadd.f32 %v1607_v4, %v6503_v60  ;;  %v1704_v60 = vadd.f32 %v1650_v39, %v6507_v35 }
 0x37d   :  { %v1609_v42 = vpop.f32.mrf.mxu1  ;;  %v1652_v59 = vpop.f32.mrf.mxu0 }
 0x37e   :  { %v1703_v8 = vadd.f32 %v1609_v42, %v6504_v2  ;;  %v3060_v45 = vmul.f32 -1.442695, %v1702_v47  ;;  %v6508_v42 = vld [vmem:[#allocation50_spill] sm:$0xff] }
 0x37f   :  { %v1611_v49 = vpop.f32.mrf.mxu1  ;;  %v1654_v37 = vpop.f32.mrf.mxu0  ;;  %v1705_v2 = vadd.f32 %v1652_v59, %v6508_v42 }
 0x380   :  { %v1706_v43 = vadd.f32 %v1611_v49, %v6505_v5  ;;  %v3061_v14 = vmul.f32 -1.442695, %v1703_v8  ;;  %3367 = vpow2.f32 %v3060_v45  ;;  %v3062_v49 = vmul.f32 -1.442695, %v1704_v60  ;;  %v6509_v5 = vld [vmem:[#allocation52_spill] sm:$0xff] }
 0x381   :  { %v1613_v53 = vpop.f32.mrf.mxu1  ;;  %v1656_v47 = vpop.f32.mrf.mxu0  ;;  %v1708_v8 = vadd.f32 %v1654_v37, %v6509_v5 }
 0x382   :  { %v1707_v18 = vadd.f32 %v1613_v53, %v6506_v41  ;;  %v3064_v57 = vmul.f32 -1.442695, %v1706_v43  ;;  %3369 = vpow2.f32 %v3061_v14  ;;  %v3063_v43 = vmul.f32 -1.442695, %v1705_v2  ;;  %v6510_v53 = vld [vmem:[#allocation54_spill] sm:$0xff] }
 0x383   :  { %v1709_v14 = vadd.f32 %v1656_v47, %v6510_v53 }
 0x384   :  { %v3065_v50 = vmul.f32 -1.442695, %v1707_v18  ;;  %3371 = vpow2.f32 %v3064_v57 }
 0x385   :  { %v3067_v35 = vmul.f32 -1.442695, %v1709_v14 }
 0x386   :  { %3373 = vpow2.f32 %v3065_v50  ;;  %v3066_v50 = vmul.f32 -1.442695, %v1708_v8 }
 0x387   :  { %3375 = vpow2.f32 %v3062_v49 }
 0x38d   :  { %v3368_v4 = vpop.eup %3367 }
 0x38e   :  { %v1734_v41 = vadd.f32 1.0, %v3368_v4 }
 0x38f   :  { %v3370_v33 = vpop.eup %3369 }
 0x390   :  { %v1735_v18 = vadd.f32 1.0, %v3370_v33  ;;  %3377 = vrcp.f32 %v1734_v41 }
 0x391   :  { %v3372_v45 = vpop.eup %3371  ;;  %3379 = vpow2.f32 %v3063_v43 }
 0x392   :  { %v1738_v31 = vadd.f32 1.0, %v3372_v45  ;;  %3381 = vrcp.f32 %v1735_v18  ;;  %v6511_v45 = vld [vmem:[#allocation49_spill] sm:$0xff] }
 0x393   :  { %v3374_v57 = vpop.eup %3373  ;;  %3383 = vpow2.f32 %v3066_v50 }
 0x394   :  { %v1739_v39 = vadd.f32 1.0, %v3374_v57  ;;  %3385 = vrcp.f32 %v1738_v31  ;;  %v3376_v59 = vpop.eup %3375 }
 0x395   :  { %3387 = vpow2.f32 %v3067_v35  ;;  %v1736_v5 = vadd.f32 1.0, %v3376_v59  ;;  %v6512_v35 = vld [vmem:[#allocation51_spill] sm:$0xff] }
 0x396   :  { %3389 = vrcp.f32 %v1739_v39 }
 0x39d   :  { %v3378_v4 = vpop.eup %3377 }
 0x39e   :  { %v3380_v33 = vpop.eup %3379 }
 0x39f   :  { %v3382_v49 = vpop.eup %3381  ;;  %v1737_v18 = vadd.f32 1.0, %v3380_v33 }
 0x3a0   :  { %v3384_v41 = vpop.eup %3383 }
 0x3a1   :  { %v3386_v14 = vpop.eup %3385  ;;  %v1740_v59 = vadd.f32 1.0, %v3384_v41 }
 0x3a2   :  { %v3388_v50 = vpop.eup %3387 }
 0x3bb   :  { %v1693_v37 = vpop.f32.mrf.mxu1 }
 0x3bc   :  { %v1758_v60 = vadd.f32 %v1693_v37, %v4698_v32 }
 0x3bd   :  { %v1695_v42 = vpop.f32.mrf.mxu1 }
 0x3be   :  { %v1762_v2 = vmul.f32 %v3378_v4, %v1758_v60  ;;  %v1759_v47 = vadd.f32 %v1695_v42, %v4702_v30  ;;  %v3390_v4 = vpop.eup %3389  ;;  %v6513_v42 = vld [vmem:[#allocation53_spill] sm:$0xff] }
 0x3bf   :  { %v1697_v8 = vpop.f32.mrf.mxu1 }
 0x3c0   :  { %v1766_v43 = vadd.f32 %v1762_v2, %v6511_v45  ;;  %v1763_v53 = vmul.f32 %v3382_v49, %v1759_v47  ;;  %v1760_v31 = vadd.f32 %v1697_v8, %v4698_v32  ;;  %v1741_v47 = vadd.f32 1.0, %v3388_v50  ;;  %v6514_v49 = vld [vmem:[#allocation55_spill] sm:$0xff] }
 0x3c1   :  { %v1699_v57 = vpop.f32.mrf.mxu1 }
 0x3c2   :  { %3391 = vtanh.f32 %v1766_v43  ;;  %v1767_v39 = vadd.f32 %v1763_v53, %v6512_v35  ;;  %v1764_v37 = vmul.f32 %v3386_v14, %v1760_v31  ;;  %v1761_v60 = vadd.f32 %v1699_v57, %v4702_v30 }
 0x3c3   :  { %3393 = vrcp.f32 %v1736_v5 }
 0x3c4   :  { %3395 = vtanh.f32 %v1767_v39  ;;  %v1768_v29 = vadd.f32 %v1764_v37, %v6513_v42  ;;  %v1765_v2 = vmul.f32 %v3390_v4, %v1761_v60 }
 0x3c5   :  { %3397 = vrcp.f32 %v1737_v18 }
 0x3c6   :  { %3399 = vtanh.f32 %v1768_v29  ;;  %v1769_v33 = vadd.f32 %v1765_v2, %v6514_v49  ;;  %v6533_v49 = vld [vmem:[#allocation43_spill] sm:$0xff] }
 0x3c7   :  { %3401 = vrcp.f32 %v1740_v59 }
 0x3c8   :  { %3403 = vtanh.f32 %v1769_v33  ;;  %v6534_v33 = vld [vmem:[#allocation101_spill] sm:$0xff] }
 0x3c9   :  { %3405 = vrcp.f32 %v1741_v47  ;;  %v6532_v47 = vld [vmem:[#allocation41_spill] sm:$0xff] }
 0x3cf   :  { %v3392_v8 = vpop.eup %3391 }
 0x3d0   :  { %v3394_v45 = vpop.eup %3393  ;;  %v1774_v43 = vsub.f32 %v4992_v28, %v3392_v8 }
 0x3d1   :  { %v3396_v53 = vpop.eup %3395 }
 0x3d2   :  { %v3398_v31 = vpop.eup %3397  ;;  %v1775_v5 = vsub.f32 %v4995_v58, %v3396_v53  ;;  %v1778_v41 = vmul.f32 %v3394_v45, %v1774_v43  ;;  %v6536_v45 = vld [vmem:[#allocation45_spill] sm:$0xff]  ;;  %v6537_v43 = vld [vmem:[#allocation47_spill] sm:$0xff] }
 0x3d3   :  { %v3400_v14 = vpop.eup %3399 }
 0x3d4   :  { %v3402_v57 = vpop.eup %3401  ;;  %v1779_v35 = vmul.f32 %v3398_v31, %v1775_v5  ;;  %v1776_v18 = vsub.f32 %v4997_v34, %v3400_v14  ;;  %v5197_v29 = vadd.f32 %v3392_v8, %v1778_v41  ;;  %v6535_v8 = vld [vmem:[#allocation102_spill] sm:$0xff]  ;;  %v6539_v31 = vld [vmem:[#allocation103_spill] sm:$0xff]  ;;  %v6541_v41 = vld [vmem:[#allocation20_spill] sm:$0xff] }
 0x3d5   :  { %v3404_v50 = vpop.eup %3403  ;;  %v6540_v5 = vld [vmem:[#allocation138_spill] sm:$0xff] }
 0x3d6   :  { %v1777_v39 = vsub.f32 %v4999_v54, %v3404_v50  ;;  %v5200_v37 = vadd.f32 %v3396_v53, %v1779_v35  ;;  %v1780_v60 = vmul.f32 %v3402_v57, %v1776_v18  ;;  %v3406_v4 = vpop.eup %3405  ;;  %v6538_v53 = vld [vmem:[#allocation19_spill] sm:$0xff]  ;;  %v6543_v57 = vld [vmem:[#allocation105_spill] sm:$0xff]  ;;  %v6544_v35 = vld [vmem:[#allocation106_spill] sm:$0xff] }
 0x3d7   :  { %v6545_v18 = vld [vmem:[#allocation107_spill] sm:$0xff] }
 0x3d8   :  { %v1781_v28 = vmul.f32 %v3406_v4, %v1777_v39  ;;  %v5202_v59 = vadd.f32 %v3400_v14, %v1780_v60  ;;  %v6542_v14 = vld [vmem:[#allocation104_spill] sm:$0xff]  ;;  %v6547_v39 = vld [vmem:[#allocation109_spill] sm:$0xff]  ;;  %v6548_v60 = vld [vmem:[#allocation110_spill] sm:$0xff] }
 0x3d9   :  { %v6549_v4 = vld [vmem:[#allocation111_spill] sm:$0xff] }
 0x3da   :  { %v5204_v42 = vadd.f32 %v3404_v50, %v1781_v28  ;;  %v1787_v58 = vadd.f32 %v5202_v59, %v5200_v37  ;;  %v5217_v54 = vpack.c.bf16 %v5202_v59, %v5197_v29  ;;  %v6546_v50 = vld [vmem:[#allocation108_spill] sm:$0xff] }
 0x3db   :  { %v6550_v28 = vld [vmem:[#allocation112_spill] sm:$0xff] }
 0x3dc   :  { %v1792_v34 = vpack.c.bf16 %v5204_v42, %v5200_v37  ;;  %v1786_v2 = vsub.f32 %v5197_v29, %v5204_v42  ;;  %3069 = vst [vmem:[%s6058_s6 + $0x28] sm:$0xff] %v1787_v58  ;;  %v6551_v58 = vld [vmem:[#allocation113_spill] sm:$0xff] }
 0x3de   :  { %1825 = vmatprep.mubr.bf16.mxu0 %v1792_v34  ;;  %1868 = vmatprep.mubr.bf16.mxu1 %v1792_v34  ;;  %3068 = vst [vmem:[%s6058_s6 + $0x20] sm:$0xff] %v1786_v2  ;;  %v6553_v2 = vld [vmem:[#allocation115_spill] sm:$0xff] }
 0x3df   :  { %1826 = vmatmul.mubr.bf16.vlgmr.msra.gmra.mxu0 %v5217_v54  ;;  %1869 = vmatmul.mubr.bf16.vlgmr.msra.gmra.mxu1 %v5217_v54 }
 0x3e0   :  { %1880 = vmatpush1.bf16.msra.mxu0 %v5019_v20  ;;  %1911 = vmatprep.mubr.bf16.mxu0 %v1792_v34  ;;  %v6552_v34 = vld [vmem:[#allocation114_spill] sm:$0xff] }
 0x3e1   :  { %1881 = vmatprep.subr.bf16.mxu0 %v5022_v61  ;;  %2014 = vmatpush1.bf16.msra.mxu1 %v4748_v0  ;;  %v6515_v0 = vld [vmem:[#allocation17_spill] sm:$0xff] }
 0x3e2   :  { %2015 = vmatprep.subr.bf16.mxu1 %v4751_v7  ;;  %v6516_v7 = vld [vmem:[#allocation25_spill] sm:$0xff] }
 0x3e4   :  { %1882 = vmatpush1.bf16.msra.mxu0 %v5027_v52 }
 0x3e5   :  { %1883 = vmatprep.subr.bf16.mxu0 %v5030_v16  ;;  %2016 = vmatpush1.bf16.msra.mxu1 %v4756_v36  ;;  %v6517_v36 = vld [vmem:[#allocation27_spill] sm:$0xff] }
 0x3e6   :  { %2017 = vmatprep.subr.bf16.mxu1 %v4759_v15  ;;  %v6518_v15 = vld [vmem:[#allocation13_spill] sm:$0xff] }
 0x3e8   :  { %1884 = vmatpush1.bf16.msra.mxu0 %v5035_v10 }
 0x3e9   :  { %1885 = vmatprep.subr.bf16.mxu0 %v5038_v6  ;;  %2018 = vmatpush1.bf16.msra.mxu1 %v4764_v62  ;;  %v6519_v62 = vld [vmem:[#allocation18_spill] sm:$0xff] }
 0x3ea   :  { %2019 = vmatprep.subr.bf16.mxu1 %v4767_v26  ;;  %v6520_v26 = vld [vmem:[#allocation29_spill] sm:$0xff] }
 0x3ec   :  { %1886 = vmatpush1.bf16.msra.mxu0 %v5043_v56 }
 0x3ed   :  { %1887 = vmatprep.subr.bf16.mxu0 %v5046_v48  ;;  %2020 = vmatpush1.bf16.msra.mxu1 %v4772_v1  ;;  %v6521_v1 = vld [vmem:[#allocation7_spill] sm:$0xff] }
 0x3ee   :  { %2021 = vmatprep.subr.bf16.mxu1 %v4775_v13  ;;  %v6522_v13 = vld [vmem:[#allocation14_spill] sm:$0xff] }
 0x3f0   :  { %1888 = vmatpush1.bf16.msra.mxu0 %v5051_v12 }
 0x3f1   :  { %1889 = vmatprep.subr.bf16.mxu0 %v5054_v63  ;;  %2022 = vmatpush1.bf16.msra.mxu1 %v4780_v11  ;;  %v6523_v11 = vld [vmem:[#allocation96_spill] sm:$0xff] }
 0x3f2   :  { %2023 = vmatprep.subr.bf16.mxu1 %v4783_v9  ;;  %v6524_v9 = vld [vmem:[#allocation40_spill] sm:$0xff] }
 0x3f4   :  { %1890 = vmatpush1.bf16.msra.mxu0 %v5059_v51 }
 0x3f5   :  { %1891 = vmatprep.subr.bf16.mxu0 %v5062_v55  ;;  %2024 = vmatpush1.bf16.msra.mxu1 %v4788_v3  ;;  %v6525_v3 = vld [vmem:[#allocation42_spill] sm:$0xff] }
 0x3f6   :  { %2025 = vmatprep.subr.bf16.mxu1 %v4791_v17  ;;  %v6526_v17 = vld [vmem:[#allocation97_spill] sm:$0xff] }
 0x3f8   :  { %1892 = vmatpush1.bf16.msra.mxu0 %v5067_v38 }
 0x3f9   :  { %1893 = vmatprep.subr.bf16.mxu0 %v5070_v24  ;;  %2026 = vmatpush1.bf16.msra.mxu1 %v4796_v19  ;;  %v6527_v19 = vld [vmem:[#allocation98_spill] sm:$0xff] }
 0x3fa   :  { %2027 = vmatprep.subr.bf16.mxu1 %v4799_v21  ;;  %v6528_v21 = vld [vmem:[#allocation44_spill] sm:$0xff] }
 0x3fc   :  { %1894 = vmatpush1.bf16.msra.mxu0 %v5075_v22 }
 0x3fd   :  { %1895 = vmatprep.subr.bf16.mxu0 %v5078_v40  ;;  %2028 = vmatpush1.bf16.msra.mxu1 %v4804_v23  ;;  %v6529_v23 = vld [vmem:[#allocation46_spill] sm:$0xff] }
 0x3fe   :  { %2029 = vmatprep.subr.bf16.mxu1 %v4807_v25  ;;  %v6530_v25 = vld [vmem:[#allocation99_spill] sm:$0xff] }
 0x400   :  { %1896 = vmatpush2.bf16.msra.mxu0 %v5083_v46 }
 0x401   :  { %1897 = vmatprep.subr.bf16.mxu0 %v5086_v44  ;;  %2030 = vmatpush2.bf16.msra.mxu1 %v4812_v27  ;;  %v6531_v27 = vld [vmem:[#allocation100_spill] sm:$0xff] }
 0x402   :  { %2031 = vmatprep.subr.bf16.mxu1 %v6515_v0  ;;  %v6555_v0 = vld [vmem:[#allocation117_spill] sm:$0xff] }
 0x404   :  { %1898 = vmatpush2.bf16.msra.mxu0 %v6516_v7 }
 0x405   :  { %1899 = vmatprep.subr.bf16.mxu0 %v6517_v36  ;;  %2032 = vmatpush2.bf16.msra.mxu1 %v6518_v15  ;;  %v6556_v15 = vld [vmem:[#allocation118_spill] sm:$0xff] }
 0x406   :  { %2033 = vmatprep.subr.bf16.mxu1 %v6519_v62  ;;  %v6557_v62 = vld [vmem:[#allocation119_spill] sm:$0xff] }
 0x408   :  { %1900 = vmatpush2.bf16.msra.mxu0 %v6520_v26 }
 0x409   :  { %1901 = vmatprep.subr.bf16.mxu0 %v6521_v1  ;;  %2034 = vmatpush2.bf16.msra.mxu1 %v6522_v13  ;;  %v6558_v13 = vld [vmem:[#allocation120_spill] sm:$0xff] }
 0x40a   :  { %2035 = vmatprep.subr.bf16.mxu1 %v6523_v11  ;;  %v6559_v11 = vld [vmem:[#allocation121_spill] sm:$0xff] }
 0x40c   :  { %1902 = vmatpush2.bf16.msra.mxu0 %v6524_v9 }
 0x40d   :  { %1903 = vmatprep.subr.bf16.mxu0 %v6525_v3  ;;  %2036 = vmatpush2.bf16.msra.mxu1 %v6526_v17  ;;  %v6560_v17 = vld [vmem:[#allocation122_spill] sm:$0xff] }
 0x40e   :  { %2037 = vmatprep.subr.bf16.mxu1 %v6527_v19  ;;  %v6561_v19 = vld [vmem:[#allocation123_spill] sm:$0xff] }
 0x410   :  { %1904 = vmatpush2.bf16.msra.mxu0 %v6528_v21 }
 0x411   :  { %1905 = vmatprep.subr.bf16.mxu0 %v6529_v23  ;;  %2038 = vmatpush2.bf16.msra.mxu1 %v6530_v25  ;;  %v6562_v25 = vld [vmem:[#allocation124_spill] sm:$0xff] }
 0x412   :  { %2039 = vmatprep.subr.bf16.mxu1 %v6531_v27  ;;  %v6563_v27 = vld [vmem:[#allocation125_spill] sm:$0xff] }
 0x414   :  { %1906 = vmatpush2.bf16.msra.mxu0 %v6532_v47 }
 0x415   :  { %1907 = vmatprep.subr.bf16.mxu0 %v6533_v49  ;;  %2040 = vmatpush2.bf16.msra.mxu1 %v6534_v33  ;;  %v6564_v33 = vld [vmem:[#allocation126_spill] sm:$0xff] }
 0x416   :  { %2041 = vmatprep.subr.bf16.mxu1 %v6535_v8  ;;  %v6565_v8 = vld [vmem:[#allocation127_spill] sm:$0xff] }
 0x418   :  { %1908 = vmatpush2.bf16.msra.mxu0 %v6536_v45 }
 0x419   :  { %1909 = vmatprep.subr.bf16.mxu0 %v6537_v43  ;;  %2042 = vmatpush2.bf16.msra.mxu1 %v6538_v53  ;;  %v6566_v53 = vld [vmem:[#allocation128_spill] sm:$0xff] }
 0x41a   :  { %2043 = vmatprep.subr.bf16.mxu1 %v6539_v31  ;;  %v6567_v31 = vld [vmem:[#allocation129_spill] sm:$0xff] }
 0x41c   :  { %1910 = vmatpush2.bf16.msra.mxu0 %v6540_v5 }
 0x41d   :  { %2056 = vmatprep.subr.bf16.mxu0 %v6541_v41  ;;  %2044 = vmatpush2.bf16.msra.mxu1 %v6542_v14  ;;  %v6568_v41 = vld [vmem:[#allocation130_spill] sm:$0xff]  ;;  %v6569_v14 = vld [vmem:[#allocation131_spill] sm:$0xff] }
 0x41e   :  { %2099 = vmatprep.subr.bf16.mxu1 %v6543_v57  ;;  %v6570_v57 = vld [vmem:[#allocation132_spill] sm:$0xff] }
 0x41f   :  { %1912 = vmatmul.mubr.bf16.vlgmr.msra.gmra.mxu0 %v5217_v54  ;;  %v6554_v54 = vld [vmem:[#allocation116_spill] sm:$0xff] }
 0x420   :  { %2057 = vmatpush1.bf16.msra.mxu0 %v6544_v35  ;;  %v6571_v35 = vld [vmem:[#allocation133_spill] sm:$0xff] }
 0x421   :  { %2058 = vmatprep.subr.bf16.mxu0 %v6545_v18  ;;  %v6572_v18 = vld [vmem:[#allocation134_spill] sm:$0xff] }
 0x424   :  { %2059 = vmatpush1.bf16.msra.mxu0 %v6546_v50  ;;  %v6573_v50 = vld [vmem:[#allocation135_spill] sm:$0xff] }
 0x425   :  { %2060 = vmatprep.subr.bf16.mxu0 %v6547_v39  ;;  %v6574_v39 = vld [vmem:[#allocation136_spill] sm:$0xff] }
 0x428   :  { %2061 = vmatpush1.bf16.msra.mxu0 %v6548_v60  ;;  %v6575_v60 = vld [vmem:[#allocation137_spill] sm:$0xff] }
 0x429   :  { %2062 = vmatprep.subr.bf16.mxu0 %v6549_v4 }
 0x42c   :  { %2063 = vmatpush1.bf16.msra.mxu0 %v6550_v28 }
 0x42d   :  { %2064 = vmatprep.subr.bf16.mxu0 %v6551_v58 }
 0x430   :  { %2065 = vmatpush1.bf16.msra.mxu0 %v6552_v34  ;;  %v6576_v34 = vld [vmem:[#allocation35_spill] sm:$0xff] }
 0x431   :  { %2066 = vmatprep.subr.bf16.mxu0 %v6553_v2 }
 0x434   :  { %2067 = vmatpush1.bf16.msra.mxu0 %v6554_v54  ;;  %v6577_v54 = vld [vmem:[#allocation15_spill] sm:$0xff] }
 0x435   :  { %2068 = vmatprep.subr.bf16.mxu0 %v6555_v0 }
 0x438   :  { %2069 = vmatpush1.bf16.msra.mxu0 %v6556_v15 }
 0x439   :  { %2070 = vmatprep.subr.bf16.mxu0 %v6557_v62 }
 0x43c   :  { %2071 = vmatpush1.bf16.msra.mxu0 %v6558_v13  ;;  %v6578_v13 = vld [vmem:[#allocation38_spill] sm:$0xff] }
 0x43d   :  { %2072 = vmatprep.subr.bf16.mxu0 %v6559_v11 }
 0x440   :  { %2073 = vmatpush2.bf16.msra.mxu0 %v6560_v17 }
 0x441   :  { %2074 = vmatprep.subr.bf16.mxu0 %v6561_v19  ;;  %v6579_v19 = vld [vmem:[#allocation16_spill] sm:$0xff] }
 0x444   :  { %2075 = vmatpush2.bf16.msra.mxu0 %v6562_v25 }
 0x445   :  { %2076 = vmatprep.subr.bf16.mxu0 %v6563_v27 }
 0x448   :  { %2077 = vmatpush2.bf16.msra.mxu0 %v6564_v33 }
 0x449   :  { %2078 = vmatprep.subr.bf16.mxu0 %v6565_v8 }
 0x44c   :  { %2079 = vmatpush2.bf16.msra.mxu0 %v6566_v53 }
 0x44d   :  { %2080 = vmatprep.subr.bf16.mxu0 %v6567_v31 }
 0x450   :  { %2081 = vmatpush2.bf16.msra.mxu0 %v6568_v41  ;;  %v6580_v41 = vld [vmem:[#allocation56_spill] sm:$0xff] }
 0x451   :  { %2082 = vmatprep.subr.bf16.mxu0 %v6569_v14 }
 0x454   :  { %2083 = vmatpush2.bf16.msra.mxu0 %v6570_v57 }
 0x455   :  { %2084 = vmatprep.subr.bf16.mxu0 %v6571_v35  ;;  %v6581_v35 = vld [vmem:[#allocation58_spill] sm:$0xff] }
 0x458   :  { %2085 = vmatpush2.bf16.msra.mxu0 %v6572_v18 }
 0x459   :  { %2086 = vmatprep.subr.bf16.mxu0 %v6573_v50 }
 0x45c   :  { %2087 = vmatpush2.bf16.msra.mxu0 %v6574_v39 }
 0x45d   :  { %2233 = vmatprep.subr.bf16.mxu0 %v6575_v60 }
 0x49f   :  { %v1827_v4 = vpop.f32.mrf.mxu0  ;;  %v1870_v33 = vpop.f32.mrf.mxu1 }
 0x4a0   :  { %v1922_v2 = vadd.f32 %v1827_v4, %v6576_v34  ;;  %v1924_v14 = vadd.f32 %v1870_v33, %v6580_v41  ;;  %v6582_v4 = vld [vmem:[#allocation60_spill] sm:$0xff] }
 0x4a1   :  { %v1829_v28 = vpop.f32.mrf.mxu0  ;;  %v1872_v53 = vpop.f32.mrf.mxu1 }
 0x4a2   :  { %v1923_v0 = vadd.f32 %v1829_v28, %v6577_v54  ;;  %v3070_v62 = vmul.f32 -1.442695, %v1922_v2  ;;  %v1925_v18 = vadd.f32 %v1872_v53, %v6581_v35  ;;  %v3072_v60 = vmul.f32 -1.442695, %v1924_v14  ;;  %v6583_v54 = vld [vmem:[#allocation62_spill] sm:$0xff] }
 0x4a3   :  { %v1831_v58 = vpop.f32.mrf.mxu0  ;;  %v1874_v31 = vpop.f32.mrf.mxu1 }
 0x4a4   :  { %v1926_v11 = vadd.f32 %v1831_v58, %v6578_v13  ;;  %v3071_v17 = vmul.f32 -1.442695, %v1923_v0  ;;  %3407 = vpow2.f32 %v3070_v62  ;;  %v1928_v28 = vadd.f32 %v1874_v31, %v6582_v4 }
 0x4a5   :  { %v1833_v15 = vpop.f32.mrf.mxu0  ;;  %v1876_v50 = vpop.f32.mrf.mxu1  ;;  %v3073_v2 = vmul.f32 -1.442695, %v1925_v18 }
 0x4a6   :  { %v1927_v25 = vadd.f32 %v1833_v15, %v6579_v19  ;;  %v3074_v27 = vmul.f32 -1.442695, %v1926_v11  ;;  %3409 = vpow2.f32 %v3071_v17  ;;  %v1929_v0 = vadd.f32 %v1876_v50, %v6583_v54 }
 0x4a7   :  { %v3076_v13 = vmul.f32 -1.442695, %v1928_v28 }
 0x4a8   :  { %v3075_v8 = vmul.f32 -1.442695, %v1927_v25  ;;  %3411 = vpow2.f32 %v3074_v27  ;;  %v3077_v17 = vmul.f32 -1.442695, %v1929_v0  ;;  %v6585_v0 = vld [vmem:[#allocation59_spill] sm:$0xff] }
 0x4aa   :  { %3413 = vpow2.f32 %v3075_v8 }
 0x4ab   :  { %3415 = vpow2.f32 %v3072_v60 }
 0x4b1   :  { %v3408_v57 = vpop.eup %3407 }
 0x4b2   :  { %v1954_v58 = vadd.f32 1.0, %v3408_v57 }
 0x4b3   :  { %v3410_v39 = vpop.eup %3409 }
 0x4b4   :  { %v1955_v15 = vadd.f32 1.0, %v3410_v39  ;;  %3417 = vrcp.f32 %v1954_v58  ;;  %v6584_v39 = vld [vmem:[#allocation57_spill] sm:$0xff] }
 0x4b5   :  { %v3412_v34 = vpop.eup %3411  ;;  %3419 = vpow2.f32 %v3073_v2 }
 0x4b6   :  { %v1958_v11 = vadd.f32 1.0, %v3412_v34  ;;  %3421 = vrcp.f32 %v1955_v15 }
 0x4b7   :  { %v3414_v62 = vpop.eup %3413  ;;  %3423 = vpow2.f32 %v3076_v13 }
 0x4b8   :  { %v1959_v19 = vadd.f32 1.0, %v3414_v62  ;;  %3425 = vrcp.f32 %v1958_v11  ;;  %v3416_v27 = vpop.eup %3415 }
 0x4b9   :  { %3427 = vpow2.f32 %v3077_v17  ;;  %v1956_v35 = vadd.f32 1.0, %v3416_v27 }
 0x4ba   :  { %3429 = vrcp.f32 %v1959_v19  ;;  %v6586_v19 = vld [vmem:[#allocation61_spill] sm:$0xff] }
 0x4c1   :  { %v3418_v8 = vpop.eup %3417 }
 0x4c2   :  { %v3420_v31 = vpop.eup %3419 }
 0x4c3   :  { %v3422_v57 = vpop.eup %3421  ;;  %v1957_v34 = vadd.f32 1.0, %v3420_v31 }
 0x4c4   :  { %v3424_v50 = vpop.eup %3423 }
 0x4c5   :  { %v3426_v58 = vpop.eup %3425  ;;  %v1960_v17 = vadd.f32 1.0, %v3424_v50 }
 0x4c6   :  { %v3428_v54 = vpop.eup %3427 }
 0x4c7   :  { %v3430_v11 = vpop.eup %3429 }
 0x4df   :  { %v1913_v25 = vpop.f32.mrf.mxu0 }
 0x4e0   :  { %v1978_v33 = vadd.f32 %v1913_v25, %v4698_v32 }
 0x4e1   :  { %v1915_v53 = vpop.f32.mrf.mxu0 }
 0x4e2   :  { %v1982_v41 = vmul.f32 %v3418_v8, %v1978_v33  ;;  %v1979_v14 = vadd.f32 %v1915_v53, %v4702_v30  ;;  %v1961_v33 = vadd.f32 1.0, %v3428_v54  ;;  %v6587_v8 = vld [vmem:[#allocation63_spill] sm:$0xff] }
 0x4e3   :  { %v1917_v18 = vpop.f32.mrf.mxu0 }
 0x4e4   :  { %v1986_v60 = vadd.f32 %v1982_v41, %v6584_v39  ;;  %v1983_v4 = vmul.f32 %v3422_v57, %v1979_v14  ;;  %v1980_v28 = vadd.f32 %v1917_v18, %v4698_v32 }
 0x4e5   :  { %v1919_v2 = vpop.f32.mrf.mxu0 }
 0x4e6   :  { %3431 = vtanh.f32 %v1986_v60  ;;  %v1987_v15 = vadd.f32 %v1983_v4, %v6585_v0  ;;  %v1984_v62 = vmul.f32 %v3426_v58, %v1980_v28  ;;  %v1981_v13 = vadd.f32 %v1919_v2, %v4702_v30 }
 0x4e7   :  { %3433 = vrcp.f32 %v1956_v35 }
 0x4e8   :  { %3435 = vtanh.f32 %v1987_v15  ;;  %v1988_v25 = vadd.f32 %v1984_v62, %v6586_v19  ;;  %v1985_v27 = vmul.f32 %v3430_v11, %v1981_v13  ;;  %v5372_v19 = vld [vmem:[#allocation3 + $0x124] ss:$24 sps:$4 sm:$0xff]  }
 0x4e9   :  { %3437 = vrcp.f32 %v1957_v34 }
 0x4ea   :  { %3439 = vtanh.f32 %v1988_v25  ;;  %v1989_v53 = vadd.f32 %v1985_v27, %v6587_v8  ;;  %v5377_v25 = vld [vmem:[#allocation3 + $0x120] ss:$24 sps:$4 sm:$0xff]   ;;  %v5388_v27 = vld [vmem:[#allocation3 + $0xc4] ss:$24 sps:$4 sm:$0xff]  }
 0x4eb   :  { %3441 = vrcp.f32 %v1960_v17  ;;  %v5369_v17 = vld [vmem:[#allocation3 + $0x150] ss:$24 sps:$4 sm:$0xff]   ;;  %v5507_v8 = vld [vmem:[#allocation3 + $0xfc] ss:$24 sps:$4 sm:$0xff]  }
 0x4ec   :  { %3443 = vtanh.f32 %v1989_v53  ;;  %6607 = vst [vmem:[#allocation14_spill] sm:$0xff] %v5507_v8  ;;  %v5510_v53 = vld [vmem:[#allocation3 + $0xf8] ss:$24 sps:$4 sm:$0xff]  }
 0x4ed   :  { %3445 = vrcp.f32 %v1961_v33  ;;  %v5501_v33 = vld [vmem:[#allocation3 + $0x12c] ss:$24 sps:$4 sm:$0xff]   ;;  %6608 = vst [vmem:[#allocation96_spill] sm:$0xff] %v5510_v53 }
 0x4ee   :  { %6605 = vst [vmem:[#allocation29_spill] sm:$0xff] %v5501_v33 }
 0x4f3   :  { %v3432_v31 = vpop.eup %3431 }
 0x4f4   :  { %v3434_v41 = vpop.eup %3433  ;;  %v1994_v14 = vsub.f32 %v5197_v29, %v3432_v31 }
 0x4f5   :  { %v3436_v57 = vpop.eup %3435 }
 0x4f6   :  { %v3438_v18 = vpop.eup %3437  ;;  %v1995_v35 = vsub.f32 %v5200_v37, %v3436_v57  ;;  %v1998_v50 = vmul.f32 %v3434_v41, %v1994_v14  ;;  %v5516_v41 = vld [vmem:[#allocation3 + $0xc8] ss:$24 sps:$4 sm:$0xff]   ;;  %v5519_v14 = vld [vmem:[#allocation3 + $0x9c] ss:$24 sps:$4 sm:$0xff]  }
 0x4f7   :  { %v3440_v39 = vpop.eup %3439  ;;  %6610 = vst [vmem:[#allocation42_spill] sm:$0xff] %v5516_v41  ;;  %6611 = vst [vmem:[#allocation97_spill] sm:$0xff] %v5519_v14 }
 0x4f8   :  { %v3442_v60 = vpop.eup %3441  ;;  %v1999_v4 = vmul.f32 %v3438_v18, %v1995_v35  ;;  %v1996_v28 = vsub.f32 %v5202_v59, %v3440_v39  ;;  %v5340_v58 = vadd.f32 %v3432_v31, %v1998_v50  ;;  %v5513_v31 = vld [vmem:[#allocation3 + $0xcc] ss:$24 sps:$4 sm:$0xff]   ;;  %v5528_v35 = vld [vmem:[#allocation3 + $0x68] ss:$24 sps:$4 sm:$0xff]   ;;  %v5531_v50 = vld [vmem:[#allocation3 + $0x3c] ss:$24 sps:$4 sm:$0xff]  }
 0x4f9   :  { %v3444_v34 = vpop.eup %3443  ;;  %6609 = vst [vmem:[#allocation40_spill] sm:$0xff] %v5513_v31  ;;  %v5525_v18 = vld [vmem:[#allocation3 + $0x6c] ss:$24 sps:$4 sm:$0xff]   ;;  %6614 = vst [vmem:[#allocation46_spill] sm:$0xff] %v5528_v35 }
 0x4fa   :  { %v1997_v2 = vsub.f32 %v5204_v42, %v3444_v34  ;;  %v5343_v54 = vadd.f32 %v3436_v57, %v1999_v4  ;;  %v2000_v0 = vmul.f32 %v3442_v60, %v1996_v28  ;;  %v3446_v15 = vpop.eup %3445  ;;  %v5522_v57 = vld [vmem:[#allocation3 + $0x98] ss:$24 sps:$4 sm:$0xff]   ;;  %6613 = vst [vmem:[#allocation44_spill] sm:$0xff] %v5525_v18  ;;  %6615 = vst [vmem:[#allocation99_spill] sm:$0xff] %v5531_v50  ;;  %v5537_v60 = vld [vmem:[#allocation3 + $0xc] ss:$24 sps:$4 sm:$0xff]  }
 0x4fb   :  { %6612 = vst [vmem:[#allocation98_spill] sm:$0xff] %v5522_v57  ;;  %6617 = vst [vmem:[#allocation41_spill] sm:$0xff] %v5537_v60  ;;  %v5540_v4 = vld [vmem:[#allocation3 + $0x8] ss:$24 sps:$4 sm:$0xff]   ;;  %v5543_v28 = vld [vmem:[#allocation3 + $0x2dc] ss:$24 sps:$4 sm:$0xff]  }
 0x4fc   :  { %v2001_v29 = vmul.f32 %v3446_v15, %v1997_v2  ;;  %v5345_v62 = vadd.f32 %v3440_v39, %v2000_v0  ;;  %v5534_v39 = vld [vmem:[#allocation3 + $0x38] ss:$24 sps:$4 sm:$0xff]   ;;  %6618 = vst [vmem:[#allocation43_spill] sm:$0xff] %v5540_v4  ;;  %6619 = vst [vmem:[#allocation101_spill] sm:$0xff] %v5543_v28  ;;  %v5549_v2 = vld [vmem:[#allocation3 + $0x2ac] ss:$24 sps:$4 sm:$0xff]  }
 0x4fd   :  { %6616 = vst [vmem:[#allocation100_spill] sm:$0xff] %v5534_v39  ;;  %6621 = vst [vmem:[#allocation45_spill] sm:$0xff] %v5549_v2  ;;  %v5552_v0 = vld [vmem:[#allocation3 + $0x2a8] ss:$24 sps:$4 sm:$0xff]   ;;  %v5555_v15 = vld [vmem:[#allocation3 + $0x27c] ss:$24 sps:$4 sm:$0xff]  }
 0x4fe   :  { %v5347_v13 = vadd.f32 %v3444_v34, %v2001_v29  ;;  %v2007_v37 = vadd.f32 %v5345_v62, %v5343_v54  ;;  %v5360_v42 = vpack.c.bf16 %v5345_v62, %v5340_v58  ;;  %v5546_v34 = vld [vmem:[#allocation3 + $0x2d8] ss:$24 sps:$4 sm:$0xff]   ;;  %6622 = vst [vmem:[#allocation47_spill] sm:$0xff] %v5552_v0  ;;  %6623 = vst [vmem:[#allocation19_spill] sm:$0xff] %v5555_v15 }
 0x4ff   :  { %6620 = vst [vmem:[#allocation102_spill] sm:$0xff] %v5546_v34  ;;  %v5558_v29 = vld [vmem:[#allocation3 + $0x278] ss:$24 sps:$4 sm:$0xff]  }
 0x500   :  { %v2012_v59 = vpack.c.bf16 %v5347_v13, %v5343_v54  ;;  %v2006_v11 = vsub.f32 %v5340_v58, %v5347_v13  ;;  %3079 = vst [vmem:[%s6058_s6 + $0x38] sm:$0xff] %v2007_v37  ;;  %6624 = vst [vmem:[#allocation103_spill] sm:$0xff] %v5558_v29  ;;  %v5561_v37 = vld [vmem:[#allocation3 + $0x24c] ss:$24 sps:$4 sm:$0xff]  }
 0x501   :  { %6625 = vst [vmem:[#allocation138_spill] sm:$0xff] %v5561_v37 }
 0x502   :  { %2045 = vmatprep.mubr.bf16.mxu1 %v2012_v59  ;;  %2088 = vmatprep.mubr.bf16.mxu0 %v2012_v59  ;;  %3078 = vst [vmem:[%s6058_s6 + $0x30] sm:$0xff] %v2006_v11  ;;  %v5567_v11 = vld [vmem:[#allocation3 + $0x21c] ss:$24 sps:$4 sm:$0xff]  }
 0x503   :  { %2046 = vmatmul.mubr.bf16.vlgmr.msra.gmra.mxu1 %v5360_v42  ;;  %2089 = vmatmul.mubr.bf16.vlgmr.msra.gmra.mxu0 %v5360_v42  ;;  %6627 = vst [vmem:[#allocation104_spill] sm:$0xff] %v5567_v11 }
 0x504   :  { %2100 = vmatpush1.bf16.msra.mxu1 %v5019_v20  ;;  %2131 = vmatprep.mubr.bf16.mxu1 %v2012_v59  ;;  %v5380_v20 = vld [vmem:[#allocation3 + $0xf4] ss:$24 sps:$4 sm:$0xff]   ;;  %v5564_v59 = vld [vmem:[#allocation3 + $0x248] ss:$24 sps:$4 sm:$0xff]  }
 0x505   :  { %2101 = vmatprep.subr.bf16.mxu1 %v5022_v61  ;;  %2234 = vmatpush1.bf16.msra.mxu0 %v5369_v17  ;;  %v5385_v61 = vld [vmem:[#allocation3 + $0xf0] ss:$24 sps:$4 sm:$0xff]   ;;  %6626 = vst [vmem:[#allocation20_spill] sm:$0xff] %v5564_v59 }
 0x506   :  { %2235 = vmatprep.subr.bf16.mxu0 %v5372_v19 }
 0x508   :  { %2102 = vmatpush1.bf16.msra.mxu1 %v5027_v52  ;;  %v5393_v52 = vld [vmem:[#allocation3 + $0xc0] ss:$24 sps:$4 sm:$0xff]  }
 0x509   :  { %2103 = vmatprep.subr.bf16.mxu1 %v5030_v16  ;;  %2236 = vmatpush1.bf16.msra.mxu0 %v5377_v25  ;;  %v5396_v16 = vld [vmem:[#allocation3 + $0x94] ss:$24 sps:$4 sm:$0xff]  }
 0x50a   :  { %2237 = vmatprep.subr.bf16.mxu0 %v5380_v20 }
 0x50c   :  { %2104 = vmatpush1.bf16.msra.mxu1 %v5035_v10  ;;  %v5401_v10 = vld [vmem:[#allocation3 + $0x90] ss:$24 sps:$4 sm:$0xff]  }
 0x50d   :  { %2105 = vmatprep.subr.bf16.mxu1 %v5038_v6  ;;  %2238 = vmatpush1.bf16.msra.mxu0 %v5385_v61  ;;  %v5404_v6 = vld [vmem:[#allocation3 + $0x64] ss:$24 sps:$4 sm:$0xff]  }
 0x50e   :  { %2239 = vmatprep.subr.bf16.mxu0 %v5388_v27 }
 0x510   :  { %2106 = vmatpush1.bf16.msra.mxu1 %v5043_v56  ;;  %v5409_v56 = vld [vmem:[#allocation3 + $0x60] ss:$24 sps:$4 sm:$0xff]  }
 0x511   :  { %2107 = vmatprep.subr.bf16.mxu1 %v5046_v48  ;;  %2240 = vmatpush1.bf16.msra.mxu0 %v5393_v52  ;;  %v5412_v48 = vld [vmem:[#allocation3 + $0x34] ss:$24 sps:$4 sm:$0xff]  }
 0x512   :  { %2241 = vmatprep.subr.bf16.mxu0 %v5396_v16 }
 0x514   :  { %2108 = vmatpush1.bf16.msra.mxu1 %v5051_v12  ;;  %v5417_v12 = vld [vmem:[#allocation3 + $0x30] ss:$24 sps:$4 sm:$0xff]  }
 0x515   :  { %2109 = vmatprep.subr.bf16.mxu1 %v5054_v63  ;;  %2242 = vmatpush1.bf16.msra.mxu0 %v5401_v10  ;;  %v5420_v63 = vld [vmem:[#allocation3 + $0x4] ss:$24 sps:$4 sm:$0xff]  }
 0x516   :  { %2243 = vmatprep.subr.bf16.mxu0 %v5404_v6 }
 0x518   :  { %2110 = vmatpush1.bf16.msra.mxu1 %v5059_v51  ;;  %v5425_v51 = vld [vmem:[#allocation3] ss:$24 sps:$4 sm:$0xff]  }
 0x519   :  { %2111 = vmatprep.subr.bf16.mxu1 %v5062_v55  ;;  %2244 = vmatpush1.bf16.msra.mxu0 %v5409_v56  ;;  %v5428_v55 = vld [vmem:[#allocation3 + $0x2d4] ss:$24 sps:$4 sm:$0xff]  }
 0x51a   :  { %2245 = vmatprep.subr.bf16.mxu0 %v5412_v48 }
 0x51c   :  { %2112 = vmatpush1.bf16.msra.mxu1 %v5067_v38  ;;  %v5433_v38 = vld [vmem:[#allocation3 + $0x2d0] ss:$24 sps:$4 sm:$0xff]  }
 0x51d   :  { %2113 = vmatprep.subr.bf16.mxu1 %v5070_v24  ;;  %2246 = vmatpush1.bf16.msra.mxu0 %v5417_v12  ;;  %v5436_v24 = vld [vmem:[#allocation3 + $0x2a4] ss:$24 sps:$4 sm:$0xff]  }
 0x51e   :  { %2247 = vmatprep.subr.bf16.mxu0 %v5420_v63  ;;  %6588 = vst [vmem:[#allocation31_spill] sm:$0xff] %v5436_v24 }
 0x520   :  { %2114 = vmatpush1.bf16.msra.mxu1 %v5075_v22  ;;  %v5441_v22 = vld [vmem:[#allocation3 + $0x2a0] ss:$24 sps:$4 sm:$0xff]  }
 0x521   :  { %2115 = vmatprep.subr.bf16.mxu1 %v5078_v40  ;;  %2248 = vmatpush1.bf16.msra.mxu0 %v5425_v51  ;;  %6589 = vst [vmem:[#allocation9_spill] sm:$0xff] %v5441_v22  ;;  %v5444_v40 = vld [vmem:[#allocation3 + $0x274] ss:$24 sps:$4 sm:$0xff]  }
 0x522   :  { %2249 = vmatprep.subr.bf16.mxu0 %v5428_v55  ;;  %6590 = vst [vmem:[#allocation33_spill] sm:$0xff] %v5444_v40 }
 0x524   :  { %2116 = vmatpush2.bf16.msra.mxu1 %v5083_v46  ;;  %v5449_v46 = vld [vmem:[#allocation3 + $0x270] ss:$24 sps:$4 sm:$0xff]  }
 0x525   :  { %2117 = vmatprep.subr.bf16.mxu1 %v5086_v44  ;;  %2250 = vmatpush2.bf16.msra.mxu0 %v5433_v38  ;;  %6591 = vst [vmem:[#allocation11_spill] sm:$0xff] %v5449_v46  ;;  %v5452_v44 = vld [vmem:[#allocation3 + $0x244] ss:$24 sps:$4 sm:$0xff]  }
 0x526   :  { %2251 = vmatprep.subr.bf16.mxu0 %v5436_v24  ;;  %6592 = vst [vmem:[#allocation48_spill] sm:$0xff] %v5452_v44 }
 0x528   :  { %2118 = vmatpush2.bf16.msra.mxu1 %v6516_v7  ;;  %v5457_v7 = vld [vmem:[#allocation3 + $0x240] ss:$24 sps:$4 sm:$0xff]  }
 0x529   :  { %2119 = vmatprep.subr.bf16.mxu1 %v6517_v36  ;;  %2252 = vmatpush2.bf16.msra.mxu0 %v5441_v22  ;;  %6593 = vst [vmem:[#allocation50_spill] sm:$0xff] %v5457_v7  ;;  %v5460_v36 = vld [vmem:[#allocation3 + $0x214] ss:$24 sps:$4 sm:$0xff]  }
 0x52a   :  { %2253 = vmatprep.subr.bf16.mxu0 %v5444_v40  ;;  %6594 = vst [vmem:[#allocation52_spill] sm:$0xff] %v5460_v36 }
 0x52c   :  { %2120 = vmatpush2.bf16.msra.mxu1 %v6520_v26  ;;  %v5465_v26 = vld [vmem:[#allocation3 + $0x210] ss:$24 sps:$4 sm:$0xff]  }
 0x52d   :  { %2121 = vmatprep.subr.bf16.mxu1 %v6521_v1  ;;  %2254 = vmatpush2.bf16.msra.mxu0 %v5449_v46  ;;  %6595 = vst [vmem:[#allocation54_spill] sm:$0xff] %v5465_v26  ;;  %v5468_v1 = vld [vmem:[#allocation3 + $0x1e4] ss:$24 sps:$4 sm:$0xff]  }
 0x52e   :  { %2255 = vmatprep.subr.bf16.mxu0 %v5452_v44  ;;  %6596 = vst [vmem:[#allocation49_spill] sm:$0xff] %v5468_v1 }
 0x530   :  { %2122 = vmatpush2.bf16.msra.mxu1 %v6524_v9  ;;  %v5473_v9 = vld [vmem:[#allocation3 + $0x1e0] ss:$24 sps:$4 sm:$0xff]  }
 0x531   :  { %2123 = vmatprep.subr.bf16.mxu1 %v6525_v3  ;;  %2256 = vmatpush2.bf16.msra.mxu0 %v5457_v7  ;;  %6597 = vst [vmem:[#allocation51_spill] sm:$0xff] %v5473_v9  ;;  %v5476_v3 = vld [vmem:[#allocation3 + $0x1b4] ss:$24 sps:$4 sm:$0xff]  }
 0x532   :  { %2257 = vmatprep.subr.bf16.mxu0 %v5460_v36  ;;  %6598 = vst [vmem:[#allocation53_spill] sm:$0xff] %v5476_v3 }
 0x534   :  { %2124 = vmatpush2.bf16.msra.mxu1 %v6528_v21  ;;  %v5481_v21 = vld [vmem:[#allocation3 + $0x1b0] ss:$24 sps:$4 sm:$0xff]  }
 0x535   :  { %2125 = vmatprep.subr.bf16.mxu1 %v6529_v23  ;;  %2258 = vmatpush2.bf16.msra.mxu0 %v5465_v26  ;;  %6599 = vst [vmem:[#allocation55_spill] sm:$0xff] %v5481_v21  ;;  %v5484_v23 = vld [vmem:[#allocation3 + $0x184] ss:$24 sps:$4 sm:$0xff]  }
 0x536   :  { %2259 = vmatprep.subr.bf16.mxu0 %v5468_v1  ;;  %6600 = vst [vmem:[#allocation17_spill] sm:$0xff] %v5484_v23 }
 0x538   :  { %2126 = vmatpush2.bf16.msra.mxu1 %v6532_v47  ;;  %v5488_v47 = vld [vmem:[#allocation3 + $0x15c] ss:$24 sps:$4 sm:$0xff]  }
 0x539   :  { %2127 = vmatprep.subr.bf16.mxu1 %v6533_v49  ;;  %2260 = vmatpush2.bf16.msra.mxu0 %v5473_v9  ;;  %6601 = vst [vmem:[#allocation25_spill] sm:$0xff] %v5488_v47  ;;  %v5491_v49 = vld [vmem:[#allocation3 + $0x180] ss:$24 sps:$4 sm:$0xff]  }
 0x53a   :  { %2261 = vmatprep.subr.bf16.mxu0 %v5476_v3  ;;  %6602 = vst [vmem:[#allocation27_spill] sm:$0xff] %v5491_v49 }
 0x53c   :  { %2128 = vmatpush2.bf16.msra.mxu1 %v6536_v45  ;;  %v5494_v45 = vld [vmem:[#allocation3 + $0x164] ss:$24 sps:$4 sm:$0xff]  }
 0x53d   :  { %2129 = vmatprep.subr.bf16.mxu1 %v6537_v43  ;;  %2262 = vmatpush2.bf16.msra.mxu0 %v5481_v21  ;;  %6603 = vst [vmem:[#allocation13_spill] sm:$0xff] %v5494_v45  ;;  %v5498_v43 = vld [vmem:[#allocation3 + $0x158] ss:$24 sps:$4 sm:$0xff]  }
 0x53e   :  { %2263 = vmatprep.subr.bf16.mxu0 %v5484_v23  ;;  %6604 = vst [vmem:[#allocation18_spill] sm:$0xff] %v5498_v43 }
 0x540   :  { %2130 = vmatpush2.bf16.msra.mxu1 %v6540_v5  ;;  %v5504_v5 = vld [vmem:[#allocation3 + $0x128] ss:$24 sps:$4 sm:$0xff]  }
 0x541   :  { %2276 = vmatprep.subr.bf16.mxu1 %v5488_v47  ;;  %2264 = vmatpush2.bf16.msra.mxu0 %v5491_v49  ;;  %6606 = vst [vmem:[#allocation7_spill] sm:$0xff] %v5504_v5 }
 0x542   :  { %2319 = vmatprep.subr.bf16.mxu0 %v5494_v45 }
 0x543   :  { %2132 = vmatmul.mubr.bf16.vlgmr.msra.gmra.mxu1 %v5360_v42  ;;  %v5570_v42 = vld [vmem:[#allocation3 + $0x218] ss:$24 sps:$4 sm:$0xff]  }
 0x544   :  { %2277 = vmatpush1.bf16.msra.mxu1 %v5498_v43  ;;  %6628 = vst [vmem:[#allocation105_spill] sm:$0xff] %v5570_v42 }
 0x545   :  { %2278 = vmatprep.subr.bf16.mxu1 %v5501_v33 }
 0x548   :  { %2279 = vmatpush1.bf16.msra.mxu1 %v5504_v5 }
 0x549   :  { %2280 = vmatprep.subr.bf16.mxu1 %v5507_v8 }
 0x54c   :  { %2281 = vmatpush1.bf16.msra.mxu1 %v5510_v53 }
 0x54d   :  { %2282 = vmatprep.subr.bf16.mxu1 %v5513_v31  ;;  %v6640_v31 = vld [vmem:[#allocation64_spill] sm:$0xff] }
 0x550   :  { %2283 = vmatpush1.bf16.msra.mxu1 %v5516_v41 }
 0x551   :  { %2284 = vmatprep.subr.bf16.mxu1 %v5519_v14 }
 0x554   :  { %2285 = vmatpush1.bf16.msra.mxu1 %v5522_v57 }
 0x555   :  { %2286 = vmatprep.subr.bf16.mxu1 %v5525_v18 }
 0x558   :  { %2287 = vmatpush1.bf16.msra.mxu1 %v5528_v35  ;;  %v6639_v35 = vld [vmem:[#allocation24_spill] sm:$0xff] }
 0x559   :  { %2288 = vmatprep.subr.bf16.mxu1 %v5531_v50 }
 0x55c   :  { %2289 = vmatpush1.bf16.msra.mxu1 %v5534_v39  ;;  %v6638_v39 = vld [vmem:[#allocation23_spill] sm:$0xff] }
 0x55d   :  { %2290 = vmatprep.subr.bf16.mxu1 %v5537_v60 }
 0x560   :  { %2291 = vmatpush1.bf16.msra.mxu1 %v5540_v4 }
 0x561   :  { %2292 = vmatprep.subr.bf16.mxu1 %v5543_v28  ;;  %v6637_v28 = vld [vmem:[#allocation22_spill] sm:$0xff] }
 0x564   :  { %2293 = vmatpush2.bf16.msra.mxu1 %v5546_v34 }
 0x565   :  { %2294 = vmatprep.subr.bf16.mxu1 %v5549_v2 }
 0x568   :  { %2295 = vmatpush2.bf16.msra.mxu1 %v5552_v0 }
 0x569   :  { %2296 = vmatprep.subr.bf16.mxu1 %v5555_v15  ;;  %v5573_v15 = vld [vmem:[#allocation3 + $0x1ec] ss:$24 sps:$4 sm:$0xff]  }
 0x56a   :  { %6629 = vst [vmem:[#allocation106_spill] sm:$0xff] %v5573_v15 }
 0x56c   :  { %2297 = vmatpush2.bf16.msra.mxu1 %v5558_v29  ;;  %v5576_v29 = vld [vmem:[#allocation3 + $0x1e8] ss:$24 sps:$4 sm:$0xff]  }
 0x56d   :  { %2298 = vmatprep.subr.bf16.mxu1 %v5561_v37  ;;  %6630 = vst [vmem:[#allocation107_spill] sm:$0xff] %v5576_v29  ;;  %v5579_v37 = vld [vmem:[#allocation3 + $0x1bc] ss:$24 sps:$4 sm:$0xff]  }
 0x56e   :  { %6631 = vst [vmem:[#allocation108_spill] sm:$0xff] %v5579_v37 }
 0x570   :  { %2299 = vmatpush2.bf16.msra.mxu1 %v5564_v59  ;;  %v5582_v59 = vld [vmem:[#allocation3 + $0x1b8] ss:$24 sps:$4 sm:$0xff]  }
 0x571   :  { %2300 = vmatprep.subr.bf16.mxu1 %v5567_v11  ;;  %6632 = vst [vmem:[#allocation109_spill] sm:$0xff] %v5582_v59  ;;  %v5585_v11 = vld [vmem:[#allocation3 + $0x18c] ss:$24 sps:$4 sm:$0xff]  }
 0x572   :  { %6633 = vst [vmem:[#allocation110_spill] sm:$0xff] %v5585_v11 }
 0x574   :  { %2301 = vmatpush2.bf16.msra.mxu1 %v5570_v42  ;;  %v5588_v42 = vld [vmem:[#allocation3 + $0x188] ss:$24 sps:$4 sm:$0xff]  }
 0x575   :  { %2302 = vmatprep.subr.bf16.mxu1 %v5573_v15  ;;  %6634 = vst [vmem:[#allocation111_spill] sm:$0xff] %v5588_v42  ;;  %v5591_v15 = vld [vmem:[#allocation3 + $0x154] ss:$24 sps:$4 sm:$0xff]  }
 0x576   :  { %6635 = vst [vmem:[#allocation112_spill] sm:$0xff] %v5591_v15 }
 0x578   :  { %2303 = vmatpush2.bf16.msra.mxu1 %v5576_v29 }
 0x579   :  { %2304 = vmatprep.subr.bf16.mxu1 %v5579_v37  ;;  %v6636_v37 = vld [vmem:[#allocation21_spill] sm:$0xff] }
 0x57c   :  { %2305 = vmatpush2.bf16.msra.mxu1 %v5582_v59 }
 0x57d   :  { %2306 = vmatprep.subr.bf16.mxu1 %v5585_v11 }
 0x580   :  { %2307 = vmatpush2.bf16.msra.mxu1 %v5588_v42 }
 0x581   :  { %2453 = vmatprep.subr.bf16.mxu1 %v5591_v15 }
 0x5c3   :  { %v2047_v29 = vpop.f32.mrf.mxu1  ;;  %v2090_v57 = vpop.f32.mrf.mxu0 }
 0x5c4   :  { %v2142_v34 = vadd.f32 %v2047_v29, %v6636_v37  ;;  %v2144_v29 = vadd.f32 %v2090_v57, %v6640_v31 }
 0x5c5   :  { %v2049_v0 = vpop.f32.mrf.mxu1  ;;  %v2092_v15 = vpop.f32.mrf.mxu0 }
 0x5c6   :  { %v2143_v4 = vadd.f32 %v2049_v0, %v6637_v28  ;;  %v3080_v60 = vmul.f32 -1.442695, %v2142_v34  ;;  %v6641_v28 = vld [vmem:[#allocation66_spill] sm:$0xff] }
 0x5c7   :  { %v2051_v2 = vpop.f32.mrf.mxu1  ;;  %v2094_v41 = vpop.f32.mrf.mxu0  ;;  %v2145_v0 = vadd.f32 %v2092_v15, %v6641_v28 }
 0x5c8   :  { %v2146_v50 = vadd.f32 %v2051_v2, %v6638_v39  ;;  %v3081_v11 = vmul.f32 -1.442695, %v2143_v4  ;;  %3447 = vpow2.f32 %v3080_v60  ;;  %v3082_v39 = vmul.f32 -1.442695, %v2144_v29  ;;  %v6642_v4 = vld [vmem:[#allocation68_spill] sm:$0xff] }
 0x5c9   :  { %v2053_v59 = vpop.f32.mrf.mxu1  ;;  %v2096_v34 = vpop.f32.mrf.mxu0  ;;  %v2148_v2 = vadd.f32 %v2094_v41, %v6642_v4 }
 0x5ca   :  { %v2147_v18 = vadd.f32 %v2053_v59, %v6639_v35  ;;  %v3084_v42 = vmul.f32 -1.442695, %v2146_v50  ;;  %3449 = vpow2.f32 %v3081_v11  ;;  %v3083_v50 = vmul.f32 -1.442695, %v2145_v0  ;;  %v6643_v59 = vld [vmem:[#allocation70_spill] sm:$0xff] }
 0x5cb   :  { %v2149_v11 = vadd.f32 %v2096_v34, %v6643_v59 }
 0x5cc   :  { %v3085_v14 = vmul.f32 -1.442695, %v2147_v18  ;;  %3451 = vpow2.f32 %v3084_v42 }
 0x5cd   :  { %v3087_v31 = vmul.f32 -1.442695, %v2149_v11 }
 0x5ce   :  { %3453 = vpow2.f32 %v3085_v14  ;;  %v3086_v14 = vmul.f32 -1.442695, %v2148_v2 }
 0x5cf   :  { %3455 = vpow2.f32 %v3082_v39 }
 0x5d5   :  { %v3448_v37 = vpop.eup %3447 }
 0x5d6   :  { %v2174_v35 = vadd.f32 1.0, %v3448_v37 }
 0x5d7   :  { %v3450_v53 = vpop.eup %3449 }
 0x5d8   :  { %v2175_v18 = vadd.f32 1.0, %v3450_v53  ;;  %3457 = vrcp.f32 %v2174_v35 }
 0x5d9   :  { %v3452_v60 = vpop.eup %3451  ;;  %3459 = vpow2.f32 %v3083_v50 }
 0x5da   :  { %v2178_v8 = vadd.f32 1.0, %v3452_v60  ;;  %3461 = vrcp.f32 %v2175_v18  ;;  %v6644_v60 = vld [vmem:[#allocation65_spill] sm:$0xff] }
 0x5db   :  { %v3454_v42 = vpop.eup %3453  ;;  %3463 = vpow2.f32 %v3086_v14 }
 0x5dc   :  { %v2179_v57 = vadd.f32 1.0, %v3454_v42  ;;  %3465 = vrcp.f32 %v2178_v8  ;;  %v3456_v15 = vpop.eup %3455 }
 0x5dd   :  { %3467 = vpow2.f32 %v3087_v31  ;;  %v2176_v4 = vadd.f32 1.0, %v3456_v15  ;;  %v6645_v31 = vld [vmem:[#allocation67_spill] sm:$0xff] }
 0x5de   :  { %3469 = vrcp.f32 %v2179_v57 }
 0x5e5   :  { %v3458_v37 = vpop.eup %3457 }
 0x5e6   :  { %v3460_v53 = vpop.eup %3459 }
 0x5e7   :  { %v3462_v39 = vpop.eup %3461  ;;  %v2177_v18 = vadd.f32 1.0, %v3460_v53 }
 0x5e8   :  { %v3464_v35 = vpop.eup %3463 }
 0x5e9   :  { %v3466_v11 = vpop.eup %3465  ;;  %v2180_v15 = vadd.f32 1.0, %v3464_v35 }
 0x5ea   :  { %v3468_v14 = vpop.eup %3467 }
 0x603   :  { %v2133_v41 = vpop.f32.mrf.mxu1 }
 0x604   :  { %v2198_v29 = vadd.f32 %v2133_v41, %v4698_v32 }
 0x605   :  { %v2135_v28 = vpop.f32.mrf.mxu1 }
 0x606   :  { %v2202_v0 = vmul.f32 %v3458_v37, %v2198_v29  ;;  %v2199_v34 = vadd.f32 %v2135_v28, %v4702_v30  ;;  %v3470_v37 = vpop.eup %3469  ;;  %v6646_v28 = vld [vmem:[#allocation69_spill] sm:$0xff] }
 0x607   :  { %v2137_v2 = vpop.f32.mrf.mxu1 }
 0x608   :  { %v2206_v50 = vadd.f32 %v2202_v0, %v6644_v60  ;;  %v2203_v59 = vmul.f32 %v3462_v39, %v2199_v34  ;;  %v2200_v8 = vadd.f32 %v2137_v2, %v4698_v32  ;;  %v2181_v34 = vadd.f32 1.0, %v3468_v14  ;;  %v6647_v39 = vld [vmem:[#allocation71_spill] sm:$0xff] }
 0x609   :  { %v2139_v42 = vpop.f32.mrf.mxu1 }
 0x60a   :  { %3471 = vtanh.f32 %v2206_v50  ;;  %v2207_v57 = vadd.f32 %v2203_v59, %v6645_v31  ;;  %v2204_v41 = vmul.f32 %v3466_v11, %v2200_v8  ;;  %v2201_v29 = vadd.f32 %v2139_v42, %v4702_v30 }
 0x60b   :  { %3473 = vrcp.f32 %v2176_v4 }
 0x60c   :  { %3475 = vtanh.f32 %v2207_v57  ;;  %v2208_v5 = vadd.f32 %v2204_v41, %v6646_v28  ;;  %v2205_v0 = vmul.f32 %v3470_v37, %v2201_v29 }
 0x60d   :  { %3477 = vrcp.f32 %v2177_v18 }
 0x60e   :  { %3479 = vtanh.f32 %v2208_v5  ;;  %v2209_v53 = vadd.f32 %v2205_v0, %v6647_v39  ;;  %v5643_v39 = vld [vmem:[#allocation3 + $0x134] ss:$24 sps:$4 sm:$0xff]  }
 0x60f   :  { %3481 = vrcp.f32 %v2180_v15 }
 0x610   :  { %3483 = vtanh.f32 %v2209_v53  ;;  %v5648_v53 = vld [vmem:[#allocation3 + $0x130] ss:$24 sps:$4 sm:$0xff]  }
 0x611   :  { %3485 = vrcp.f32 %v2181_v34  ;;  %v5640_v34 = vld [vmem:[#allocation3 + $0x160] ss:$24 sps:$4 sm:$0xff]  }
 0x617   :  { %v3472_v2 = vpop.eup %3471 }
 0x618   :  { %v3474_v60 = vpop.eup %3473  ;;  %v2214_v50 = vsub.f32 %v5340_v58, %v3472_v2 }
 0x619   :  { %v3476_v59 = vpop.eup %3475 }
 0x61a   :  { %v3478_v8 = vpop.eup %3477  ;;  %v2215_v4 = vsub.f32 %v5343_v54, %v3476_v59  ;;  %v2218_v35 = vmul.f32 %v3474_v60, %v2214_v50  ;;  %v5656_v60 = vld [vmem:[#allocation3 + $0x100] ss:$24 sps:$4 sm:$0xff]   ;;  %v5659_v50 = vld [vmem:[#allocation3 + $0xd4] ss:$24 sps:$4 sm:$0xff]  }
 0x61b   :  { %v3480_v11 = vpop.eup %3479 }
 0x61c   :  { %v3482_v42 = vpop.eup %3481  ;;  %v2219_v31 = vmul.f32 %v3478_v8, %v2215_v4  ;;  %v2216_v18 = vsub.f32 %v5345_v62, %v3480_v11  ;;  %v5613_v5 = vadd.f32 %v3472_v2, %v2218_v35  ;;  %v5651_v2 = vld [vmem:[#allocation3 + $0x104] ss:$24 sps:$4 sm:$0xff]   ;;  %v5672_v4 = vld [vmem:[#allocation3 + $0xa0] ss:$24 sps:$4 sm:$0xff]   ;;  %v5675_v35 = vld [vmem:[#allocation3 + $0x74] ss:$24 sps:$4 sm:$0xff]  }
 0x61d   :  { %v3484_v14 = vpop.eup %3483  ;;  %v5667_v8 = vld [vmem:[#allocation3 + $0xa4] ss:$24 sps:$4 sm:$0xff]  }
 0x61e   :  { %v2217_v57 = vsub.f32 %v5347_v13, %v3484_v14  ;;  %v5616_v41 = vadd.f32 %v3476_v59, %v2219_v31  ;;  %v2220_v29 = vmul.f32 %v3482_v42, %v2216_v18  ;;  %v3486_v37 = vpop.eup %3485  ;;  %v5664_v59 = vld [vmem:[#allocation3 + $0xd0] ss:$24 sps:$4 sm:$0xff]   ;;  %v5683_v42 = vld [vmem:[#allocation3 + $0x44] ss:$24 sps:$4 sm:$0xff]   ;;  %v5688_v31 = vld [vmem:[#allocation3 + $0x40] ss:$24 sps:$4 sm:$0xff]  }
 0x61f   :  { %v5691_v18 = vld [vmem:[#allocation3 + $0x14] ss:$24 sps:$4 sm:$0xff]  }
 0x620   :  { %v2221_v58 = vmul.f32 %v3486_v37, %v2217_v57  ;;  %v5618_v15 = vadd.f32 %v3480_v11, %v2220_v29  ;;  %v5680_v11 = vld [vmem:[#allocation3 + $0x70] ss:$24 sps:$4 sm:$0xff]   ;;  %v5699_v57 = vld [vmem:[#allocation3 + $0x2e4] ss:$24 sps:$4 sm:$0xff]   ;;  %v5704_v29 = vld [vmem:[#allocation3 + $0x2e0] ss:$24 sps:$4 sm:$0xff]  }
 0x621   :  { %v5707_v37 = vld [vmem:[#allocation3 + $0x2b4] ss:$24 sps:$4 sm:$0xff]  }
 0x622   :  { %v5620_v28 = vadd.f32 %v3484_v14, %v2221_v58  ;;  %v2227_v54 = vadd.f32 %v5618_v15, %v5616_v41  ;;  %v5633_v13 = vpack.c.bf16 %v5618_v15, %v5613_v5  ;;  %v5696_v14 = vld [vmem:[#allocation3 + $0x10] ss:$24 sps:$4 sm:$0xff]  }
 0x623   :  { %v5712_v58 = vld [vmem:[#allocation3 + $0x2b0] ss:$24 sps:$4 sm:$0xff]  }
 0x624   :  { %v2232_v62 = vpack.c.bf16 %v5620_v28, %v5616_v41  ;;  %v2226_v0 = vsub.f32 %v5613_v5, %v5620_v28  ;;  %3089 = vst [vmem:[%s6058_s6 + $0x48] sm:$0xff] %v2227_v54  ;;  %6648 = vst [vmem:[#allocation113_spill] sm:$0xff] %v5712_v58  ;;  %v5715_v54 = vld [vmem:[#allocation3 + $0x284] ss:$24 sps:$4 sm:$0xff]  }
 0x625   :  { %6649 = vst [vmem:[#allocation114_spill] sm:$0xff] %v5715_v54 }
 0x626   :  { %2265 = vmatprep.mubr.bf16.mxu0 %v2232_v62  ;;  %2308 = vmatprep.mubr.bf16.mxu1 %v2232_v62  ;;  %3088 = vst [vmem:[%s6058_s6 + $0x40] sm:$0xff] %v2226_v0  ;;  %v5723_v0 = vld [vmem:[#allocation3 + $0x254] ss:$24 sps:$4 sm:$0xff]  }
 0x627   :  { %2266 = vmatmul.mubr.bf16.vlgmr.msra.gmra.mxu0 %v5633_v13  ;;  %2309 = vmatmul.mubr.bf16.vlgmr.msra.gmra.mxu1 %v5633_v13  ;;  %6651 = vst [vmem:[#allocation116_spill] sm:$0xff] %v5723_v0 }
 0x628   :  { %2320 = vmatpush1.bf16.msra.mxu0 %v5640_v34  ;;  %2351 = vmatprep.mubr.bf16.mxu0 %v2232_v62  ;;  %v5720_v62 = vld [vmem:[#allocation3 + $0x280] ss:$24 sps:$4 sm:$0xff]  }
 0x629   :  { %2321 = vmatprep.subr.bf16.mxu0 %v5643_v39  ;;  %2454 = vmatpush1.bf16.msra.mxu1 %v5369_v17  ;;  %6650 = vst [vmem:[#allocation115_spill] sm:$0xff] %v5720_v62 }
 0x62a   :  { %2455 = vmatprep.subr.bf16.mxu1 %v5372_v19 }
 0x62c   :  { %2322 = vmatpush1.bf16.msra.mxu0 %v5648_v53 }
 0x62d   :  { %2323 = vmatprep.subr.bf16.mxu0 %v5651_v2  ;;  %2456 = vmatpush1.bf16.msra.mxu1 %v5377_v25 }
 0x62e   :  { %2457 = vmatprep.subr.bf16.mxu1 %v5380_v20 }
 0x630   :  { %2324 = vmatpush1.bf16.msra.mxu0 %v5656_v60 }
 0x631   :  { %2325 = vmatprep.subr.bf16.mxu0 %v5659_v50  ;;  %2458 = vmatpush1.bf16.msra.mxu1 %v5385_v61 }
 0x632   :  { %2459 = vmatprep.subr.bf16.mxu1 %v5388_v27 }
 0x634   :  { %2326 = vmatpush1.bf16.msra.mxu0 %v5664_v59 }
 0x635   :  { %2327 = vmatprep.subr.bf16.mxu0 %v5667_v8  ;;  %2460 = vmatpush1.bf16.msra.mxu1 %v5393_v52 }
 0x636   :  { %2461 = vmatprep.subr.bf16.mxu1 %v5396_v16 }
 0x638   :  { %2328 = vmatpush1.bf16.msra.mxu0 %v5672_v4 }
 0x639   :  { %2329 = vmatprep.subr.bf16.mxu0 %v5675_v35  ;;  %2462 = vmatpush1.bf16.msra.mxu1 %v5401_v10 }
 0x63a   :  { %2463 = vmatprep.subr.bf16.mxu1 %v5404_v6 }
 0x63c   :  { %2330 = vmatpush1.bf16.msra.mxu0 %v5680_v11 }
 0x63d   :  { %2331 = vmatprep.subr.bf16.mxu0 %v5683_v42  ;;  %2464 = vmatpush1.bf16.msra.mxu1 %v5409_v56 }
 0x63e   :  { %2465 = vmatprep.subr.bf16.mxu1 %v5412_v48 }
 0x640   :  { %2332 = vmatpush1.bf16.msra.mxu0 %v5688_v31 }
 0x641   :  { %2333 = vmatprep.subr.bf16.mxu0 %v5691_v18  ;;  %2466 = vmatpush1.bf16.msra.mxu1 %v5417_v12 }
 0x642   :  { %2467 = vmatprep.subr.bf16.mxu1 %v5420_v63 }
 0x644   :  { %2334 = vmatpush1.bf16.msra.mxu0 %v5696_v14 }
 0x645   :  { %2335 = vmatprep.subr.bf16.mxu0 %v5699_v57  ;;  %2468 = vmatpush1.bf16.msra.mxu1 %v5425_v51 }
 0x646   :  { %2469 = vmatprep.subr.bf16.mxu1 %v5428_v55 }
 0x648   :  { %2336 = vmatpush2.bf16.msra.mxu0 %v5704_v29 }
 0x649   :  { %2337 = vmatprep.subr.bf16.mxu0 %v5707_v37  ;;  %2470 = vmatpush2.bf16.msra.mxu1 %v5433_v38 }
 0x64a   :  { %2471 = vmatprep.subr.bf16.mxu1 %v5436_v24 }
 0x64c   :  { %2338 = vmatpush2.bf16.msra.mxu0 %v5712_v58  ;;  %v5728_v58 = vld [vmem:[#allocation3 + $0x250] ss:$24 sps:$4 sm:$0xff]  }
 0x64d   :  { %2339 = vmatprep.subr.bf16.mxu0 %v5715_v54  ;;  %2472 = vmatpush2.bf16.msra.mxu1 %v5441_v22  ;;  %6652 = vst [vmem:[#allocation117_spill] sm:$0xff] %v5728_v58  ;;  %v5731_v54 = vld [vmem:[#allocation3 + $0x224] ss:$24 sps:$4 sm:$0xff]  }
 0x64e   :  { %2473 = vmatprep.subr.bf16.mxu1 %v5444_v40  ;;  %6653 = vst [vmem:[#allocation118_spill] sm:$0xff] %v5731_v54 }
 0x650   :  { %2340 = vmatpush2.bf16.msra.mxu0 %v5720_v62  ;;  %v5736_v62 = vld [vmem:[#allocation3 + $0x220] ss:$24 sps:$4 sm:$0xff]  }
 0x651   :  { %2341 = vmatprep.subr.bf16.mxu0 %v5723_v0  ;;  %2474 = vmatpush2.bf16.msra.mxu1 %v5449_v46  ;;  %6654 = vst [vmem:[#allocation119_spill] sm:$0xff] %v5736_v62  ;;  %v5739_v0 = vld [vmem:[#allocation3 + $0x1f4] ss:$24 sps:$4 sm:$0xff]  }
 0x652   :  { %2475 = vmatprep.subr.bf16.mxu1 %v5452_v44  ;;  %6655 = vst [vmem:[#allocation120_spill] sm:$0xff] %v5739_v0  ;;  %v6695_v46 = vld [vmem:[#allocation72_spill] sm:$0xff] }
 0x654   :  { %2342 = vmatpush2.bf16.msra.mxu0 %v5728_v58  ;;  %v5744_v58 = vld [vmem:[#allocation3 + $0x1f0] ss:$24 sps:$4 sm:$0xff]  }
 0x655   :  { %2343 = vmatprep.subr.bf16.mxu0 %v5731_v54  ;;  %2476 = vmatpush2.bf16.msra.mxu1 %v5457_v7  ;;  %6656 = vst [vmem:[#allocation121_spill] sm:$0xff] %v5744_v58  ;;  %v5747_v54 = vld [vmem:[#allocation3 + $0x1c4] ss:$24 sps:$4 sm:$0xff]  }
 0x656   :  { %2477 = vmatprep.subr.bf16.mxu1 %v5460_v36  ;;  %6657 = vst [vmem:[#allocation122_spill] sm:$0xff] %v5747_v54  ;;  %v6694_v36 = vld [vmem:[#allocation8_spill] sm:$0xff] }
 0x658   :  { %2344 = vmatpush2.bf16.msra.mxu0 %v5736_v62  ;;  %v5752_v62 = vld [vmem:[#allocation3 + $0x1c0] ss:$24 sps:$4 sm:$0xff]  }
 0x659   :  { %2345 = vmatprep.subr.bf16.mxu0 %v5739_v0  ;;  %2478 = vmatpush2.bf16.msra.mxu1 %v5465_v26  ;;  %6658 = vst [vmem:[#allocation123_spill] sm:$0xff] %v5752_v62  ;;  %v5755_v0 = vld [vmem:[#allocation3 + $0x194] ss:$24 sps:$4 sm:$0xff]  }
 0x65a   :  { %2479 = vmatprep.subr.bf16.mxu1 %v5468_v1  ;;  %6659 = vst [vmem:[#allocation124_spill] sm:$0xff] %v5755_v0 }
 0x65c   :  { %2346 = vmatpush2.bf16.msra.mxu0 %v5744_v58  ;;  %v5760_v58 = vld [vmem:[#allocation3 + $0x190] ss:$24 sps:$4 sm:$0xff]  }
 0x65d   :  { %2347 = vmatprep.subr.bf16.mxu0 %v5747_v54  ;;  %2480 = vmatpush2.bf16.msra.mxu1 %v5473_v9  ;;  %6660 = vst [vmem:[#allocation125_spill] sm:$0xff] %v5760_v58 }
 0x65e   :  { %2481 = vmatprep.subr.bf16.mxu1 %v5476_v3 }
 0x660   :  { %2348 = vmatpush2.bf16.msra.mxu0 %v5752_v62  ;;  %v6664_v62 = vld [vmem:[#allocation40_spill] sm:$0xff] }
 0x661   :  { %2349 = vmatprep.subr.bf16.mxu0 %v5755_v0  ;;  %2482 = vmatpush2.bf16.msra.mxu1 %v5481_v21  ;;  %v6661_v0 = vld [vmem:[#allocation7_spill] sm:$0xff]  ;;  %v6662_v21 = vld [vmem:[#allocation14_spill] sm:$0xff] }
 0x662   :  { %2483 = vmatprep.subr.bf16.mxu1 %v5484_v23  ;;  %v6663_v23 = vld [vmem:[#allocation96_spill] sm:$0xff] }
 0x664   :  { %2350 = vmatpush2.bf16.msra.mxu0 %v5760_v58  ;;  %v6665_v58 = vld [vmem:[#allocation42_spill] sm:$0xff] }
 0x665   :  { %2496 = vmatprep.subr.bf16.mxu0 %v5488_v47  ;;  %2484 = vmatpush2.bf16.msra.mxu1 %v5491_v49  ;;  %v6666_v47 = vld [vmem:[#allocation97_spill] sm:$0xff]  ;;  %v6667_v49 = vld [vmem:[#allocation98_spill] sm:$0xff] }
 0x666   :  { %2539 = vmatprep.subr.bf16.mxu1 %v5494_v45  ;;  %v6668_v45 = vld [vmem:[#allocation44_spill] sm:$0xff] }
 0x667   :  { %2352 = vmatmul.mubr.bf16.vlgmr.msra.gmra.mxu0 %v5633_v13  ;;  %v6669_v13 = vld [vmem:[#allocation46_spill] sm:$0xff] }
 0x668   :  { %2497 = vmatpush1.bf16.msra.mxu0 %v5498_v43  ;;  %v6670_v43 = vld [vmem:[#allocation99_spill] sm:$0xff] }
 0x669   :  { %2498 = vmatprep.subr.bf16.mxu0 %v5501_v33  ;;  %v6671_v33 = vld [vmem:[#allocation100_spill] sm:$0xff] }
 0x66c   :  { %2499 = vmatpush1.bf16.msra.mxu0 %v6661_v0  ;;  %v6672_v0 = vld [vmem:[#allocation41_spill] sm:$0xff] }
 0x66d   :  { %2500 = vmatprep.subr.bf16.mxu0 %v6662_v21  ;;  %v6673_v21 = vld [vmem:[#allocation43_spill] sm:$0xff] }
 0x670   :  { %2501 = vmatpush1.bf16.msra.mxu0 %v6663_v23  ;;  %v6674_v23 = vld [vmem:[#allocation101_spill] sm:$0xff] }
 0x671   :  { %2502 = vmatprep.subr.bf16.mxu0 %v6664_v62  ;;  %v6675_v62 = vld [vmem:[#allocation102_spill] sm:$0xff] }
 0x674   :  { %2503 = vmatpush1.bf16.msra.mxu0 %v6665_v58  ;;  %v6676_v58 = vld [vmem:[#allocation45_spill] sm:$0xff] }
 0x675   :  { %2504 = vmatprep.subr.bf16.mxu0 %v6666_v47  ;;  %v6677_v47 = vld [vmem:[#allocation47_spill] sm:$0xff] }
 0x678   :  { %2505 = vmatpush1.bf16.msra.mxu0 %v6667_v49  ;;  %v6678_v49 = vld [vmem:[#allocation19_spill] sm:$0xff] }
 0x679   :  { %2506 = vmatprep.subr.bf16.mxu0 %v6668_v45  ;;  %v6679_v45 = vld [vmem:[#allocation103_spill] sm:$0xff] }
 0x67c   :  { %2507 = vmatpush1.bf16.msra.mxu0 %v6669_v13  ;;  %v6680_v13 = vld [vmem:[#allocation138_spill] sm:$0xff] }
 0x67d   :  { %2508 = vmatprep.subr.bf16.mxu0 %v6670_v43  ;;  %v6681_v43 = vld [vmem:[#allocation20_spill] sm:$0xff] }
 0x680   :  { %2509 = vmatpush1.bf16.msra.mxu0 %v6671_v33  ;;  %v6682_v33 = vld [vmem:[#allocation104_spill] sm:$0xff] }
 0x681   :  { %2510 = vmatprep.subr.bf16.mxu0 %v6672_v0  ;;  %v6683_v0 = vld [vmem:[#allocation105_spill] sm:$0xff] }
 0x684   :  { %2511 = vmatpush1.bf16.msra.mxu0 %v6673_v21  ;;  %v6684_v21 = vld [vmem:[#allocation106_spill] sm:$0xff] }
 0x685   :  { %2512 = vmatprep.subr.bf16.mxu0 %v6674_v23  ;;  %v6685_v23 = vld [vmem:[#allocation107_spill] sm:$0xff] }
 0x688   :  { %2513 = vmatpush2.bf16.msra.mxu0 %v6675_v62  ;;  %v6686_v62 = vld [vmem:[#allocation108_spill] sm:$0xff] }
 0x689   :  { %2514 = vmatprep.subr.bf16.mxu0 %v6676_v58  ;;  %v6687_v58 = vld [vmem:[#allocation109_spill] sm:$0xff] }
 0x68c   :  { %2515 = vmatpush2.bf16.msra.mxu0 %v6677_v47  ;;  %v6688_v47 = vld [vmem:[#allocation110_spill] sm:$0xff] }
 0x68d   :  { %2516 = vmatprep.subr.bf16.mxu0 %v6678_v49  ;;  %v6689_v49 = vld [vmem:[#allocation111_spill] sm:$0xff] }
 0x690   :  { %2517 = vmatpush2.bf16.msra.mxu0 %v6679_v45  ;;  %v6690_v45 = vld [vmem:[#allocation112_spill] sm:$0xff] }
 0x691   :  { %2518 = vmatprep.subr.bf16.mxu0 %v6680_v13 }
 0x694   :  { %2519 = vmatpush2.bf16.msra.mxu0 %v6681_v43 }
 0x695   :  { %2520 = vmatprep.subr.bf16.mxu0 %v6682_v33  ;;  %v6691_v33 = vld [vmem:[#allocation26_spill] sm:$0xff] }
 0x698   :  { %2521 = vmatpush2.bf16.msra.mxu0 %v6683_v0  ;;  %v6692_v0 = vld [vmem:[#allocation28_spill] sm:$0xff] }
 0x699   :  { %2522 = vmatprep.subr.bf16.mxu0 %v6684_v21 }
 0x69c   :  { %2523 = vmatpush2.bf16.msra.mxu0 %v6685_v23  ;;  %v6693_v23 = vld [vmem:[#allocation30_spill] sm:$0xff] }
 0x69d   :  { %2524 = vmatprep.subr.bf16.mxu0 %v6686_v62 }
 0x6a0   :  { %2525 = vmatpush2.bf16.msra.mxu0 %v6687_v58 }
 0x6a1   :  { %2526 = vmatprep.subr.bf16.mxu0 %v6688_v47 }
 0x6a4   :  { %2527 = vmatpush2.bf16.msra.mxu0 %v6689_v49 }
 0x6a5   :  { %2673 = vmatprep.subr.bf16.mxu0 %v6690_v45 }
 0x6e7   :  { %v2267_v13 = vpop.f32.mrf.mxu0  ;;  %v2310_v7 = vpop.f32.mrf.mxu1 }
 0x6e8   :  { %v2362_v9 = vadd.f32 %v2267_v13, %v6691_v33  ;;  %v2364_v33 = vadd.f32 %v2310_v7, %v6695_v46 }
 0x6e9   :  { %v2269_v43 = vpop.f32.mrf.mxu0  ;;  %v2312_v45 = vpop.f32.mrf.mxu1 }
 0x6ea   :  { %v2363_v54 = vadd.f32 %v2269_v43, %v6692_v0  ;;  %v3090_v1 = vmul.f32 -1.442695, %v2362_v9  ;;  %v6696_v43 = vld [vmem:[#allocation74_spill] sm:$0xff] }
 0x6eb   :  { %v2271_v3 = vpop.f32.mrf.mxu0  ;;  %v2314_v44 = vpop.f32.mrf.mxu1  ;;  %v2365_v0 = vadd.f32 %v2312_v45, %v6696_v43 }
 0x6ec   :  { %v2366_v26 = vadd.f32 %v2271_v3, %v6693_v23  ;;  %v3091_v62 = vmul.f32 -1.442695, %v2363_v54  ;;  %3487 = vpow2.f32 %v3090_v1  ;;  %v3092_v3 = vmul.f32 -1.442695, %v2364_v33  ;;  %v6697_v23 = vld [vmem:[#allocation76_spill] sm:$0xff] }
 0x6ed   :  { %v2273_v21 = vpop.f32.mrf.mxu0  ;;  %v2316_v9 = vpop.f32.mrf.mxu1  ;;  %v2368_v54 = vadd.f32 %v2314_v44, %v6697_v23 }
 0x6ee   :  { %v2367_v58 = vadd.f32 %v2273_v21, %v6694_v36  ;;  %v3094_v47 = vmul.f32 -1.442695, %v2366_v26  ;;  %3489 = vpow2.f32 %v3091_v62  ;;  %v3093_v26 = vmul.f32 -1.442695, %v2365_v0  ;;  %v6698_v21 = vld [vmem:[#allocation78_spill] sm:$0xff] }
 0x6ef   :  { %v2369_v62 = vadd.f32 %v2316_v9, %v6698_v21 }
 0x6f0   :  { %v3095_v49 = vmul.f32 -1.442695, %v2367_v58  ;;  %3491 = vpow2.f32 %v3094_v47 }
 0x6f1   :  { %v3097_v46 = vmul.f32 -1.442695, %v2369_v62 }
 0x6f2   :  { %3493 = vpow2.f32 %v3095_v49  ;;  %v3096_v49 = vmul.f32 -1.442695, %v2368_v54 }
 0x6f3   :  { %3495 = vpow2.f32 %v3092_v3 }
 0x6f9   :  { %v3488_v13 = vpop.eup %3487 }
 0x6fa   :  { %v2394_v36 = vadd.f32 1.0, %v3488_v13 }
 0x6fb   :  { %v3490_v40 = vpop.eup %3489 }
 0x6fc   :  { %v2395_v58 = vadd.f32 1.0, %v3490_v40  ;;  %3497 = vrcp.f32 %v2394_v36 }
 0x6fd   :  { %v3492_v1 = vpop.eup %3491  ;;  %3499 = vpow2.f32 %v3093_v26 }
 0x6fe   :  { %v2398_v22 = vadd.f32 1.0, %v3492_v1  ;;  %3501 = vrcp.f32 %v2395_v58  ;;  %v6699_v1 = vld [vmem:[#allocation73_spill] sm:$0xff] }
 0x6ff   :  { %v3494_v47 = vpop.eup %3493  ;;  %3503 = vpow2.f32 %v3096_v49 }
 0x700   :  { %v2399_v7 = vadd.f32 1.0, %v3494_v47  ;;  %3505 = vrcp.f32 %v2398_v22  ;;  %v3496_v45 = vpop.eup %3495 }
 0x701   :  { %3507 = vpow2.f32 %v3097_v46  ;;  %v2396_v23 = vadd.f32 1.0, %v3496_v45  ;;  %v6700_v46 = vld [vmem:[#allocation75_spill] sm:$0xff] }
 0x702   :  { %3509 = vrcp.f32 %v2399_v7 }
 0x709   :  { %v3498_v13 = vpop.eup %3497 }
 0x70a   :  { %v3500_v40 = vpop.eup %3499 }
 0x70b   :  { %v3502_v3 = vpop.eup %3501  ;;  %v2397_v58 = vadd.f32 1.0, %v3500_v40 }
 0x70c   :  { %v3504_v36 = vpop.eup %3503 }
 0x70d   :  { %v3506_v62 = vpop.eup %3505  ;;  %v2400_v45 = vadd.f32 1.0, %v3504_v36 }
 0x70e   :  { %v3508_v49 = vpop.eup %3507 }
 0x727   :  { %v2353_v44 = vpop.f32.mrf.mxu0 }
 0x728   :  { %v2418_v33 = vadd.f32 %v2353_v44, %v4698_v32 }
 0x729   :  { %v2355_v43 = vpop.f32.mrf.mxu0 }
 0x72a   :  { %v2422_v0 = vmul.f32 %v3498_v13, %v2418_v33  ;;  %v2419_v9 = vadd.f32 %v2355_v43, %v4702_v30  ;;  %v3510_v13 = vpop.eup %3509  ;;  %v6701_v43 = vld [vmem:[#allocation77_spill] sm:$0xff] }
 0x72b   :  { %v2357_v54 = vpop.f32.mrf.mxu0 }
 0x72c   :  { %v2426_v26 = vadd.f32 %v2422_v0, %v6699_v1  ;;  %v2423_v21 = vmul.f32 %v3502_v3, %v2419_v9  ;;  %v2420_v22 = vadd.f32 %v2357_v54, %v4698_v32  ;;  %v2401_v9 = vadd.f32 1.0, %v3508_v49  ;;  %v6702_v3 = vld [vmem:[#allocation79_spill] sm:$0xff] }
 0x72d   :  { %v2359_v47 = vpop.f32.mrf.mxu0 }
 0x72e   :  { %3511 = vtanh.f32 %v2426_v26  ;;  %v2427_v7 = vadd.f32 %v2423_v21, %v6700_v46  ;;  %v2424_v44 = vmul.f32 %v3506_v62, %v2420_v22  ;;  %v2421_v33 = vadd.f32 %v2359_v47, %v4702_v30 }
 0x72f   :  { %3513 = vrcp.f32 %v2396_v23 }
 0x730   :  { %3515 = vtanh.f32 %v2427_v7  ;;  %v2428_v24 = vadd.f32 %v2424_v44, %v6701_v43  ;;  %v2425_v0 = vmul.f32 %v3510_v13, %v2421_v33 }
 0x731   :  { %3517 = vrcp.f32 %v2397_v58 }
 0x732   :  { %3519 = vtanh.f32 %v2428_v24  ;;  %v2429_v40 = vadd.f32 %v2425_v0, %v6702_v3  ;;  %v6721_v3 = vld [vmem:[#allocation122_spill] sm:$0xff] }
 0x733   :  { %3521 = vrcp.f32 %v2400_v45 }
 0x734   :  { %3523 = vtanh.f32 %v2429_v40  ;;  %v6722_v40 = vld [vmem:[#allocation51_spill] sm:$0xff] }
 0x735   :  { %3525 = vrcp.f32 %v2401_v9  ;;  %v6720_v9 = vld [vmem:[#allocation121_spill] sm:$0xff] }
 0x73b   :  { %v3512_v54 = vpop.eup %3511 }
 0x73c   :  { %v3514_v1 = vpop.eup %3513  ;;  %v2434_v26 = vsub.f32 %v5613_v5, %v3512_v54 }
 0x73d   :  { %v3516_v21 = vpop.eup %3515 }
 0x73e   :  { %v3518_v22 = vpop.eup %3517  ;;  %v2435_v23 = vsub.f32 %v5616_v41, %v3516_v21  ;;  %v2438_v36 = vmul.f32 %v3514_v1, %v2434_v26  ;;  %v6724_v1 = vld [vmem:[#allocation123_spill] sm:$0xff]  ;;  %v6725_v26 = vld [vmem:[#allocation124_spill] sm:$0xff] }
 0x73f   :  { %v3520_v62 = vpop.eup %3519 }
 0x740   :  { %v3522_v47 = vpop.eup %3521  ;;  %v2439_v46 = vmul.f32 %v3518_v22, %v2435_v23  ;;  %v2436_v58 = vsub.f32 %v5618_v15, %v3520_v62  ;;  %v5818_v24 = vadd.f32 %v3512_v54, %v2438_v36  ;;  %v6723_v54 = vld [vmem:[#allocation53_spill] sm:$0xff] }
 0x741   :  { %v3524_v49 = vpop.eup %3523  ;;  %v6727_v22 = vld [vmem:[#allocation17_spill] sm:$0xff] }
 0x742   :  { %v2437_v7 = vsub.f32 %v5620_v28, %v3524_v49  ;;  %v5821_v44 = vadd.f32 %v3516_v21, %v2439_v46  ;;  %v2440_v33 = vmul.f32 %v3522_v47, %v2436_v58  ;;  %v3526_v13 = vpop.eup %3525  ;;  %v6726_v21 = vld [vmem:[#allocation55_spill] sm:$0xff]  ;;  %v6728_v23 = vld [vmem:[#allocation125_spill] sm:$0xff]  ;;  %v6732_v46 = vld [vmem:[#allocation18_spill] sm:$0xff] }
 0x743   :  { %v6729_v36 = vld [vmem:[#allocation25_spill] sm:$0xff] }
 0x744   :  { %v2441_v5 = vmul.f32 %v3526_v13, %v2437_v7  ;;  %v5823_v45 = vadd.f32 %v3520_v62, %v2440_v33  ;;  %v6730_v62 = vld [vmem:[#allocation27_spill] sm:$0xff]  ;;  %v6731_v47 = vld [vmem:[#allocation13_spill] sm:$0xff]  ;;  %v6735_v7 = vld [vmem:[#allocation14_spill] sm:$0xff] }
 0x745   :  { %v6733_v58 = vld [vmem:[#allocation29_spill] sm:$0xff]  ;;  %v6736_v33 = vld [vmem:[#allocation96_spill] sm:$0xff] }
 0x746   :  { %v5825_v43 = vadd.f32 %v3524_v49, %v2441_v5  ;;  %v2447_v41 = vadd.f32 %v5823_v45, %v5821_v44  ;;  %v5838_v28 = vpack.c.bf16 %v5823_v45, %v5818_v24  ;;  %v6734_v49 = vld [vmem:[#allocation7_spill] sm:$0xff]  ;;  %v6737_v13 = vld [vmem:[#allocation40_spill] sm:$0xff]  ;;  %v6738_v5 = vld [vmem:[#allocation42_spill] sm:$0xff] }
 0x748   :  { %v2452_v15 = vpack.c.bf16 %v5825_v43, %v5821_v44  ;;  %v2446_v0 = vsub.f32 %v5818_v24, %v5825_v43  ;;  %3099 = vst [vmem:[%s6058_s6 + $0x58] sm:$0xff] %v2447_v41  ;;  %v6739_v41 = vld [vmem:[#allocation97_spill] sm:$0xff] }
 0x74a   :  { %2485 = vmatprep.mubr.bf16.mxu1 %v2452_v15  ;;  %2528 = vmatprep.mubr.bf16.mxu0 %v2452_v15  ;;  %3098 = vst [vmem:[%s6058_s6 + $0x50] sm:$0xff] %v2446_v0  ;;  %v6741_v0 = vld [vmem:[#allocation44_spill] sm:$0xff] }
 0x74b   :  { %2486 = vmatmul.mubr.bf16.vlgmr.msra.gmra.mxu1 %v5838_v28  ;;  %2529 = vmatmul.mubr.bf16.vlgmr.msra.gmra.mxu0 %v5838_v28 }
 0x74c   :  { %2540 = vmatpush1.bf16.msra.mxu1 %v5640_v34  ;;  %2571 = vmatprep.mubr.bf16.mxu1 %v2452_v15  ;;  %v6740_v15 = vld [vmem:[#allocation98_spill] sm:$0xff] }
 0x74d   :  { %2541 = vmatprep.subr.bf16.mxu1 %v5643_v39  ;;  %2674 = vmatpush1.bf16.msra.mxu0 %v5369_v17  ;;  %v6703_v17 = vld [vmem:[#allocation31_spill] sm:$0xff] }
 0x74e   :  { %2675 = vmatprep.subr.bf16.mxu0 %v5372_v19  ;;  %v6704_v19 = vld [vmem:[#allocation113_spill] sm:$0xff] }
 0x750   :  { %2542 = vmatpush1.bf16.msra.mxu1 %v5648_v53 }
 0x751   :  { %2543 = vmatprep.subr.bf16.mxu1 %v5651_v2  ;;  %2676 = vmatpush1.bf16.msra.mxu0 %v5377_v25  ;;  %v6705_v25 = vld [vmem:[#allocation114_spill] sm:$0xff] }
 0x752   :  { %2677 = vmatprep.subr.bf16.mxu0 %v5380_v20  ;;  %v6706_v20 = vld [vmem:[#allocation9_spill] sm:$0xff] }
 0x754   :  { %2544 = vmatpush1.bf16.msra.mxu1 %v5656_v60 }
 0x755   :  { %2545 = vmatprep.subr.bf16.mxu1 %v5659_v50  ;;  %2678 = vmatpush1.bf16.msra.mxu0 %v5385_v61  ;;  %v6707_v61 = vld [vmem:[#allocation33_spill] sm:$0xff] }
 0x756   :  { %2679 = vmatprep.subr.bf16.mxu0 %v5388_v27  ;;  %v6708_v27 = vld [vmem:[#allocation115_spill] sm:$0xff] }
 0x758   :  { %2546 = vmatpush1.bf16.msra.mxu1 %v5664_v59 }
 0x759   :  { %2547 = vmatprep.subr.bf16.mxu1 %v5667_v8  ;;  %2680 = vmatpush1.bf16.msra.mxu0 %v5393_v52  ;;  %v6709_v52 = vld [vmem:[#allocation116_spill] sm:$0xff] }
 0x75a   :  { %2681 = vmatprep.subr.bf16.mxu0 %v5396_v16  ;;  %v6710_v16 = vld [vmem:[#allocation11_spill] sm:$0xff] }
 0x75c   :  { %2548 = vmatpush1.bf16.msra.mxu1 %v5672_v4 }
 0x75d   :  { %2549 = vmatprep.subr.bf16.mxu1 %v5675_v35  ;;  %2682 = vmatpush1.bf16.msra.mxu0 %v5401_v10  ;;  %v6711_v10 = vld [vmem:[#allocation48_spill] sm:$0xff] }
 0x75e   :  { %2683 = vmatprep.subr.bf16.mxu0 %v5404_v6  ;;  %v6712_v6 = vld [vmem:[#allocation117_spill] sm:$0xff] }
 0x760   :  { %2550 = vmatpush1.bf16.msra.mxu1 %v5680_v11 }
 0x761   :  { %2551 = vmatprep.subr.bf16.mxu1 %v5683_v42  ;;  %2684 = vmatpush1.bf16.msra.mxu0 %v5409_v56  ;;  %v6713_v56 = vld [vmem:[#allocation118_spill] sm:$0xff] }
 0x762   :  { %2685 = vmatprep.subr.bf16.mxu0 %v5412_v48  ;;  %v6714_v48 = vld [vmem:[#allocation50_spill] sm:$0xff] }
 0x764   :  { %2552 = vmatpush1.bf16.msra.mxu1 %v5688_v31 }
 0x765   :  { %2553 = vmatprep.subr.bf16.mxu1 %v5691_v18  ;;  %2686 = vmatpush1.bf16.msra.mxu0 %v5417_v12  ;;  %v6715_v12 = vld [vmem:[#allocation52_spill] sm:$0xff] }
 0x766   :  { %2687 = vmatprep.subr.bf16.mxu0 %v5420_v63  ;;  %v6716_v63 = vld [vmem:[#allocation119_spill] sm:$0xff] }
 0x768   :  { %2554 = vmatpush1.bf16.msra.mxu1 %v5696_v14 }
 0x769   :  { %2555 = vmatprep.subr.bf16.mxu1 %v5699_v57  ;;  %2688 = vmatpush1.bf16.msra.mxu0 %v5425_v51  ;;  %v6717_v51 = vld [vmem:[#allocation120_spill] sm:$0xff] }
 0x76a   :  { %2689 = vmatprep.subr.bf16.mxu0 %v5428_v55  ;;  %v6718_v55 = vld [vmem:[#allocation54_spill] sm:$0xff] }
 0x76c   :  { %2556 = vmatpush2.bf16.msra.mxu1 %v5704_v29 }
 0x76d   :  { %2557 = vmatprep.subr.bf16.mxu1 %v5707_v37  ;;  %2690 = vmatpush2.bf16.msra.mxu0 %v5433_v38  ;;  %v6719_v38 = vld [vmem:[#allocation49_spill] sm:$0xff] }
 0x76e   :  { %2691 = vmatprep.subr.bf16.mxu0 %v6703_v17  ;;  %v6743_v17 = vld [vmem:[#allocation99_spill] sm:$0xff] }
 0x770   :  { %2558 = vmatpush2.bf16.msra.mxu1 %v6704_v19 }
 0x771   :  { %2559 = vmatprep.subr.bf16.mxu1 %v6705_v25  ;;  %2692 = vmatpush2.bf16.msra.mxu0 %v6706_v20  ;;  %v6744_v20 = vld [vmem:[#allocation100_spill] sm:$0xff] }
 0x772   :  { %2693 = vmatprep.subr.bf16.mxu0 %v6707_v61  ;;  %v6745_v61 = vld [vmem:[#allocation41_spill] sm:$0xff] }
 0x774   :  { %2560 = vmatpush2.bf16.msra.mxu1 %v6708_v27 }
 0x775   :  { %2561 = vmatprep.subr.bf16.mxu1 %v6709_v52  ;;  %2694 = vmatpush2.bf16.msra.mxu0 %v6710_v16  ;;  %v6746_v16 = vld [vmem:[#allocation43_spill] sm:$0xff] }
 0x776   :  { %2695 = vmatprep.subr.bf16.mxu0 %v6711_v10  ;;  %v6747_v10 = vld [vmem:[#allocation101_spill] sm:$0xff] }
 0x778   :  { %2562 = vmatpush2.bf16.msra.mxu1 %v6712_v6 }
 0x779   :  { %2563 = vmatprep.subr.bf16.mxu1 %v6713_v56  ;;  %2696 = vmatpush2.bf16.msra.mxu0 %v6714_v48  ;;  %v6748_v48 = vld [vmem:[#allocation102_spill] sm:$0xff] }
 0x77a   :  { %2697 = vmatprep.subr.bf16.mxu0 %v6715_v12  ;;  %v6749_v12 = vld [vmem:[#allocation45_spill] sm:$0xff] }
 0x77c   :  { %2564 = vmatpush2.bf16.msra.mxu1 %v6716_v63 }
 0x77d   :  { %2565 = vmatprep.subr.bf16.mxu1 %v6717_v51  ;;  %2698 = vmatpush2.bf16.msra.mxu0 %v6718_v55  ;;  %v6750_v55 = vld [vmem:[#allocation47_spill] sm:$0xff] }
 0x77e   :  { %2699 = vmatprep.subr.bf16.mxu0 %v6719_v38  ;;  %v6751_v38 = vld [vmem:[#allocation19_spill] sm:$0xff] }
 0x780   :  { %2566 = vmatpush2.bf16.msra.mxu1 %v6720_v9 }
 0x781   :  { %2567 = vmatprep.subr.bf16.mxu1 %v6721_v3  ;;  %2700 = vmatpush2.bf16.msra.mxu0 %v6722_v40  ;;  %v6752_v40 = vld [vmem:[#allocation103_spill] sm:$0xff] }
 0x782   :  { %2701 = vmatprep.subr.bf16.mxu0 %v6723_v54  ;;  %v6753_v54 = vld [vmem:[#allocation138_spill] sm:$0xff] }
 0x784   :  { %2568 = vmatpush2.bf16.msra.mxu1 %v6724_v1 }
 0x785   :  { %2569 = vmatprep.subr.bf16.mxu1 %v6725_v26  ;;  %2702 = vmatpush2.bf16.msra.mxu0 %v6726_v21  ;;  %v6754_v21 = vld [vmem:[#allocation20_spill] sm:$0xff] }
 0x786   :  { %2703 = vmatprep.subr.bf16.mxu0 %v6727_v22  ;;  %v6755_v22 = vld [vmem:[#allocation104_spill] sm:$0xff] }
 0x788   :  { %2570 = vmatpush2.bf16.msra.mxu1 %v6728_v23 }
 0x789   :  { %2716 = vmatprep.subr.bf16.mxu1 %v6729_v36  ;;  %2704 = vmatpush2.bf16.msra.mxu0 %v6730_v62  ;;  %v6756_v36 = vld [vmem:[#allocation105_spill] sm:$0xff]  ;;  %v6757_v62 = vld [vmem:[#allocation106_spill] sm:$0xff] }
 0x78a   :  { %2759 = vmatprep.subr.bf16.mxu0 %v6731_v47  ;;  %v6758_v47 = vld [vmem:[#allocation107_spill] sm:$0xff] }
 0x78b   :  { %2572 = vmatmul.mubr.bf16.vlgmr.msra.gmra.mxu1 %v5838_v28  ;;  %v6742_v28 = vld [vmem:[#allocation46_spill] sm:$0xff] }
 0x78c   :  { %2717 = vmatpush1.bf16.msra.mxu1 %v6732_v46  ;;  %v6759_v46 = vld [vmem:[#allocation108_spill] sm:$0xff] }
 0x78d   :  { %2718 = vmatprep.subr.bf16.mxu1 %v6733_v58  ;;  %v6760_v58 = vld [vmem:[#allocation109_spill] sm:$0xff] }
 0x790   :  { %2719 = vmatpush1.bf16.msra.mxu1 %v6734_v49  ;;  %v6761_v49 = vld [vmem:[#allocation110_spill] sm:$0xff] }
 0x791   :  { %2720 = vmatprep.subr.bf16.mxu1 %v6735_v7  ;;  %v6762_v7 = vld [vmem:[#allocation111_spill] sm:$0xff] }
 0x794   :  { %2721 = vmatpush1.bf16.msra.mxu1 %v6736_v33 }
 0x795   :  { %2722 = vmatprep.subr.bf16.mxu1 %v6737_v13 }
 0x798   :  { %2723 = vmatpush1.bf16.msra.mxu1 %v6738_v5 }
 0x799   :  { %2724 = vmatprep.subr.bf16.mxu1 %v6739_v41  ;;  %v6763_v41 = vld [vmem:[#allocation32_spill] sm:$0xff] }
 0x79c   :  { %2725 = vmatpush1.bf16.msra.mxu1 %v6740_v15 }
 0x79d   :  { %2726 = vmatprep.subr.bf16.mxu1 %v6741_v0  ;;  %v6764_v0 = vld [vmem:[#allocation10_spill] sm:$0xff] }
 0x7a0   :  { %2727 = vmatpush1.bf16.msra.mxu1 %v6742_v28 }
 0x7a1   :  { %2728 = vmatprep.subr.bf16.mxu1 %v6743_v17 }
 0x7a4   :  { %2729 = vmatpush1.bf16.msra.mxu1 %v6744_v20 }
 0x7a5   :  { %2730 = vmatprep.subr.bf16.mxu1 %v6745_v61  ;;  %v6765_v61 = vld [vmem:[#allocation34_spill] sm:$0xff] }
 0x7a8   :  { %2731 = vmatpush1.bf16.msra.mxu1 %v6746_v16 }
 0x7a9   :  { %2732 = vmatprep.subr.bf16.mxu1 %v6747_v10 }
 0x7ac   :  { %2733 = vmatpush2.bf16.msra.mxu1 %v6748_v48  ;;  %v6766_v48 = vld [vmem:[#allocation12_spill] sm:$0xff] }
 0x7ad   :  { %2734 = vmatprep.subr.bf16.mxu1 %v6749_v12 }
 0x7b0   :  { %2735 = vmatpush2.bf16.msra.mxu1 %v6750_v55 }
 0x7b1   :  { %2736 = vmatprep.subr.bf16.mxu1 %v6751_v38 }
 0x7b4   :  { %2737 = vmatpush2.bf16.msra.mxu1 %v6752_v40 }
 0x7b5   :  { %2738 = vmatprep.subr.bf16.mxu1 %v6753_v54 }
 0x7b8   :  { %2739 = vmatpush2.bf16.msra.mxu1 %v6754_v21 }
 0x7b9   :  { %2740 = vmatprep.subr.bf16.mxu1 %v6755_v22  ;;  %v6767_v22 = vld [vmem:[#allocation80_spill] sm:$0xff] }
 0x7bc   :  { %2741 = vmatpush2.bf16.msra.mxu1 %v6756_v36 }
 0x7bd   :  { %2742 = vmatprep.subr.bf16.mxu1 %v6757_v62 }
 0x7c0   :  { %2743 = vmatpush2.bf16.msra.mxu1 %v6758_v47  ;;  %v6768_v47 = vld [vmem:[#allocation82_spill] sm:$0xff] }
 0x7c1   :  { %2744 = vmatprep.subr.bf16.mxu1 %v6759_v46 }
 0x7c4   :  { %2745 = vmatpush2.bf16.msra.mxu1 %v6760_v58 }
 0x7c5   :  { %2746 = vmatprep.subr.bf16.mxu1 %v6761_v49 }
 0x7c8   :  { %2747 = vmatpush2.bf16.msra.mxu1 %v6762_v7 }
 0x80b   :  { %v2487_v33 = vpop.f32.mrf.mxu1  ;;  %v2530_v38 = vpop.f32.mrf.mxu0 }
 0x80c   :  { %v2582_v15 = vadd.f32 %v2487_v33, %v6763_v41  ;;  %v2584_v36 = vadd.f32 %v2530_v38, %v6767_v22  ;;  %v6769_v33 = vld [vmem:[#allocation84_spill] sm:$0xff] }
 0x80d   :  { %v2489_v13 = vpop.f32.mrf.mxu1  ;;  %v2532_v54 = vpop.f32.mrf.mxu0 }
 0x80e   :  { %v2583_v28 = vadd.f32 %v2489_v13, %v6764_v0  ;;  %v3100_v20 = vmul.f32 -1.442695, %v2582_v15  ;;  %v2585_v46 = vadd.f32 %v2532_v54, %v6768_v47  ;;  %v3102_v7 = vmul.f32 -1.442695, %v2584_v36  ;;  %v6770_v0 = vld [vmem:[#allocation86_spill] sm:$0xff] }
 0x80f   :  { %v2491_v5 = vpop.f32.mrf.mxu1  ;;  %v2534_v21 = vpop.f32.mrf.mxu0 }
 0x810   :  { %v2586_v16 = vadd.f32 %v2491_v5, %v6765_v61  ;;  %v3101_v10 = vmul.f32 -1.442695, %v2583_v28  ;;  %3527 = vpow2.f32 %v3100_v20  ;;  %v2588_v13 = vadd.f32 %v2534_v21, %v6769_v33 }
 0x811   :  { %v2493_v17 = vpop.f32.mrf.mxu1  ;;  %v2536_v58 = vpop.f32.mrf.mxu0  ;;  %v3103_v15 = vmul.f32 -1.442695, %v2585_v46 }
 0x812   :  { %v2587_v12 = vadd.f32 %v2493_v17, %v6766_v48  ;;  %v3104_v55 = vmul.f32 -1.442695, %v2586_v16  ;;  %3529 = vpow2.f32 %v3101_v10  ;;  %v2589_v28 = vadd.f32 %v2536_v58, %v6770_v0 }
 0x813   :  { %v3106_v61 = vmul.f32 -1.442695, %v2588_v13 }
 0x814   :  { %v3105_v40 = vmul.f32 -1.442695, %v2587_v12  ;;  %3531 = vpow2.f32 %v3104_v55  ;;  %v3107_v10 = vmul.f32 -1.442695, %v2589_v28  ;;  %v6772_v28 = vld [vmem:[#allocation83_spill] sm:$0xff] }
 0x816   :  { %3533 = vpow2.f32 %v3105_v40 }
 0x817   :  { %3535 = vpow2.f32 %v3102_v7 }
 0x81d   :  { %v3528_v62 = vpop.eup %3527 }
 0x81e   :  { %v2614_v5 = vadd.f32 1.0, %v3528_v62 }
 0x81f   :  { %v3530_v49 = vpop.eup %3529 }
 0x820   :  { %v2615_v17 = vadd.f32 1.0, %v3530_v49  ;;  %3537 = vrcp.f32 %v2614_v5  ;;  %v6771_v49 = vld [vmem:[#allocation81_spill] sm:$0xff] }
 0x821   :  { %v3532_v41 = vpop.eup %3531  ;;  %3539 = vpow2.f32 %v3103_v15 }
 0x822   :  { %v2618_v16 = vadd.f32 1.0, %v3532_v41  ;;  %3541 = vrcp.f32 %v2615_v17 }
 0x823   :  { %v3534_v20 = vpop.eup %3533  ;;  %3543 = vpow2.f32 %v3106_v61 }
 0x824   :  { %v2619_v48 = vadd.f32 1.0, %v3534_v20  ;;  %3545 = vrcp.f32 %v2618_v16  ;;  %v3536_v55 = vpop.eup %3535 }
 0x825   :  { %3547 = vpow2.f32 %v3107_v10  ;;  %v2616_v47 = vadd.f32 1.0, %v3536_v55 }
 0x826   :  { %3549 = vrcp.f32 %v2619_v48  ;;  %v6773_v48 = vld [vmem:[#allocation85_spill] sm:$0xff] }
 0x82d   :  { %v3538_v40 = vpop.eup %3537 }
 0x82e   :  { %v3540_v21 = vpop.eup %3539 }
 0x82f   :  { %v3542_v62 = vpop.eup %3541  ;;  %v2617_v41 = vadd.f32 1.0, %v3540_v21 }
 0x830   :  { %v3544_v58 = vpop.eup %3543 }
 0x831   :  { %v3546_v5 = vpop.eup %3545  ;;  %v2620_v10 = vadd.f32 1.0, %v3544_v58 }
 0x832   :  { %v3548_v0 = vpop.eup %3547 }
 0x833   :  { %v3550_v16 = vpop.eup %3549 }
 0x84b   :  { %v2573_v12 = vpop.f32.mrf.mxu1 }
 0x84c   :  { %v2638_v38 = vadd.f32 %v2573_v12, %v4698_v32 }
 0x84d   :  { %v2575_v54 = vpop.f32.mrf.mxu1 }
 0x84e   :  { %v2642_v22 = vmul.f32 %v3538_v40, %v2638_v38  ;;  %v2639_v36 = vadd.f32 %v2575_v54, %v4702_v30  ;;  %v2621_v38 = vadd.f32 1.0, %v3548_v0  ;;  %v6774_v40 = vld [vmem:[#allocation87_spill] sm:$0xff] }
 0x84f   :  { %v2577_v46 = vpop.f32.mrf.mxu1 }
 0x850   :  { %v2646_v7 = vadd.f32 %v2642_v22, %v6771_v49  ;;  %v2643_v33 = vmul.f32 %v3542_v62, %v2639_v36  ;;  %v2640_v13 = vadd.f32 %v2577_v46, %v4698_v32 }
 0x851   :  { %v2579_v15 = vpop.f32.mrf.mxu1 }
 0x852   :  { %3551 = vtanh.f32 %v2646_v7  ;;  %v2647_v17 = vadd.f32 %v2643_v33, %v6772_v28  ;;  %v2644_v20 = vmul.f32 %v3546_v5, %v2640_v13  ;;  %v2641_v61 = vadd.f32 %v2579_v15, %v4702_v30 }
 0x853   :  { %3553 = vrcp.f32 %v2616_v47 }
 0x854   :  { %3555 = vtanh.f32 %v2647_v17  ;;  %v2648_v12 = vadd.f32 %v2644_v20, %v6773_v48  ;;  %v2645_v55 = vmul.f32 %v3550_v16, %v2641_v61  ;;  %v6782_v48 = vld [vmem:[#allocation94_spill] sm:$0xff] }
 0x855   :  { %3557 = vrcp.f32 %v2617_v41 }
 0x856   :  { %3559 = vtanh.f32 %v2648_v12  ;;  %v2649_v54 = vadd.f32 %v2645_v55, %v6774_v40 }
 0x857   :  { %3561 = vrcp.f32 %v2620_v10 }
 0x858   :  { %3563 = vtanh.f32 %v2649_v54 }
 0x859   :  { %3565 = vrcp.f32 %v2621_v38 }
 0x85f   :  { %v3552_v21 = vpop.eup %3551 }
 0x860   :  { %v3554_v22 = vpop.eup %3553  ;;  %v2654_v36 = vsub.f32 %v5818_v24, %v3552_v21 }
 0x861   :  { %v3556_v62 = vpop.eup %3555 }
 0x862   :  { %v3558_v46 = vpop.eup %3557  ;;  %v2655_v47 = vsub.f32 %v5821_v44, %v3556_v62  ;;  %v2658_v58 = vmul.f32 %v3554_v22, %v2654_v36 }
 0x863   :  { %v3560_v49 = vpop.eup %3559 }
 0x864   :  { %v3562_v7 = vpop.eup %3561  ;;  %v2659_v33 = vmul.f32 %v3558_v46, %v2655_v47  ;;  %v2656_v13 = vsub.f32 %v5823_v45, %v3560_v49  ;;  %v5960_v5 = vadd.f32 %v3552_v21, %v2658_v58 }
 0x865   :  { %v3564_v41 = vpop.eup %3563 }
 0x866   :  { %v2657_v15 = vsub.f32 %v5825_v43, %v3564_v41  ;;  %v5963_v0 = vadd.f32 %v3556_v62, %v2659_v33  ;;  %v2660_v28 = vmul.f32 %v3562_v7, %v2656_v13  ;;  %v3566_v17 = vpop.eup %3565 }
 0x868   :  { %v2661_v24 = vmul.f32 %v3566_v17, %v2657_v15  ;;  %v5965_v20 = vadd.f32 %v3560_v49, %v2660_v28  ;;  %v6783_v17 = vld [vmem:[#allocation89_spill] sm:$0xff] }
 0x86a   :  { %v5967_v61 = vadd.f32 %v3564_v41, %v2661_v24  ;;  %v2667_v44 = vadd.f32 %v5965_v20, %v5963_v0  ;;  %v2671_v43 = vpack.c.bf16 %v5965_v20, %v5960_v5 }
 0x86c   :  { %v2672_v45 = vpack.c.bf16 %v5967_v61, %v5963_v0  ;;  %v2666_v16 = vsub.f32 %v5960_v5, %v5967_v61  ;;  %3109 = vst [vmem:[%s6058_s6 + $0x68] sm:$0xff] %v2667_v44 }
 0x86e   :  { %2705 = vmatprep.mubr.bf16.mxu0 %v2672_v45  ;;  %2748 = vmatprep.mubr.bf16.mxu1 %v2672_v45  ;;  %3108 = vst [vmem:[%s6058_s6 + $0x60] sm:$0xff] %v2666_v16 }
 0x86f   :  { %2706 = vmatmul.mubr.bf16.vlgmr.msra.gmra.mxu0 %v2671_v43  ;;  %2749 = vmatmul.mubr.bf16.vlgmr.msra.gmra.mxu1 %v2671_v43 }
 0x870   :  { %2760 = vmatpush1.bf16.msra.mxu0 %v5640_v34  ;;  %2791 = vmatprep.mubr.bf16.mxu0 %v2672_v45 }
 0x871   :  { %2761 = vmatprep.subr.bf16.mxu0 %v5643_v39 }
 0x874   :  { %2762 = vmatpush1.bf16.msra.mxu0 %v5648_v53 }
 0x875   :  { %2763 = vmatprep.subr.bf16.mxu0 %v5651_v2  ;;  %v6775_v2 = vld [vmem:[#allocation36_spill] sm:$0xff] }
 0x878   :  { %2764 = vmatpush1.bf16.msra.mxu0 %v5656_v60 }
 0x879   :  { %2765 = vmatprep.subr.bf16.mxu0 %v5659_v50  ;;  %v6776_v50 = vld [vmem:[#allocation37_spill] sm:$0xff] }
 0x87c   :  { %2766 = vmatpush1.bf16.msra.mxu0 %v5664_v59 }
 0x87d   :  { %2767 = vmatprep.subr.bf16.mxu0 %v5667_v8 }
 0x880   :  { %2768 = vmatpush1.bf16.msra.mxu0 %v5672_v4 }
 0x881   :  { %2769 = vmatprep.subr.bf16.mxu0 %v5675_v35  ;;  %v6777_v35 = vld [vmem:[#allocation39_spill] sm:$0xff] }
 0x884   :  { %2770 = vmatpush1.bf16.msra.mxu0 %v5680_v11 }
 0x885   :  { %2771 = vmatprep.subr.bf16.mxu0 %v5683_v42 }
 0x888   :  { %2772 = vmatpush1.bf16.msra.mxu0 %v5688_v31  ;;  %v6778_v31 = vld [vmem:[#allocation6_spill] sm:$0xff] }
 0x889   :  { %2773 = vmatprep.subr.bf16.mxu0 %v5691_v18 }
 0x88c   :  { %2774 = vmatpush1.bf16.msra.mxu0 %v5696_v14 }
 0x88d   :  { %2775 = vmatprep.subr.bf16.mxu0 %v5699_v57 }
 0x890   :  { %2776 = vmatpush2.bf16.msra.mxu0 %v5704_v29 }
 0x891   :  { %2777 = vmatprep.subr.bf16.mxu0 %v5707_v37 }
 0x894   :  { %2778 = vmatpush2.bf16.msra.mxu0 %v6704_v19 }
 0x895   :  { %2779 = vmatprep.subr.bf16.mxu0 %v6705_v25  ;;  %v6779_v25 = vld [vmem:[#allocation88_spill] sm:$0xff] }
 0x898   :  { %2780 = vmatpush2.bf16.msra.mxu0 %v6708_v27 }
 0x899   :  { %2781 = vmatprep.subr.bf16.mxu0 %v6709_v52 }
 0x89c   :  { %2782 = vmatpush2.bf16.msra.mxu0 %v6712_v6  ;;  %v6780_v6 = vld [vmem:[#allocation90_spill] sm:$0xff] }
 0x89d   :  { %2783 = vmatprep.subr.bf16.mxu0 %v6713_v56 }
 0x8a0   :  { %2784 = vmatpush2.bf16.msra.mxu0 %v6716_v63 }
 0x8a1   :  { %2785 = vmatprep.subr.bf16.mxu0 %v6717_v51 }
 0x8a4   :  { %2786 = vmatpush2.bf16.msra.mxu0 %v6720_v9 }
 0x8a5   :  { %2787 = vmatprep.subr.bf16.mxu0 %v6721_v3  ;;  %v6781_v3 = vld [vmem:[#allocation92_spill] sm:$0xff] }
 0x8a8   :  { %2788 = vmatpush2.bf16.msra.mxu0 %v6724_v1 }
 0x8a9   :  { %2789 = vmatprep.subr.bf16.mxu0 %v6725_v26 }
 0x8ac   :  { %2790 = vmatpush2.bf16.msra.mxu0 %v6728_v23 }
 0x8af   :  { %2792 = vmatmul.mubr.bf16.vlgmr.msra.gmra.mxu0 %v2671_v43 }
 0x92f   :  { %v2707_v34 = vpop.f32.mrf.mxu0  ;;  %v2750_v57 = vpop.f32.mrf.mxu1 }
 0x930   :  { %v2802_v60 = vadd.f32 %v2707_v34, %v6775_v2  ;;  %v2804_v27 = vadd.f32 %v2750_v57, %v6779_v25 }
 0x931   :  { %v2709_v39 = vpop.f32.mrf.mxu0  ;;  %v2752_v37 = vpop.f32.mrf.mxu1 }
 0x932   :  { %v2803_v59 = vadd.f32 %v2709_v39, %v6776_v50  ;;  %v3110_v4 = vmul.f32 -1.442695, %v2802_v60  ;;  %v2805_v56 = vadd.f32 %v2752_v37, %v6780_v6  ;;  %v3112_v9 = vmul.f32 -1.442695, %v2804_v27 }
 0x933   :  { %v2711_v53 = vpop.f32.mrf.mxu0  ;;  %v2754_v19 = vpop.f32.mrf.mxu1 }
 0x934   :  { %v2806_v11 = vadd.f32 %v2711_v53, %v6777_v35  ;;  %v3111_v42 = vmul.f32 -1.442695, %v2803_v59  ;;  %3567 = vpow2.f32 %v3110_v4  ;;  %v2808_v1 = vadd.f32 %v2754_v19, %v6781_v3  ;;  %v6784_v53 = vld [vmem:[#allocation91_spill] sm:$0xff]  ;;  %v6785_v4 = vld [vmem:[#allocation93_spill] sm:$0xff] }
 0x935   :  { %v2713_v8 = vpop.f32.mrf.mxu0  ;;  %v2756_v63 = vpop.f32.mrf.mxu1  ;;  %v3113_v10 = vmul.f32 -1.442695, %v2805_v56 }
 0x936   :  { %v2807_v18 = vadd.f32 %v2713_v8, %v6778_v31  ;;  %v3114_v14 = vmul.f32 -1.442695, %v2806_v11  ;;  %3569 = vpow2.f32 %v3111_v42  ;;  %v2809_v12 = vadd.f32 %v2756_v63, %v6782_v48 }
 0x937   :  { %v3116_v40 = vmul.f32 -1.442695, %v2808_v1 }
 0x938   :  { %v3115_v29 = vmul.f32 -1.442695, %v2807_v18  ;;  %3571 = vpow2.f32 %v3114_v14  ;;  %v3117_v21 = vmul.f32 -1.442695, %v2809_v12 }
 0x93a   :  { %3573 = vpow2.f32 %v3115_v29 }
 0x93b   :  { %3575 = vpow2.f32 %v3112_v9 }
 0x941   :  { %v3568_v52 = vpop.eup %3567 }
 0x942   :  { %v2834_v26 = vadd.f32 1.0, %v3568_v52 }
 0x943   :  { %v3570_v51 = vpop.eup %3569 }
 0x944   :  { %v2835_v55 = vadd.f32 1.0, %v3570_v51  ;;  %3577 = vrcp.f32 %v2834_v26 }
 0x945   :  { %v3572_v23 = vpop.eup %3571  ;;  %3579 = vpow2.f32 %v3113_v10 }
 0x946   :  { %v2838_v54 = vadd.f32 1.0, %v3572_v23  ;;  %3581 = vrcp.f32 %v2835_v55 }
 0x947   :  { %v3574_v38 = vpop.eup %3573  ;;  %3583 = vpow2.f32 %v3116_v40 }
 0x948   :  { %v2839_v22 = vadd.f32 1.0, %v3574_v38  ;;  %3585 = vrcp.f32 %v2838_v54  ;;  %v3576_v62 = vpop.eup %3575 }
 0x949   :  { %3587 = vpow2.f32 %v3117_v21  ;;  %v2836_v41 = vadd.f32 1.0, %v3576_v62 }
 0x94a   :  { %3589 = vrcp.f32 %v2839_v22 }
 0x951   :  { %v3578_v47 = vpop.eup %3577 }
 0x952   :  { %v3580_v49 = vpop.eup %3579 }
 0x953   :  { %v3582_v13 = vpop.eup %3581  ;;  %v2837_v43 = vadd.f32 1.0, %v3580_v49 }
 0x954   :  { %v3584_v28 = vpop.eup %3583 }
 0x955   :  { %v3586_v16 = vpop.eup %3585  ;;  %v2840_v8 = vadd.f32 1.0, %v3584_v28 }
 0x956   :  { %v3588_v39 = vpop.eup %3587 }
 0x957   :  { %v3590_v59 = vpop.eup %3589  ;;  %v2841_v42 = vadd.f32 1.0, %v3588_v39 }
 0x96f   :  { %v2793_v36 = vpop.f32.mrf.mxu0 }
 0x970   :  { %v2858_v46 = vadd.f32 %v2793_v36, %v4698_v32 }
 0x971   :  { %v2795_v58 = vpop.f32.mrf.mxu0 }
 0x972   :  { %v2862_v7 = vmul.f32 %v3578_v47, %v2858_v46  ;;  %v2859_v33 = vadd.f32 %v2795_v58, %v4702_v30 }
 0x973   :  { %v2797_v15 = vpop.f32.mrf.mxu0 }
 0x974   :  { %v2866_v24 = vadd.f32 %v2862_v7, %v6783_v17  ;;  %v2863_v44 = vmul.f32 %v3582_v13, %v2859_v33  ;;  %v2860_v45 = vadd.f32 %v2797_v15, %v4698_v32  ;;  %v6786_v32 = vld [vmem:[#allocation95_spill] sm:$0xff] }
 0x975   :  { %v2799_v34 = vpop.f32.mrf.mxu0 }
 0x976   :  { %3591 = vtanh.f32 %v2866_v24  ;;  %v2867_v2 = vadd.f32 %v2863_v44, %v6784_v53  ;;  %v2864_v60 = vmul.f32 %v3586_v16, %v2860_v45  ;;  %v2861_v50 = vadd.f32 %v2799_v34, %v4702_v30 }
 0x977   :  { %3593 = vrcp.f32 %v2836_v41 }
 0x978   :  { %3595 = vtanh.f32 %v2867_v2  ;;  %v2868_v35 = vadd.f32 %v2864_v60, %v6785_v4  ;;  %v2865_v11 = vmul.f32 %v3590_v59, %v2861_v50 }
 0x979   :  { %3597 = vrcp.f32 %v2837_v43 }
 0x97a   :  { %3599 = vtanh.f32 %v2868_v35  ;;  %v2869_v31 = vadd.f32 %v2865_v11, %v6786_v32 }
 0x97b   :  { %3601 = vrcp.f32 %v2840_v8 }
 0x97c   :  { %3603 = vtanh.f32 %v2869_v31 }
 0x97d   :  { %3605 = vrcp.f32 %v2841_v42 }
 0x983   :  { %v3592_v18 = vpop.eup %3591 }
 0x984   :  { %v3594_v14 = vpop.eup %3593  ;;  %v2874_v57 = vsub.f32 %v5960_v5, %v3592_v18 }
 0x985   :  { %v3596_v30 = vpop.eup %3595 }
 0x986   :  { %v3598_v29 = vpop.eup %3597  ;;  %v2878_v37 = vmul.f32 %v3594_v14, %v2874_v57  ;;  %v2875_v19 = vsub.f32 %v5963_v0, %v3596_v30 }
 0x987   :  { %v3600_v25 = vpop.eup %3599 }
 0x988   :  { %v3602_v27 = vpop.eup %3601  ;;  %v2882_v52 = vadd.f32 %v3592_v18, %v2878_v37  ;;  %v2879_v6 = vmul.f32 %v3598_v29, %v2875_v19  ;;  %v2876_v56 = vsub.f32 %v5965_v20, %v3600_v25 }
 0x989   :  { %v3604_v63 = vpop.eup %3603 }
 0x98a   :  { %2895 = vst [vmem:[%s6059_s7] sm:$0xff] %v2882_v52  ;;  %v2883_v51 = vadd.f32 %v3596_v30, %v2879_v6  ;;  %v2880_v9 = vmul.f32 %v3602_v27, %v2876_v56  ;;  %v2877_v5 = vsub.f32 %v5967_v61, %v3604_v63  ;;  %v3606_v3 = vpop.eup %3605 }
 0x98c   :  { %2896 = vst [vmem:[%s6059_s7 + $0x8] sm:$0xff] %v2883_v51  ;;  %v2884_v0 = vadd.f32 %v3600_v25, %v2880_v9  ;;  %v2881_v1 = vmul.f32 %v3606_v3, %v2877_v5 }
 0x98e   :  { %v2887_v26 = vadd.f32 %v2884_v0, %v2883_v51  ;;  %2897 = vst [vmem:[%s6059_s7 + $0x10] sm:$0xff] %v2884_v0  ;;  %v2885_v20 = vadd.f32 %v3604_v63, %v2881_v1 }
 0x990   :  { %3119 = vst [vmem:[%s6058_s6 + $0x78] sm:$0xff] %v2887_v26  ;;  %v2886_v23 = vsub.f32 %v2882_v52, %v2885_v20  ;;  %2898 = vst [vmem:[%s6059_s7 + $0x18] sm:$0xff] %v2885_v20 }
 0x992   :  { %3118 = vst [vmem:[%s6058_s6 + $0x70] sm:$0xff] %v2886_v23 }
 0x993   :  { %2907 = vsyncpa [#allocation4], 1 }

</bundles_post_ra>
